<compile_context>
chip_gen: v7x
topology: tpu7x:2x2x1
jax: 0.10.0
libtpu: 0.0.40
codegen_flags: <defaults>
</compile_context>

<pallas_src>
import functools

import jax
import jax.numpy as jnp
from jax.experimental import pallas as pl
from jax.experimental.pallas import tpu as pltpu


# ----------------------------------------------------------------------------
# Single fused kernel: encoder -> L local layers (+ x_local accumulation)
#                      -> prediction head.  All operands fully resident in VMEM.
# ----------------------------------------------------------------------------
def _polynormer_fused_kernel(xin_ref, a_ref, encw_ref, encb_ref,
                             wx_ref, bx_ref, gamma_ref, betaln_ref,
                             headw_ref, headb_ref, out_ref,
                             *, n_layers, hidden, beta, eps):
    bf16 = jnp.bfloat16

    # --- encoder: x = x_in @ W_enc + b_enc (bf16 MXU, f32 accumulation) -----
    x = jnp.dot(xin_ref[...], encw_ref[...],
                preferred_element_type=jnp.float32) + encb_ref[...]
    # input dropout: identity (eval mode)

    a = a_ref[...]                       # (N, N) bf16 normalized adjacency
    x_local = jnp.zeros_like(x)

    # --- local layers (static python loop -> unrolled) ----------------------
    for l in range(n_layers):
        w_x = wx_ref[l]                  # (H, 3H) bf16 = [W_conv | W_h | W_lin]
        b_x = bx_ref[l]                  # (1, 3H) f32  = [0      | b_h | b_lin]

        # one lane-dense matmul for all three x-side projections
        cat = jnp.dot(x.astype(bf16), w_x,
                      preferred_element_type=jnp.float32) + b_x
        xwc = cat[:, :hidden]                             # x @ W_conv (critical path)
        h = jnp.maximum(cat[:, hidden:2 * hidden], 0.0)   # gate branch
        lin = cat[:, 2 * hidden:3 * hidden]               # linear branch (+ bias)

        # weighted aggregation, reassociated: A @ (x @ W_conv)
        conv = jnp.dot(a, xwc.astype(bf16),
                       preferred_element_type=jnp.float32)
        xn = jnp.maximum(conv + lin, 0.0)
        # TODO(synk): in-layer dropout is a no-op here (eval mode / p=0).

        # polynomial gating + LayerNorm over the feature dim.
        # gamma/beta already folded with (1 - beta) in the wrapper.
        g = h * xn
        mu = jnp.mean(g, axis=-1, keepdims=True)
        var = jnp.maximum(jnp.mean(g * g, axis=-1, keepdims=True) - mu * mu, 0.0)
        ln = (g - mu) * jax.lax.rsqrt(var + eps)
        ln = ln * gamma_ref[l] + betaln_ref[l]

        x = ln + beta * xn
        x_local = x_local + x

    # --- head on x_local; output is a lane-dense 128-wide padded slab -------
    out = jnp.dot(x_local.astype(bf16), headw_ref[...],
                  preferred_element_type=jnp.float32) + headb_ref[...]
    out_ref[...] = out.astype(out_ref.dtype)


# ----------------------------------------------------------------------------
# Wrapper: weight packing / folding (trace time) + the single pallas_call
# ----------------------------------------------------------------------------
def polynormer_forward(x_in, a_norm, params, *, beta=0.5, eps=1e-5):
    n, _ = x_in.shape
    hidden = params["enc_w"].shape[1]
    dim_out = params["head_w"].shape[1]
    n_layers = len(params["local_layers"])
    bf16 = jnp.bfloat16

    # concatenated x-side weights per layer: (L, H, 3H) and (L, 1, 3H)
    # order = [W_conv | W_h | W_lin] so the conv operand lands at lane 0.
    wx = jnp.stack([
        jnp.concatenate([p["w_conv"], p["w_h"], p["w_lin"]], axis=1)
        for p in params["local_layers"]]).astype(bf16)
    bx = jnp.stack([
        jnp.concatenate([jnp.zeros_like(p["b_lin"]), p["b_h"], p["b_lin"]],
                        axis=1)
        for p in params["local_layers"]])
    # fold the (1 - beta) polynomial gate into the LayerNorm affine params
    gammas = jnp.stack([(1.0 - beta) * p["ln_gamma"]
                        for p in params["local_layers"]])
    betas_ln = jnp.stack([(1.0 - beta) * p["ln_beta"]
                          for p in params["local_layers"]])

    # lane-dense head: pad output columns up to a multiple of 128
    out_pad = ((dim_out + 127) // 128) * 128
    head_w = jnp.pad(params["head_w"], ((0, 0), (0, out_pad - dim_out)))
    head_b = jnp.pad(params["head_b"], ((0, 0), (0, out_pad - dim_out)))

    kernel = functools.partial(
        _polynormer_fused_kernel,
        n_layers=n_layers, hidden=hidden, beta=beta, eps=eps)

    vmem_spec = pl.BlockSpec(memory_space=pltpu.MemorySpace.VMEM)
    out = pl.pallas_call(
        kernel,
        out_shape=jax.ShapeDtypeStruct((n, out_pad), jnp.float32),
        in_specs=[vmem_spec] * 10,
        out_specs=vmem_spec,
        compiler_params=pltpu.CompilerParams(
            vmem_limit_bytes=32 * 1024 * 1024),
    )(x_in.astype(bf16), a_norm.astype(bf16),
      params["enc_w"].astype(bf16), params["enc_b"],
      wx, bx, gammas, betas_ln,
      head_w.astype(bf16), head_b)
    # TODO(synk): for graphs whose NxN normalized adjacency no longer fits in
    # VMEM (esp. v7x's 64 MiB), re-introduce a node-row grid with a K-tiled
    # aggregation axis + VMEM f32 accumulator instead of this fully-resident form.
    return out[:, :dim_out]


# ----------------------------------------------------------------------------
# Pure-JAX reference (mirrors the kernel's bf16 cast points) for validation
# ----------------------------------------------------------------------------
def polynormer_reference(x_in, a_norm, params, *, beta=0.5, eps=1e-5):
    bf16, f32 = jnp.bfloat16, jnp.float32
    x = jnp.dot(x_in.astype(bf16), params["enc_w"].astype(bf16),
                preferred_element_type=f32) + params["enc_b"]
    a = a_norm.astype(bf16)
    x_local = jnp.zeros_like(x)
    for p in params["local_layers"]:
        xb = x.astype(bf16)
        h = jnp.maximum(
            jnp.dot(xb, p["w_h"].astype(bf16), preferred_element_type=f32)
            + p["b_h"], 0.0)
        lin = jnp.dot(xb, p["w_lin"].astype(bf16),
                      preferred_element_type=f32) + p["b_lin"]
        xwc = jnp.dot(xb, p["w_conv"].astype(bf16), preferred_element_type=f32)
        conv = jnp.dot(a, xwc.astype(bf16), preferred_element_type=f32)
        xn = jnp.maximum(conv + lin, 0.0)
        g = h * xn
        mu = jnp.mean(g, axis=-1, keepdims=True)
        var = jnp.mean((g - mu) ** 2, axis=-1, keepdims=True)
        ln = (g - mu) * jax.lax.rsqrt(var + eps)
        ln = ln * p["ln_gamma"] + p["ln_beta"]
        x = (1.0 - beta) * ln + beta * xn
        x_local = x_local + x
    return jnp.dot(x_local.astype(bf16), params["head_w"].astype(bf16),
                   preferred_element_type=f32) + params["head_b"]


# ----------------------------------------------------------------------------
# Deterministic parameter / input construction
# ----------------------------------------------------------------------------
def make_params(key, f_in, hidden, dim_out, n_layers):
    keys = jax.random.split(key, 4 + 6 * n_layers)
    s = 0.1
    params = {
        "enc_w": s * jax.random.normal(keys[0], (f_in, hidden), jnp.float32),
        "enc_b": s * jax.random.normal(keys[1], (1, hidden), jnp.float32),
        "head_w": s * jax.random.normal(keys[2], (hidden, dim_out), jnp.float32),
        "head_b": s * jax.random.normal(keys[3], (1, dim_out), jnp.float32),
        "local_layers": [],
    }
    for l in range(n_layers):
        k = keys[4 + 6 * l: 4 + 6 * (l + 1)]
        params["local_layers"].append({
            "w_h": s * jax.random.normal(k[0], (hidden, hidden), jnp.float32),
            "b_h": s * jax.random.normal(k[1], (1, hidden), jnp.float32),
            "w_conv": s * jax.random.normal(k[2], (hidden, hidden), jnp.float32),
            "w_lin": s * jax.random.normal(k[3], (hidden, hidden), jnp.float32),
            "b_lin": s * jax.random.normal(k[4], (1, hidden), jnp.float32),
            "ln_gamma": jnp.ones((1, hidden), jnp.float32),
            "ln_beta": jnp.zeros((1, hidden), jnp.float32),
        })
    return params


def make_normalized_adjacency(key, n):
    # random symmetric graph + self loops, GCN normalization D^-1/2 (A+I) D^-1/2
    raw = jax.random.uniform(key, (n, n)) < 0.05
    adj = jnp.logical_or(raw, raw.T).astype(jnp.float32)
    adj = adj + jnp.eye(n, dtype=jnp.float32)
    deg = jnp.sum(adj, axis=1)
    d_inv_sqrt = jax.lax.rsqrt(deg)
    return adj * d_inv_sqrt[:, None] * d_inv_sqrt[None, :]


if __name__ == "__main__":
    N = 256          # number of graph nodes
    F_IN = 32        # raw node feature dim
    HIDDEN = 64      # cfg.gnn.dim_inner
    DIM_OUT = 8      # prediction head output dim
    N_LOCAL = 2      # cfg.gnn.layers_mp
    BETA = 0.5       # cfg.gt.polynormer.beta

    key = jax.random.PRNGKey(0)
    k_x, k_a, k_p = jax.random.split(key, 3)

    x_in = jax.random.normal(k_x, (N, F_IN), jnp.float32)
    a_norm = make_normalized_adjacency(k_a, N)
    params = make_params(k_p, F_IN, HIDDEN, DIM_OUT, N_LOCAL)

    out = polynormer_forward(x_in, a_norm, params, beta=BETA)
    out = jax.block_until_ready(out)
    assert out.shape == (N, DIM_OUT) and out.dtype == jnp.float32

    ref = jax.block_until_ready(
        polynormer_reference(x_in, a_norm, params, beta=BETA))
    max_err = float(jnp.max(jnp.abs(out - ref)))
    assert max_err < 5e-2, f"mismatch vs reference: max abs err = {max_err}"
    print("KERNEL_OK")
</pallas_src>

<mosaic_0001>
module attributes {stable_mosaic.version = 11 : i64} {
  func.func @_polynormer_fused_kernel(%arg0: memref<256x32xbf16, #tpu.memory_space<vmem>>, %arg1: memref<256x256xbf16, #tpu.memory_space<vmem>>, %arg2: memref<32x64xbf16, #tpu.memory_space<vmem>>, %arg3: memref<1x64xf32, #tpu.memory_space<vmem>>, %arg4: memref<2x64x192xbf16, #tpu.memory_space<vmem>>, %arg5: memref<2x1x192xf32, #tpu.memory_space<vmem>>, %arg6: memref<2x1x64xf32, #tpu.memory_space<vmem>>, %arg7: memref<2x1x64xf32, #tpu.memory_space<vmem>>, %arg8: memref<64x128xbf16, #tpu.memory_space<vmem>>, %arg9: memref<1x128xf32, #tpu.memory_space<vmem>>, %arg10: memref<256x128xf32, #tpu.memory_space<vmem>>) attributes {dimension_semantics = [], scalar_prefetch = 0 : i64, scratch_operands = 0 : i64, tpu.core_type = #tpu.core_type<tc>} {
    %c0 = arith.constant 0 : index
    %c0_0 = arith.constant 0 : index
    %0 = vector.load %arg0[%c0, %c0_0] : memref<256x32xbf16, #tpu.memory_space<vmem>>, vector<256x32xbf16>
    %c0_1 = arith.constant 0 : index
    %c0_2 = arith.constant 0 : index
    %1 = vector.load %arg2[%c0_1, %c0_2] : memref<32x64xbf16, #tpu.memory_space<vmem>>, vector<32x64xbf16>
    %cst = arith.constant dense<0.000000e+00> : vector<256x64xf32>
    %2 = tpu.matmul %0, %1, %cst {dimension_numbers = #tpu.dot_dimension_numbers<[1], [0], [0], [1], [0, 0, 1, 1], [], []>} : vector<256x32xbf16>, vector<32x64xbf16>, vector<256x64xf32> -> vector<256x64xf32>
    %c0_3 = arith.constant 0 : index
    %c0_4 = arith.constant 0 : index
    %3 = vector.load %arg3[%c0_3, %c0_4] : memref<1x64xf32, #tpu.memory_space<vmem>>, vector<1x64xf32>
    %4 = vector.broadcast %3 : vector<1x64xf32> to vector<256x64xf32>
    %5 = arith.addf %2, %4 : vector<256x64xf32>
    %c0_5 = arith.constant 0 : index
    %c0_6 = arith.constant 0 : index
    %6 = vector.load %arg1[%c0_5, %c0_6] : memref<256x256xbf16, #tpu.memory_space<vmem>>, vector<256x256xbf16>
    %cst_7 = arith.constant 0.000000e+00 : f32
    %7 = vector.broadcast %cst_7 : f32 to vector<256x64xf32>
    %c0_8 = arith.constant 0 : index
    %c0_9 = arith.constant 0 : index
    %c0_10 = arith.constant 0 : index
    %8 = vector.load %arg4[%c0_8, %c0_9, %c0_10] : memref<2x64x192xbf16, #tpu.memory_space<vmem>>, vector<1x64x192xbf16>
    %9 = vector.shape_cast %8 : vector<1x64x192xbf16> to vector<64x192xbf16>
    %c0_11 = arith.constant 0 : index
    %c0_12 = arith.constant 0 : index
    %c0_13 = arith.constant 0 : index
    %10 = vector.load %arg5[%c0_11, %c0_12, %c0_13] : memref<2x1x192xf32, #tpu.memory_space<vmem>>, vector<1x1x192xf32>
    %11 = vector.shape_cast %10 : vector<1x1x192xf32> to vector<1x192xf32>
    %12 = arith.truncf %5 : vector<256x64xf32> to vector<256x64xbf16>
    %cst_14 = arith.constant dense<0.000000e+00> : vector<256x192xf32>
    %13 = tpu.matmul %12, %9, %cst_14 {dimension_numbers = #tpu.dot_dimension_numbers<[1], [0], [0], [1], [0, 0, 1, 1], [], []>} : vector<256x64xbf16>, vector<64x192xbf16>, vector<256x192xf32> -> vector<256x192xf32>
    %14 = vector.broadcast %11 : vector<1x192xf32> to vector<256x192xf32>
    %15 = arith.addf %13, %14 : vector<256x192xf32>
    %16 = vector.extract_strided_slice %15 {offsets = [0, 0], sizes = [256, 64], strides = [1, 1]} : vector<256x192xf32> to vector<256x64xf32>
    %17 = vector.extract_strided_slice %15 {offsets = [0, 64], sizes = [256, 64], strides = [1, 1]} : vector<256x192xf32> to vector<256x64xf32>
    %cst_15 = arith.constant 0.000000e+00 : f32
    %18 = vector.broadcast %cst_15 : f32 to vector<256x64xf32>
    %19 = arith.maximumf %17, %18 : vector<256x64xf32>
    %20 = vector.extract_strided_slice %15 {offsets = [0, 128], sizes = [256, 64], strides = [1, 1]} : vector<256x192xf32> to vector<256x64xf32>
    %21 = arith.truncf %16 : vector<256x64xf32> to vector<256x64xbf16>
    %cst_16 = arith.constant dense<0.000000e+00> : vector<256x64xf32>
    %22 = tpu.matmul %6, %21, %cst_16 {dimension_numbers = #tpu.dot_dimension_numbers<[1], [0], [0], [1], [0, 0, 1, 1], [], []>} : vector<256x256xbf16>, vector<256x64xbf16>, vector<256x64xf32> -> vector<256x64xf32>
    %23 = arith.addf %22, %20 : vector<256x64xf32>
    %cst_17 = arith.constant 0.000000e+00 : f32
    %24 = vector.broadcast %cst_17 : f32 to vector<256x64xf32>
    %25 = arith.maximumf %23, %24 : vector<256x64xf32>
    %26 = arith.mulf %19, %25 : vector<256x64xf32>
    %cst_18 = arith.constant dense<0.000000e+00> : vector<256xf32>
    %27 = vector.multi_reduction <add>, %26, %cst_18 [1] : vector<256x64xf32> to vector<256xf32>
    %28 = vector.shape_cast %27 : vector<256xf32> to vector<256x1xf32>
    %cst_19 = arith.constant 6.400000e+01 : f32
    %29 = vector.broadcast %cst_19 : f32 to vector<256x1xf32>
    %30 = arith.divf %28, %29 : vector<256x1xf32>
    %31 = arith.mulf %26, %26 : vector<256x64xf32>
    %cst_20 = arith.constant dense<0.000000e+00> : vector<256xf32>
    %32 = vector.multi_reduction <add>, %31, %cst_20 [1] : vector<256x64xf32> to vector<256xf32>
    %33 = vector.shape_cast %32 : vector<256xf32> to vector<256x1xf32>
    %cst_21 = arith.constant 6.400000e+01 : f32
    %34 = vector.broadcast %cst_21 : f32 to vector<256x1xf32>
    %35 = arith.divf %33, %34 : vector<256x1xf32>
    %36 = arith.mulf %30, %30 : vector<256x1xf32>
    %37 = arith.subf %35, %36 : vector<256x1xf32>
    %cst_22 = arith.constant 0.000000e+00 : f32
    %38 = vector.broadcast %cst_22 : f32 to vector<256x1xf32>
    %39 = arith.maximumf %37, %38 : vector<256x1xf32>
    %40 = vector.broadcast %30 : vector<256x1xf32> to vector<256x64xf32>
    %41 = arith.subf %26, %40 : vector<256x64xf32>
    %cst_23 = arith.constant 9.99999974E-6 : f32
    %42 = vector.broadcast %cst_23 : f32 to vector<256x1xf32>
    %43 = arith.addf %39, %42 : vector<256x1xf32>
    %44 = math.rsqrt %43 : vector<256x1xf32>
    %45 = vector.broadcast %44 : vector<256x1xf32> to vector<256x64xf32>
    %46 = arith.mulf %41, %45 : vector<256x64xf32>
    %c0_24 = arith.constant 0 : index
    %c0_25 = arith.constant 0 : index
    %c0_26 = arith.constant 0 : index
    %47 = vector.load %arg6[%c0_24, %c0_25, %c0_26] : memref<2x1x64xf32, #tpu.memory_space<vmem>>, vector<1x1x64xf32>
    %48 = vector.shape_cast %47 : vector<1x1x64xf32> to vector<1x64xf32>
    %49 = vector.broadcast %48 : vector<1x64xf32> to vector<256x64xf32>
    %50 = arith.mulf %46, %49 : vector<256x64xf32>
    %c0_27 = arith.constant 0 : index
    %c0_28 = arith.constant 0 : index
    %c0_29 = arith.constant 0 : index
    %51 = vector.load %arg7[%c0_27, %c0_28, %c0_29] : memref<2x1x64xf32, #tpu.memory_space<vmem>>, vector<1x1x64xf32>
    %52 = vector.shape_cast %51 : vector<1x1x64xf32> to vector<1x64xf32>
    %53 = vector.broadcast %52 : vector<1x64xf32> to vector<256x64xf32>
    %54 = arith.addf %50, %53 : vector<256x64xf32>
    %cst_30 = arith.constant 5.000000e-01 : f32
    %55 = vector.broadcast %cst_30 : f32 to vector<256x64xf32>
    %56 = arith.mulf %55, %25 : vector<256x64xf32>
    %57 = arith.addf %54, %56 : vector<256x64xf32>
    %58 = arith.addf %7, %57 : vector<256x64xf32>
    %c1 = arith.constant 1 : index
    %c0_31 = arith.constant 0 : index
    %c0_32 = arith.constant 0 : index
    %59 = vector.load %arg4[%c1, %c0_31, %c0_32] : memref<2x64x192xbf16, #tpu.memory_space<vmem>>, vector<1x64x192xbf16>
    %60 = vector.shape_cast %59 : vector<1x64x192xbf16> to vector<64x192xbf16>
    %c1_33 = arith.constant 1 : index
    %c0_34 = arith.constant 0 : index
    %c0_35 = arith.constant 0 : index
    %61 = vector.load %arg5[%c1_33, %c0_34, %c0_35] : memref<2x1x192xf32, #tpu.memory_space<vmem>>, vector<1x1x192xf32>
    %62 = vector.shape_cast %61 : vector<1x1x192xf32> to vector<1x192xf32>
    %63 = arith.truncf %57 : vector<256x64xf32> to vector<256x64xbf16>
    %cst_36 = arith.constant dense<0.000000e+00> : vector<256x192xf32>
    %64 = tpu.matmul %63, %60, %cst_36 {dimension_numbers = #tpu.dot_dimension_numbers<[1], [0], [0], [1], [0, 0, 1, 1], [], []>} : vector<256x64xbf16>, vector<64x192xbf16>, vector<256x192xf32> -> vector<256x192xf32>
    %65 = vector.broadcast %62 : vector<1x192xf32> to vector<256x192xf32>
    %66 = arith.addf %64, %65 : vector<256x192xf32>
    %67 = vector.extract_strided_slice %66 {offsets = [0, 0], sizes = [256, 64], strides = [1, 1]} : vector<256x192xf32> to vector<256x64xf32>
    %68 = vector.extract_strided_slice %66 {offsets = [0, 64], sizes = [256, 64], strides = [1, 1]} : vector<256x192xf32> to vector<256x64xf32>
    %cst_37 = arith.constant 0.000000e+00 : f32
    %69 = vector.broadcast %cst_37 : f32 to vector<256x64xf32>
    %70 = arith.maximumf %68, %69 : vector<256x64xf32>
    %71 = vector.extract_strided_slice %66 {offsets = [0, 128], sizes = [256, 64], strides = [1, 1]} : vector<256x192xf32> to vector<256x64xf32>
    %72 = arith.truncf %67 : vector<256x64xf32> to vector<256x64xbf16>
    %cst_38 = arith.constant dense<0.000000e+00> : vector<256x64xf32>
    %73 = tpu.matmul %6, %72, %cst_38 {dimension_numbers = #tpu.dot_dimension_numbers<[1], [0], [0], [1], [0, 0, 1, 1], [], []>} : vector<256x256xbf16>, vector<256x64xbf16>, vector<256x64xf32> -> vector<256x64xf32>
    %74 = arith.addf %73, %71 : vector<256x64xf32>
    %cst_39 = arith.constant 0.000000e+00 : f32
    %75 = vector.broadcast %cst_39 : f32 to vector<256x64xf32>
    %76 = arith.maximumf %74, %75 : vector<256x64xf32>
    %77 = arith.mulf %70, %76 : vector<256x64xf32>
    %cst_40 = arith.constant dense<0.000000e+00> : vector<256xf32>
    %78 = vector.multi_reduction <add>, %77, %cst_40 [1] : vector<256x64xf32> to vector<256xf32>
    %79 = vector.shape_cast %78 : vector<256xf32> to vector<256x1xf32>
    %cst_41 = arith.constant 6.400000e+01 : f32
    %80 = vector.broadcast %cst_41 : f32 to vector<256x1xf32>
    %81 = arith.divf %79, %80 : vector<256x1xf32>
    %82 = arith.mulf %77, %77 : vector<256x64xf32>
    %cst_42 = arith.constant dense<0.000000e+00> : vector<256xf32>
    %83 = vector.multi_reduction <add>, %82, %cst_42 [1] : vector<256x64xf32> to vector<256xf32>
    %84 = vector.shape_cast %83 : vector<256xf32> to vector<256x1xf32>
    %cst_43 = arith.constant 6.400000e+01 : f32
    %85 = vector.broadcast %cst_43 : f32 to vector<256x1xf32>
    %86 = arith.divf %84, %85 : vector<256x1xf32>
    %87 = arith.mulf %81, %81 : vector<256x1xf32>
    %88 = arith.subf %86, %87 : vector<256x1xf32>
    %cst_44 = arith.constant 0.000000e+00 : f32
    %89 = vector.broadcast %cst_44 : f32 to vector<256x1xf32>
    %90 = arith.maximumf %88, %89 : vector<256x1xf32>
    %91 = vector.broadcast %81 : vector<256x1xf32> to vector<256x64xf32>
    %92 = arith.subf %77, %91 : vector<256x64xf32>
    %cst_45 = arith.constant 9.99999974E-6 : f32
    %93 = vector.broadcast %cst_45 : f32 to vector<256x1xf32>
    %94 = arith.addf %90, %93 : vector<256x1xf32>
    %95 = math.rsqrt %94 : vector<256x1xf32>
    %96 = vector.broadcast %95 : vector<256x1xf32> to vector<256x64xf32>
    %97 = arith.mulf %92, %96 : vector<256x64xf32>
    %c1_46 = arith.constant 1 : index
    %c0_47 = arith.constant 0 : index
    %c0_48 = arith.constant 0 : index
    %98 = vector.load %arg6[%c1_46, %c0_47, %c0_48] : memref<2x1x64xf32, #tpu.memory_space<vmem>>, vector<1x1x64xf32>
    %99 = vector.shape_cast %98 : vector<1x1x64xf32> to vector<1x64xf32>
    %100 = vector.broadcast %99 : vector<1x64xf32> to vector<256x64xf32>
    %101 = arith.mulf %97, %100 : vector<256x64xf32>
    %c1_49 = arith.constant 1 : index
    %c0_50 = arith.constant 0 : index
    %c0_51 = arith.constant 0 : index
    %102 = vector.load %arg7[%c1_49, %c0_50, %c0_51] : memref<2x1x64xf32, #tpu.memory_space<vmem>>, vector<1x1x64xf32>
    %103 = vector.shape_cast %102 : vector<1x1x64xf32> to vector<1x64xf32>
    %104 = vector.broadcast %103 : vector<1x64xf32> to vector<256x64xf32>
    %105 = arith.addf %101, %104 : vector<256x64xf32>
    %cst_52 = arith.constant 5.000000e-01 : f32
    %106 = vector.broadcast %cst_52 : f32 to vector<256x64xf32>
    %107 = arith.mulf %106, %76 : vector<256x64xf32>
    %108 = arith.addf %105, %107 : vector<256x64xf32>
    %109 = arith.addf %58, %108 : vector<256x64xf32>
    %110 = arith.truncf %109 : vector<256x64xf32> to vector<256x64xbf16>
    %c0_53 = arith.constant 0 : index
    %c0_54 = arith.constant 0 : index
    %111 = vector.load %arg8[%c0_53, %c0_54] : memref<64x128xbf16, #tpu.memory_space<vmem>>, vector<64x128xbf16>
    %cst_55 = arith.constant dense<0.000000e+00> : vector<256x128xf32>
    %112 = tpu.matmul %110, %111, %cst_55 {dimension_numbers = #tpu.dot_dimension_numbers<[1], [0], [0], [1], [0, 0, 1, 1], [], []>} : vector<256x64xbf16>, vector<64x128xbf16>, vector<256x128xf32> -> vector<256x128xf32>
    %c0_56 = arith.constant 0 : index
    %c0_57 = arith.constant 0 : index
    %113 = vector.load %arg9[%c0_56, %c0_57] : memref<1x128xf32, #tpu.memory_space<vmem>>, vector<1x128xf32>
    %114 = vector.broadcast %113 : vector<1x128xf32> to vector<256x128xf32>
    %115 = arith.addf %112, %114 : vector<256x128xf32>
    %c0_58 = arith.constant 0 : index
    %c0_59 = arith.constant 0 : index
    %116 = vector.load %arg10[%c0_58, %c0_59] : memref<256x128xf32, #tpu.memory_space<vmem>>, vector<256x128xf32>
    tpu.vector_store %arg10[%c0_58, %c0_59], %115 {strides = array<i32>} : memref<256x128xf32, #tpu.memory_space<vmem>>, vector<256x128xf32>,
    return
  }
}

</mosaic_0001>

<bundles_post_ra>
// kernel: tpu_custom_call.1
= control target key start
LH: loop header
LB: loop body
LE: loop exit
PB: predicated region body
PF: predicated region fallthrough
CT: control target
= control target key end

     0   :  { %15 = vsyncpa [#allocation3], 0  ;;  %s8373_s0 = inlined_call_operand.vmem [shape: bf16[256,32], index: 0, kind: input, shape index: {}]   ;;  %s8374_s1 = inlined_call_operand.hbm [shape: bf16[256,256], index: 1, kind: input, shape index: {}]   ;;  %s8375_s2 = inlined_call_operand.hbm [shape: bf16[32,64], index: 2, kind: input, shape index: {}]   ;;  %s8376_s3 = inlined_call_operand.vmem [shape: f32[1,64], index: 3, kind: input, shape index: {}]   ;;  %s8377_s4 = inlined_call_operand.vmem [shape: bf16[2,64,192], index: 4, kind: input, shape index: {}]   ;;  %s8378_s5 = inlined_call_operand.vmem [shape: f32[2,1,192], index: 5, kind: input, shape index: {}]   ;;  %s8379_s6 = inlined_call_operand.vmem [shape: f32[2,1,64], index: 6, kind: input, shape index: {}]   ;;  %s8380_s7 = inlined_call_operand.vmem [shape: f32[2,1,64], index: 7, kind: input, shape index: {}]   ;;  %s8381_s8 = inlined_call_operand.vmem [shape: bf16[64,128], index: 8, kind: input, shape index: {}]   ;;  %s8382_s9 = inlined_call_operand.vmem [shape: f32[1,128], index: 9, kind: input, shape index: {}]   ;;  %s8383_s10 = inlined_call_operand.hbm [shape: f32[256,128], index: 10, kind: output, shape index: {}]  }
   0x1   :  { %16 = vsyncpa [#allocation6], 0 }
   0x2   :  { %17 = vsyncpa [#allocation4], 0  ;;  %s5424_s13 = smov [#allocation2]   ;;  %s5352_s17 = scalar_lea.hbm %s8374_s1, 4096 }
   0x3   :  { %s25_s14 = sshll.u32 %s5424_s13, 4  ;;  %p5353_p0 = scmp.ne.s32.totalorder %s8374_s1, %s5352_s17  ;;  %s26_s14 = int_to_ptr.vmem [resolvable:$true] %s25_s14 }
   0x4   :  { %p5356_p1 = scmp.lt.u32.totalorder %s5352_s17, %s8374_s1 }
   0x6   :  { %p5358_p2 = pnand %p5356_p1, %p5353_p0 }
   0x8   :  { %5361 = shalt.err (!%p5358_p2)
}
   0x9   :  { %s5362_s22 = scalar_lea.vmem %s26_s14, 4096  ;;  %p5367_p4 = scmp.lt.s32.totalorder %s26_s14, %s26_s14 }
   0xa   :  { %p5363_p3 = scmp.ne.s32.totalorder %s26_s14, %s5362_s22  ;;  %p5368_p5 = scmp.lt.s32.totalorder %s5362_s22, %s5362_s22 }
   0xc   :  { %p5369_p6 = por %p5368_p5, %p5367_p4 }
   0xe   :  { %p5370_p7 = pnand %p5369_p6, %p5363_p3 }
  0x10   :  { %5373 = shalt.err (!%p5370_p7)
}
  0x11   :  { %s5425_s23 = smov 128   ;;  %s5426_s24 = smov 8  }
  0x12   :  { %31 = dma.hbm_to_vmem [thread:$0]  %s8374_s1, 4096, %s26_s14, [#allocation3], %s5425_s23, %s5425_s23, %s5426_s24  }
  0x13   :  { %s5427_s27 = smov [#allocation5]   ;;  %s5374_s11 = scalar_lea.hbm %s8375_s2, 256 }
  0x14   :  { %s37_s28 = sshll.u32 %s5427_s27, 4  ;;  %p5375_p8 = scmp.ne.s32.totalorder %s8375_s2, %s5374_s11  ;;  %s38_s28 = int_to_ptr.vmem [resolvable:$true] %s37_s28 }
  0x15   :  { %p5378_p9 = scmp.lt.u32.totalorder %s5374_s11, %s8375_s2 }
  0x17   :  { %p5380_p10 = pnand %p5378_p9, %p5375_p8 }
  0x19   :  { %5383 = shalt.err (!%p5380_p10)
}
  0x1a   :  { %s5384_s17 = scalar_lea.vmem %s38_s28, 256  ;;  %p5389_p12 = scmp.lt.s32.totalorder %s38_s28, %s38_s28 }
  0x1b   :  { %p5385_p11 = scmp.ne.s32.totalorder %s38_s28, %s5384_s17  ;;  %p5390_p13 = scmp.lt.s32.totalorder %s5384_s17, %s5384_s17 }
  0x1d   :  { %p5391_p0 = por %p5390_p13, %p5389_p12 }
  0x1f   :  { %p5392_p1 = pnand %p5391_p0, %p5385_p11 }
  0x21   :  { %5395 = shalt.err (!%p5392_p1)
}
  0x22   :  { %s5428_s1 = smov 64   ;;  %s5429_s14 = smov 4  }
  0x23   :  { %43 = dma.hbm_to_vmem [thread:$0]  %s8375_s2, 256, %s38_s28, [#allocation6], %s5428_s1, %s5428_s1, %s5429_s14  }
  0x24   :  { %5418 = dma.done.wait [#allocation3], 4096  }
  0x25   :  { %5419 = vsyncadd [#allocation3], 4294963200 }
  0x26   :  { %5420 = dma.done.wait [#allocation6], 256  }
  0x27   :  { %5421 = vsyncadd [#allocation6], 4294967040  ;;  %v5099_v0 = vld [vmem:[#allocation5] sm:$0xff]   ;;  %v5100_v1 = vld [vmem:[#allocation5 + $0x8] sm:$0xff]   ;;  %vm200_vm0 = vcmask 261120   ;;  %v8385_v26 = vmov 0  }
  0x28   :  { %5015 = vmatprep.subr.bf16.mxu0 %v5099_v0  ;;  %v5101_v2 = vld [vmem:[%s8373_s0] sm:$0xff]   ;;  %v5102_v3 = vld [vmem:[%s8373_s0 + $0x8] sm:$0xff]   ;;  %v5103_v4 = vld [vmem:[%s8373_s0 + $0x10] sm:$0xff]   ;;  %599 = vmatprep.mubr.bf16.mxu1 %v8385_v26  ;;  %vm518_vm1 = vcmask 523264  }
  0x29   :  { %5016 = vmatpush3.bf16.msra.mxu0 %v5099_v0  ;;  %5019 = vmatprep.mubr.msk.bf16.mxu0 %vm200_vm0, %v5101_v2  ;;  %v5104_v5 = vld [vmem:[%s8373_s0 + $0x18] sm:$0xff]   ;;  %v5105_v6 = vld [vmem:[%s8373_s0 + $0x20] sm:$0xff]   ;;  %v5106_v9 = vld [vmem:[%s8373_s0 + $0x28] sm:$0xff]  }
  0x2a   :  { %5017 = vmatprep.subr.bf16.mxu0 %v5100_v1  ;;  %v5117_v7 = vld [vmem:[%s8377_s4 + $0x4] ss:$8 sps:$4 sm:$0xff]   ;;  %v5119_v8 = vld [vmem:[%s8377_s4] ss:$8 sps:$4 sm:$0xff]   ;;  %v5120_v10 = vld [vmem:[%s8377_s4 + $0x14] ss:$8 sps:$4 sm:$0xff]  }
  0x2b   :  { %567 = vmatprep.subr.bf16.mxu1 %v5117_v7  ;;  %v5122_v11 = vld [vmem:[%s8377_s4 + $0x10] ss:$8 sps:$4 sm:$0xff]   ;;  %v5109_v14 = vld [vmem:[%s8373_s0 + $0x40] sm:$0xff]   ;;  %v5110_v15 = vld [vmem:[%s8373_s0 + $0x48] sm:$0xff]  }
  0x2c   :  { %v5107_v12 = vld [vmem:[%s8373_s0 + $0x30] sm:$0xff]   ;;  %568 = vmatpush1.bf16.msra.mxu1 %v5119_v8  ;;  %v5108_v13 = vld [vmem:[%s8373_s0 + $0x38] sm:$0xff]   ;;  %v5113_v18 = vld [vmem:[%s8373_s0 + $0x60] sm:$0xff]  }
  0x2d   :  { %5018 = vmatpush3.bf16.msra.mxu0 %v5100_v1  ;;  %569 = vmatprep.subr.bf16.mxu1 %v5120_v10  ;;  %v5111_v16 = vld [vmem:[%s8373_s0 + $0x50] sm:$0xff]   ;;  %v5112_v17 = vld [vmem:[%s8373_s0 + $0x58] sm:$0xff]   ;;  %v5114_v19 = vld [vmem:[%s8373_s0 + $0x68] sm:$0xff]  }
  0x2e   :  { %v5115_v20 = vld [vmem:[%s8373_s0 + $0x70] sm:$0xff]   ;;  %v5116_v21 = vld [vmem:[%s8373_s0 + $0x78] sm:$0xff]   ;;  %v5123_v22 = vld [vmem:[%s8377_s4 + $0x24] ss:$8 sps:$4 sm:$0xff]  }
  0x2f   :  { %v5125_v23 = vld [vmem:[%s8377_s4 + $0x20] ss:$8 sps:$4 sm:$0xff]   ;;  %v5126_v24 = vld [vmem:[%s8377_s4 + $0x34] ss:$8 sps:$4 sm:$0xff]   ;;  %v5128_v25 = vld [vmem:[%s8377_s4 + $0x30] ss:$8 sps:$4 sm:$0xff]  }
  0x30   :  { %5020 = vmatmul.mubr.msk.bf16.vlgmr.msra.gmra.mrb[0].mxu0 %vm200_vm0, %v5102_v3  ;;  %570 = vmatpush1.bf16.msra.mxu1 %v5122_v11  ;;  %v5608_v28 = vld [vmem:[%s8376_s3] ss:$0 sm:$0xff] }
  0x31   :  { %5023 = vmatprep.mubr.msk.bf16.mxu0 %vm200_vm0, %v5103_v4  ;;  %571 = vmatprep.subr.bf16.mxu1 %v5123_v22 }
  0x34   :  { %572 = vmatpush1.bf16.msra.mxu1 %v5125_v23 }
  0x35   :  { %573 = vmatprep.subr.bf16.mxu1 %v5126_v24 }
  0x38   :  { %5024 = vmatmul.mubr.msk.bf16.gmra.mrb[4].mxu0 %vm200_vm0, %v5104_v5  ;;  %574 = vmatpush1.bf16.msra.mxu1 %v5128_v25 }
  0x39   :  { %5027 = vmatprep.mubr.msk.bf16.mxu0 %vm200_vm0, %v5105_v6 }
  0x40   :  { %5028 = vmatmul.mubr.msk.bf16.gmra.mrb[8].mxu0 %vm200_vm0, %v5106_v9 }
  0x41   :  { %5031 = vmatprep.mubr.msk.bf16.mxu0 %vm200_vm0, %v5107_v12 }
  0x48   :  { %5032 = vmatmul.mubr.msk.bf16.gmra.mrb[12].mxu0 %vm200_vm0, %v5108_v13 }
  0x49   :  { %5035 = vmatprep.mubr.msk.bf16.mxu0 %vm200_vm0, %v5109_v14 }
  0x50   :  { %5036 = vmatmul.mubr.msk.bf16.gmra.mrb[16].mxu0 %vm200_vm0, %v5110_v15 }
  0x51   :  { %5039 = vmatprep.mubr.msk.bf16.mxu0 %vm200_vm0, %v5111_v16 }
  0x58   :  { %5040 = vmatmul.mubr.msk.bf16.gmra.mrb[20].mxu0 %vm200_vm0, %v5112_v17 }
  0x59   :  { %5043 = vmatprep.mubr.msk.bf16.mxu0 %vm200_vm0, %v5113_v18 }
  0x60   :  { %5044 = vmatmul.mubr.msk.bf16.gmra.mrb[24].mxu0 %vm200_vm0, %v5114_v19 }
  0x61   :  { %5047 = vmatprep.mubr.msk.bf16.mxu0 %vm200_vm0, %v5115_v20 }
  0x68   :  { %5048 = vmatmul.mubr.msk.bf16.gmra.mrb[28].mxu0 %vm200_vm0, %v5116_v21 }
 0x103   :  { %v5021_v27 = vpop.f32.mrb[0].mxu0 }
 0x104   :  { %v283_v29 = vpop.f32.mrb[1].mxu0  ;;  %v292_v31 = vadd.f32 %v5021_v27, %v5608_v28 }
 0x105   :  { %v5022_v30 = vpop.f32.mrb[2].mxu0  ;;  %v284_v34 = vadd.f32 %v5608_v28, %v283_v29 }
 0x106   :  { %v295_v32 = vadd.f32 %v5022_v30, %v5608_v28  ;;  %v286_v33 = vpop.f32.mrb[3].mxu0 }
 0x107   :  { %v287_v35 = vadd.f32 %v5608_v28, %v286_v33 }
 0x108   :  { %v452_v36 = vpack.c.bf16 %v295_v32, %v292_v31 }
 0x109   :  { %v451_v37 = vpack.c.bf16 %v287_v35, %v284_v34 }
 0x10b   :  { %4645 = vmatmul.mubr.msk.bf16.vlgmr.msra.gmra.mrb[0].mxu1 %vm518_vm1, %v451_v37  ;;  %v5025_v38 = vpop.f32.mrb[4].mxu0 }
 0x10c   :  { %v308_v39 = vadd.f32 %v5025_v38, %v5608_v28  ;;  %v299_v40 = vpop.f32.mrb[5].mxu0  ;;  %609 = vmatprep.mubr.bf16.mxu1 %v8385_v26 }
 0x10d   :  { %v300_v41 = vadd.f32 %v5608_v28, %v299_v40  ;;  %v5026_v42 = vpop.f32.mrb[6].mxu0 }
 0x10e   :  { %v311_v43 = vadd.f32 %v5026_v42, %v5608_v28  ;;  %v302_v44 = vpop.f32.mrb[7].mxu0 }
 0x10f   :  { %v303_v45 = vadd.f32 %v5608_v28, %v302_v44 }
 0x110   :  { %v454_v46 = vpack.c.bf16 %v311_v43, %v308_v39 }
 0x111   :  { %v453_v47 = vpack.c.bf16 %v303_v45, %v300_v41 }
 0x113   :  { %4646 = vmatmul.mubr.msk.bf16.gmra.mrb[4].mxu1 %vm518_vm1, %v452_v36  ;;  %v5029_v48 = vpop.f32.mrb[8].mxu0 }
 0x114   :  { %619 = vmatprep.mubr.bf16.mxu1 %v8385_v26  ;;  %v324_v49 = vadd.f32 %v5029_v48, %v5608_v28  ;;  %v315_v50 = vpop.f32.mrb[9].mxu0  ;;  %v5680_v48 = vld [vmem:[%s8378_s5] sm:$0x3] }
 0x115   :  { %v316_v51 = vadd.f32 %v5608_v28, %v315_v50  ;;  %v5030_v52 = vpop.f32.mrb[10].mxu0 }
 0x116   :  { %v327_v53 = vadd.f32 %v5030_v52, %v5608_v28  ;;  %v318_v54 = vpop.f32.mrb[11].mxu0 }
 0x117   :  { %v319_v55 = vadd.f32 %v5608_v28, %v318_v54 }
 0x118   :  { %v456_v56 = vpack.c.bf16 %v327_v53, %v324_v49 }
 0x119   :  { %v455_v57 = vpack.c.bf16 %v319_v55, %v316_v51  ;;  %v5687_v51 = vld [vmem:[#allocation2 + $0x4] ss:$8 sps:$4 sm:$0xff]  }
 0x11a   :  { %1000 = vmatprep.mubr.bf16.mxu0 %v5687_v51 }
 0x11b   :  { %4647 = vmatmul.mubr.msk.bf16.gmra.mrb[8].mxu1 %vm518_vm1, %v453_v47  ;;  %v5033_v58 = vpop.f32.mrb[12].mxu0 }
 0x11c   :  { %629 = vmatprep.mubr.bf16.mxu1 %v8385_v26  ;;  %v340_v59 = vadd.f32 %v5033_v58, %v5608_v28  ;;  %v331_v60 = vpop.f32.mrb[13].mxu0 }
 0x11d   :  { %v332_v61 = vadd.f32 %v5608_v28, %v331_v60  ;;  %v5034_v62 = vpop.f32.mrb[14].mxu0 }
 0x11e   :  { %v343_v63 = vadd.f32 %v5034_v62, %v5608_v28  ;;  %v334_v0 = vpop.f32.mrb[15].mxu0 }
 0x11f   :  { %v335_v1 = vadd.f32 %v5608_v28, %v334_v0 }
 0x120   :  { %v458_v2 = vpack.c.bf16 %v343_v63, %v340_v59 }
 0x121   :  { %v457_v3 = vpack.c.bf16 %v335_v1, %v332_v61 }
 0x123   :  { %4648 = vmatmul.mubr.msk.bf16.gmra.mrb[12].mxu1 %vm518_vm1, %v454_v46  ;;  %v5037_v4 = vpop.f32.mrb[16].mxu0 }
 0x124   :  { %639 = vmatprep.mubr.bf16.mxu1 %v8385_v26  ;;  %v356_v5 = vadd.f32 %v5037_v4, %v5608_v28  ;;  %v347_v6 = vpop.f32.mrb[17].mxu0 }
 0x125   :  { %v348_v7 = vadd.f32 %v5608_v28, %v347_v6  ;;  %v5038_v8 = vpop.f32.mrb[18].mxu0 }
 0x126   :  { %v359_v9 = vadd.f32 %v5038_v8, %v5608_v28  ;;  %v350_v10 = vpop.f32.mrb[19].mxu0 }
 0x127   :  { %v351_v11 = vadd.f32 %v5608_v28, %v350_v10 }
 0x128   :  { %v460_v12 = vpack.c.bf16 %v359_v9, %v356_v5 }
 0x129   :  { %v459_v13 = vpack.c.bf16 %v351_v11, %v348_v7 }
 0x12b   :  { %4649 = vmatmul.mubr.msk.bf16.gmra.mrb[16].mxu1 %vm518_vm1, %v455_v57  ;;  %v5041_v14 = vpop.f32.mrb[20].mxu0 }
 0x12c   :  { %649 = vmatprep.mubr.bf16.mxu1 %v8385_v26  ;;  %v372_v15 = vadd.f32 %v5041_v14, %v5608_v28  ;;  %v363_v16 = vpop.f32.mrb[21].mxu0 }
 0x12d   :  { %v364_v17 = vadd.f32 %v5608_v28, %v363_v16  ;;  %v5042_v18 = vpop.f32.mrb[22].mxu0 }
 0x12e   :  { %v375_v19 = vadd.f32 %v5042_v18, %v5608_v28  ;;  %v366_v20 = vpop.f32.mrb[23].mxu0 }
 0x12f   :  { %v367_v21 = vadd.f32 %v5608_v28, %v366_v20 }
 0x130   :  { %v462_v22 = vpack.c.bf16 %v375_v19, %v372_v15 }
 0x131   :  { %v461_v23 = vpack.c.bf16 %v367_v21, %v364_v17 }
 0x133   :  { %4650 = vmatmul.mubr.msk.bf16.gmra.mrb[20].mxu1 %vm518_vm1, %v456_v56  ;;  %v5045_v24 = vpop.f32.mrb[24].mxu0 }
 0x134   :  { %659 = vmatprep.mubr.bf16.mxu1 %v8385_v26  ;;  %v388_v25 = vadd.f32 %v5045_v24, %v5608_v28  ;;  %v379_v27 = vpop.f32.mrb[25].mxu0 }
 0x135   :  { %v380_v29 = vadd.f32 %v5608_v28, %v379_v27  ;;  %v5046_v30 = vpop.f32.mrb[26].mxu0 }
 0x136   :  { %v391_v31 = vadd.f32 %v5046_v30, %v5608_v28  ;;  %v382_v32 = vpop.f32.mrb[27].mxu0 }
 0x137   :  { %v383_v33 = vadd.f32 %v5608_v28, %v382_v32 }
 0x138   :  { %v464_v34 = vpack.c.bf16 %v391_v31, %v388_v25 }
 0x139   :  { %v463_v35 = vpack.c.bf16 %v383_v33, %v380_v29 }
 0x13b   :  { %4651 = vmatmul.mubr.msk.bf16.gmra.mrb[24].mxu1 %vm518_vm1, %v457_v3  ;;  %v5049_v36 = vpop.f32.mrb[28].mxu0 }
 0x13c   :  { %669 = vmatprep.mubr.bf16.mxu1 %v8385_v26  ;;  %v404_v37 = vadd.f32 %v5049_v36, %v5608_v28  ;;  %v395_v38 = vpop.f32.mrb[29].mxu0 }
 0x13d   :  { %v396_v39 = vadd.f32 %v5608_v28, %v395_v38  ;;  %v5050_v40 = vpop.f32.mrb[30].mxu0 }
 0x13e   :  { %v407_v41 = vadd.f32 %v5050_v40, %v5608_v28  ;;  %v398_v42 = vpop.f32.mrb[31].mxu0 }
 0x13f   :  { %v399_v43 = vadd.f32 %v5608_v28, %v398_v42  ;;  %v468_v28 = vlaneseq }
 0x140   :  { %v466_v44 = vpack.c.bf16 %v407_v41, %v404_v37 }
 0x141   :  { %v465_v45 = vpack.c.bf16 %v399_v43, %v396_v39  ;;  %v5674_v46 = vshrl.u32 %v468_v28, 7 }
 0x143   :  { %4652 = vmatmul.mubr.msk.bf16.gmra.mrb[28].mxu1 %vm518_vm1, %v458_v2  ;;  %8523 = vst [vmem:[#allocation11_spill] sm:$0xff] %v5674_v46  ;;  %v8384_v47 = vsub.s32 0, %v5674_v46 }
 0x144   :  { %679 = vmatprep.mubr.bf16.mxu1 %v8385_v26 }
 0x145   :  { %v5685_v49 = vrot.slane %v5680_v48, %v8384_v47 }
 0x14b   :  { %4653 = vmatmul.mubr.msk.bf16.gmra.mrb[32].mxu1 %vm518_vm1, %v459_v13 }
 0x14c   :  { %689 = vmatprep.mubr.bf16.mxu1 %v8385_v26 }
 0x153   :  { %4654 = vmatmul.mubr.msk.bf16.gmra.mrb[36].mxu1 %vm518_vm1, %v460_v12 }
 0x154   :  { %699 = vmatprep.mubr.bf16.mxu1 %v8385_v26 }
 0x15b   :  { %4655 = vmatmul.mubr.msk.bf16.gmra.mrb[40].mxu1 %vm518_vm1, %v461_v23 }
 0x15c   :  { %709 = vmatprep.mubr.bf16.mxu1 %v8385_v26 }
 0x163   :  { %4656 = vmatmul.mubr.msk.bf16.gmra.mrb[44].mxu1 %vm518_vm1, %v462_v22 }
 0x164   :  { %719 = vmatprep.mubr.bf16.mxu1 %v8385_v26 }
 0x16b   :  { %4657 = vmatmul.mubr.msk.bf16.gmra.mrb[48].mxu1 %vm518_vm1, %v463_v35 }
 0x16c   :  { %729 = vmatprep.mubr.bf16.mxu1 %v8385_v26 }
 0x173   :  { %4658 = vmatmul.mubr.msk.bf16.gmra.mrb[52].mxu1 %vm518_vm1, %v464_v34 }
 0x174   :  { %739 = vmatprep.mubr.bf16.mxu1 %v8385_v26 }
 0x17b   :  { %4659 = vmatmul.mubr.msk.bf16.gmra.mrb[56].mxu1 %vm518_vm1, %v465_v45 }
 0x17c   :  { %749 = vmatprep.mubr.bf16.mxu1 %v8385_v26 }
 0x183   :  { %4660 = vmatmul.mubr.msk.bf16.gmra.mrb[60].mxu1 %vm518_vm1, %v466_v44 }
 0x184   :  { %2602 = vmatprep.mubr.bf16.mxu1 %v8385_v26 }
 0x1de   :  { %v601_v50 = vpop.f32.mrb[0].mxu1 }
 0x1df   :  { %v5689_v52 = vpop.f32.mrb[1].mxu1  ;;  %v5693_v54 = vadd.f32 %v601_v50, %v5685_v49 }
 0x1e0   :  { %v605_v53 = vpop.f32.mrb[2].mxu1 }
 0x1e1   :  { %v5696_v55 = vadd.f32 %v605_v53, %v5685_v49  ;;  %v5698_v56 = vpop.f32.mrb[3].mxu1 }
 0x1e3   :  { %v792_v57 = vpack.c.bf16 %v5696_v55, %v5693_v54 }
 0x1e6   :  { %v611_v58 = vpop.f32.mrb[4].mxu1 }
 0x1e7   :  { %v5702_v59 = vpop.f32.mrb[5].mxu1  ;;  %v5705_v61 = vadd.f32 %v611_v58, %v5685_v49 }
 0x1e8   :  { %v615_v60 = vpop.f32.mrb[6].mxu1 }
 0x1e9   :  { %v5708_v62 = vadd.f32 %v615_v60, %v5685_v49  ;;  %v5710_v63 = vpop.f32.mrb[7].mxu1 }
 0x1eb   :  { %v793_v0 = vpack.c.bf16 %v5708_v62, %v5705_v61 }
 0x1ee   :  { %v621_v1 = vpop.f32.mrb[8].mxu1 }
 0x1ef   :  { %v5714_v2 = vpop.f32.mrb[9].mxu1  ;;  %v5717_v4 = vadd.f32 %v621_v1, %v5685_v49 }
 0x1f0   :  { %v625_v3 = vpop.f32.mrb[10].mxu1 }
 0x1f1   :  { %v5720_v5 = vadd.f32 %v625_v3, %v5685_v49  ;;  %v5722_v6 = vpop.f32.mrb[11].mxu1 }
 0x1f3   :  { %v794_v7 = vpack.c.bf16 %v5720_v5, %v5717_v4 }
 0x1f6   :  { %v631_v8 = vpop.f32.mrb[12].mxu1 }
 0x1f7   :  { %v5726_v9 = vpop.f32.mrb[13].mxu1  ;;  %v5729_v11 = vadd.f32 %v631_v8, %v5685_v49 }
 0x1f8   :  { %v635_v10 = vpop.f32.mrb[14].mxu1 }
 0x1f9   :  { %v5732_v12 = vadd.f32 %v635_v10, %v5685_v49  ;;  %v5734_v13 = vpop.f32.mrb[15].mxu1 }
 0x1fb   :  { %v795_v14 = vpack.c.bf16 %v5732_v12, %v5729_v11 }
 0x1fe   :  { %v641_v15 = vpop.f32.mrb[16].mxu1 }
 0x1ff   :  { %v5738_v16 = vpop.f32.mrb[17].mxu1  ;;  %v5741_v18 = vadd.f32 %v641_v15, %v5685_v49 }
 0x200   :  { %v645_v17 = vpop.f32.mrb[18].mxu1 }
 0x201   :  { %v5744_v19 = vadd.f32 %v645_v17, %v5685_v49  ;;  %v5746_v20 = vpop.f32.mrb[19].mxu1 }
 0x203   :  { %v796_v21 = vpack.c.bf16 %v5744_v19, %v5741_v18 }
 0x206   :  { %v651_v22 = vpop.f32.mrb[20].mxu1 }
 0x207   :  { %v5750_v23 = vpop.f32.mrb[21].mxu1  ;;  %v5753_v25 = vadd.f32 %v651_v22, %v5685_v49 }
 0x208   :  { %v655_v24 = vpop.f32.mrb[22].mxu1 }
 0x209   :  { %v5756_v27 = vadd.f32 %v655_v24, %v5685_v49  ;;  %v5758_v29 = vpop.f32.mrb[23].mxu1 }
 0x20e   :  { %v661_v31 = vpop.f32.mrb[24].mxu1 }
 0x20f   :  { %v5762_v32 = vpop.f32.mrb[25].mxu1  ;;  %v5765_v34 = vadd.f32 %v661_v31, %v5685_v49 }
 0x210   :  { %v665_v33 = vpop.f32.mrb[26].mxu1 }
 0x211   :  { %v5768_v35 = vadd.f32 %v665_v33, %v5685_v49  ;;  %v5770_v36 = vpop.f32.mrb[27].mxu1 }
 0x216   :  { %v671_v38 = vpop.f32.mrb[28].mxu1 }
 0x217   :  { %v5774_v39 = vpop.f32.mrb[29].mxu1  ;;  %v5777_v41 = vadd.f32 %v671_v38, %v5685_v49 }
 0x218   :  { %v675_v40 = vpop.f32.mrb[30].mxu1 }
 0x219   :  { %8524 = vst [vmem:[#allocation12_spill] sm:$0xff] %v5777_v41  ;;  %v5780_v42 = vadd.f32 %v675_v40, %v5685_v49  ;;  %v5782_v43 = vpop.f32.mrb[31].mxu1 }
 0x21b   :  { %8525 = vst [vmem:[#allocation13_spill] sm:$0xff] %v5780_v42 }
 0x21e   :  { %v681_v45 = vpop.f32.mrb[32].mxu1 }
 0x21f   :  { %v5786_v28 = vpop.f32.mrb[33].mxu1  ;;  %v5789_v53 = vadd.f32 %v681_v45, %v5685_v49 }
 0x220   :  { %v685_v50 = vpop.f32.mrb[34].mxu1 }
 0x221   :  { %8526 = vst [vmem:[#allocation14_spill] sm:$0xff] %v5789_v53  ;;  %v5792_v58 = vadd.f32 %v685_v50, %v5685_v49  ;;  %v5794_v60 = vpop.f32.mrb[35].mxu1 }
 0x223   :  { %8527 = vst [vmem:[#allocation15_spill] sm:$0xff] %v5792_v58  ;;  %v800_v1 = vpack.c.bf16 %v5792_v58, %v5789_v53  ;;  %v5141_v58 = vld [vmem:[#allocation2 + $0x44] ss:$8 sps:$4 sm:$0xff]  }
 0x225   :  { %4771 = vmatprep.subr.bf16.mxu0 %v800_v1 }
 0x226   :  { %v691_v3 = vpop.f32.mrb[36].mxu1  ;;  %4772 = vmatpush3.bf16.msra.mxu0 %v792_v57 }
 0x227   :  { %v5798_v8 = vpop.f32.mrb[37].mxu1  ;;  %v5801_v15 = vadd.f32 %v691_v3, %v5685_v49 }
 0x228   :  { %v695_v10 = vpop.f32.mrb[38].mxu1 }
 0x229   :  { %8528 = vst [vmem:[#allocation16_spill] sm:$0xff] %v5801_v15  ;;  %v5804_v17 = vadd.f32 %v695_v10, %v5685_v49  ;;  %v5806_v22 = vpop.f32.mrb[39].mxu1 }
 0x22b   :  { %8529 = vst [vmem:[#allocation17_spill] sm:$0xff] %v5804_v17  ;;  %v801_v24 = vpack.c.bf16 %v5804_v17, %v5801_v15  ;;  %v5134_v15 = vld [vmem:[#allocation2 + $0x10] ss:$8 sps:$4 sm:$0xff]  }
 0x22c   :  { %v5140_v17 = vld [vmem:[#allocation2 + $0x30] ss:$8 sps:$4 sm:$0xff]  }
 0x22d   :  { %4773 = vmatprep.subr.bf16.mxu0 %v801_v24 }
 0x22e   :  { %v701_v31 = vpop.f32.mrb[40].mxu1  ;;  %4774 = vmatpush3.bf16.msra.mxu0 %v793_v0 }
 0x22f   :  { %v5810_v33 = vpop.f32.mrb[41].mxu1  ;;  %v5813_v38 = vadd.f32 %v701_v31, %v5685_v49 }
 0x230   :  { %v705_v57 = vpop.f32.mrb[42].mxu1 }
 0x231   :  { %8530 = vst [vmem:[#allocation18_spill] sm:$0xff] %v5813_v38  ;;  %v5816_v40 = vadd.f32 %v705_v57, %v5685_v49  ;;  %v5818_v45 = vpop.f32.mrb[43].mxu1 }
 0x233   :  { %8531 = vst [vmem:[#allocation19_spill] sm:$0xff] %v5816_v40  ;;  %v802_v50 = vpack.c.bf16 %v5816_v40, %v5813_v38 }
 0x235   :  { %4775 = vmatprep.subr.bf16.mxu0 %v802_v50 }
 0x236   :  { %v711_v1 = vpop.f32.mrb[44].mxu1  ;;  %4776 = vmatpush3.bf16.msra.mxu0 %v794_v7 }
 0x237   :  { %v5822_v3 = vpop.f32.mrb[45].mxu1  ;;  %v5825_v10 = vadd.f32 %v711_v1, %v5685_v49 }
 0x238   :  { %v715_v0 = vpop.f32.mrb[46].mxu1 }
 0x239   :  { %8532 = vst [vmem:[#allocation20_spill] sm:$0xff] %v5825_v10  ;;  %v5828_v24 = vadd.f32 %v715_v0, %v5685_v49  ;;  %v5830_v31 = vpop.f32.mrb[47].mxu1 }
 0x23b   :  { %8533 = vst [vmem:[#allocation21_spill] sm:$0xff] %v5828_v24  ;;  %v803_v57 = vpack.c.bf16 %v5828_v24, %v5825_v10  ;;  %v8538_v10 = vpack.c.bf16 %v5756_v27, %v5753_v25 }
 0x23d   :  { %4777 = vmatprep.subr.bf16.mxu0 %v803_v57 }
 0x23e   :  { %v721_v47 = vpop.f32.mrb[48].mxu1  ;;  %4778 = vmatpush3.bf16.msra.mxu0 %v795_v14 }
 0x23f   :  { %v5837_v7 = vpop.f32.mrb[49].mxu1  ;;  %v5840_v1 = vadd.f32 %v721_v47, %v5685_v49 }
 0x240   :  { %v725_v50 = vpop.f32.mrb[50].mxu1 }
 0x241   :  { %8534 = vst [vmem:[#allocation22_spill] sm:$0xff] %v5840_v1  ;;  %v5843_v0 = vadd.f32 %v725_v50, %v5685_v49  ;;  %v5845_v26 = vpop.f32.mrb[51].mxu1 }
 0x243   :  { %8535 = vst [vmem:[#allocation23_spill] sm:$0xff] %v5843_v0  ;;  %v804_v44 = vpack.c.bf16 %v5843_v0, %v5840_v1 }
 0x245   :  { %4779 = vmatprep.subr.bf16.mxu0 %v804_v44 }
 0x246   :  { %v731_v57 = vpop.f32.mrb[52].mxu1  ;;  %4780 = vmatpush3.bf16.msra.mxu0 %v796_v21 }
 0x247   :  { %v5852_v14 = vpop.f32.mrb[53].mxu1  ;;  %v5855_v47 = vadd.f32 %v731_v57, %v5685_v49 }
 0x248   :  { %v735_v37 = vpop.f32.mrb[54].mxu1 }
 0x249   :  { %8536 = vst [vmem:[#allocation24_spill] sm:$0xff] %v5855_v47  ;;  %v5858_v50 = vadd.f32 %v735_v37, %v5685_v49  ;;  %v5860_v30 = vpop.f32.mrb[55].mxu1 }
 0x24b   :  { %8537 = vst [vmem:[#allocation25_spill] sm:$0xff] %v5858_v50  ;;  %v805_v1 = vpack.c.bf16 %v5858_v50, %v5855_v47  ;;  %v8541_v47 = vpack.c.bf16 %v5768_v35, %v5765_v34 }
 0x24d   :  { %4781 = vmatprep.subr.bf16.mxu0 %v805_v1 }
 0x24e   :  { %v741_v44 = vpop.f32.mrb[56].mxu1  ;;  %4782 = vmatpush3.bf16.msra.mxu0 %v8538_v10 }
 0x24f   :  { %v5867_v21 = vpop.f32.mrb[57].mxu1  ;;  %v5870_v57 = vadd.f32 %v741_v44, %v5685_v49 }
 0x250   :  { %v745_v0 = vpop.f32.mrb[58].mxu1 }
 0x251   :  { %8539 = vst [vmem:[#allocation26_spill] sm:$0xff] %v5870_v57  ;;  %v5873_v37 = vadd.f32 %v745_v0, %v5685_v49  ;;  %v5875_v38 = vpop.f32.mrb[59].mxu1 }
 0x253   :  { %8540 = vst [vmem:[#allocation27_spill] sm:$0xff] %v5873_v37  ;;  %v806_v50 = vpack.c.bf16 %v5873_v37, %v5870_v57  ;;  %v8544_v57 = vpack.c.bf16 %v5780_v42, %v5777_v41 }
 0x255   :  { %4783 = vmatprep.subr.bf16.mxu0 %v806_v50  ;;  %v5129_v50 = vld [vmem:[#allocation2] ss:$8 sps:$4 sm:$0xff]  }
 0x256   :  { %v751_v1 = vpop.f32.mrb[60].mxu1  ;;  %4784 = vmatpush3.bf16.msra.mxu0 %v8541_v47  ;;  %v5132_v47 = vld [vmem:[#allocation2 + $0x14] ss:$8 sps:$4 sm:$0xff]  }
 0x257   :  { %v5882_v10 = vpop.f32.mrb[61].mxu1  ;;  %v5885_v44 = vadd.f32 %v751_v1, %v5685_v49  ;;  %v5135_v1 = vld [vmem:[#allocation2 + $0x24] ss:$8 sps:$4 sm:$0xff]  }
 0x258   :  { %v755_v24 = vpop.f32.mrb[62].mxu1 }
 0x259   :  { %8542 = vst [vmem:[#allocation28_spill] sm:$0xff] %v5885_v44  ;;  %v5888_v0 = vadd.f32 %v755_v24, %v5685_v49  ;;  %v5890_v40 = vpop.f32.mrb[63].mxu1  ;;  %v5137_v49 = vld [vmem:[#allocation2 + $0x20] ss:$8 sps:$4 sm:$0xff]   ;;  %v5138_v24 = vld [vmem:[#allocation2 + $0x34] ss:$8 sps:$4 sm:$0xff]  }
 0x25b   :  { %8543 = vst [vmem:[#allocation29_spill] sm:$0xff] %v5888_v0  ;;  %v807_v37 = vpack.c.bf16 %v5888_v0, %v5885_v44  ;;  %v5144_v0 = vld [vmem:[#allocation2 + $0x54] ss:$8 sps:$4 sm:$0xff]   ;;  %v5147_v44 = vld [vmem:[#allocation2 + $0x64] ss:$8 sps:$4 sm:$0xff]  }
 0x25d   :  { %4785 = vmatprep.subr.bf16.mxu0 %v807_v37  ;;  %v5143_v37 = vld [vmem:[#allocation2 + $0x40] ss:$8 sps:$4 sm:$0xff]  }
 0x25e   :  { %4786 = vmatpush3.bf16.msra.mxu0 %v8544_v57  ;;  %v5146_v57 = vld [vmem:[#allocation2 + $0x50] ss:$8 sps:$4 sm:$0xff]  }
 0x261   :  { %1001 = vmatmul.mubr.bf16.vlgmr.msra.gmra.mrb[32].mxu0 %v5129_v50  ;;  %v5149_v50 = vld [vmem:[#allocation2 + $0x60] ss:$8 sps:$4 sm:$0xff]  }
 0x262   :  { %1008 = vmatprep.mubr.bf16.mxu0 %v5132_v47  ;;  %v5150_v47 = vld [vmem:[#allocation2 + $0x74] ss:$8 sps:$4 sm:$0xff]  }
 0x269   :  { %1009 = vmatmul.mubr.bf16.gmra.mrb[36].mxu0 %v5134_v15  ;;  %v5152_v15 = vld [vmem:[#allocation2 + $0x70] ss:$8 sps:$4 sm:$0xff]  }
 0x26a   :  { %1016 = vmatprep.mubr.bf16.mxu0 %v5135_v1  ;;  %v5153_v1 = vld [vmem:[#allocation2 + $0x84] ss:$8 sps:$4 sm:$0xff]  }
 0x271   :  { %1017 = vmatmul.mubr.bf16.gmra.mrb[40].mxu0 %v5137_v49  ;;  %v5155_v49 = vld [vmem:[#allocation2 + $0x80] ss:$8 sps:$4 sm:$0xff]  }
 0x272   :  { %1024 = vmatprep.mubr.bf16.mxu0 %v5138_v24  ;;  %v5156_v24 = vld [vmem:[#allocation2 + $0x94] ss:$8 sps:$4 sm:$0xff]  }
 0x279   :  { %1025 = vmatmul.mubr.bf16.gmra.mrb[44].mxu0 %v5140_v17  ;;  %v5159_v17 = vld [vmem:[#allocation2 + $0xa4] ss:$8 sps:$4 sm:$0xff]  }
 0x27a   :  { %1032 = vmatprep.mubr.bf16.mxu0 %v5141_v58  ;;  %v5158_v58 = vld [vmem:[#allocation2 + $0x90] ss:$8 sps:$4 sm:$0xff]  }
 0x281   :  { %1033 = vmatmul.mubr.bf16.gmra.mrb[48].mxu0 %v5143_v37  ;;  %v5162_v37 = vld [vmem:[#allocation2 + $0xb4] ss:$8 sps:$4 sm:$0xff]  }
 0x282   :  { %1040 = vmatprep.mubr.bf16.mxu0 %v5144_v0  ;;  %v5161_v0 = vld [vmem:[#allocation2 + $0xa0] ss:$8 sps:$4 sm:$0xff]  }
 0x289   :  { %1041 = vmatmul.mubr.bf16.gmra.mrb[52].mxu0 %v5146_v57  ;;  %v5165_v57 = vld [vmem:[#allocation2 + $0xc4] ss:$8 sps:$4 sm:$0xff]  }
 0x28a   :  { %1048 = vmatprep.mubr.bf16.mxu0 %v5147_v44  ;;  %v5164_v44 = vld [vmem:[#allocation2 + $0xb0] ss:$8 sps:$4 sm:$0xff]  }
 0x291   :  { %1049 = vmatmul.mubr.bf16.gmra.mrb[56].mxu0 %v5149_v50  ;;  %v4693_v50 = vld [vmem:[%s8379_s6] ss:$0 sm:$0xff] }
 0x292   :  { %1056 = vmatprep.mubr.bf16.mxu0 %v5150_v47  ;;  %2096 = vrot.lane.b32.xlu1 %v4693_v50, %s5428_s1  ;;  %v4694_v47 = vld [vmem:[%s8380_s7] ss:$0 sm:$0xff] }
 0x296   :  { %2137 = vrot.lane.b32.xlu1 %v4694_v47, %s5428_s1 }
 0x299   :  { %1057 = vmatmul.mubr.bf16.gmra.mrb[60].mxu0 %v5152_v15  ;;  %v5167_v15 = vld [vmem:[#allocation2 + $0xc0] ss:$8 sps:$4 sm:$0xff]  }
 0x29a   :  { %1064 = vmatprep.mubr.bf16.mxu0 %v5153_v1  ;;  %v5168_v1 = vld [vmem:[#allocation2 + $0xd4] ss:$8 sps:$4 sm:$0xff]  }
 0x2a1   :  { %1065 = vmatmul.mubr.bf16.gmra.mrb[64].mxu0 %v5155_v49  ;;  %v5170_v49 = vld [vmem:[#allocation2 + $0xd0] ss:$8 sps:$4 sm:$0xff]  }
 0x2a2   :  { %1072 = vmatprep.mubr.bf16.mxu0 %v5156_v24  ;;  %v5171_v24 = vld [vmem:[#allocation2 + $0xe4] ss:$8 sps:$4 sm:$0xff]  }
 0x2a9   :  { %1073 = vmatmul.mubr.bf16.gmra.mrb[68].mxu0 %v5158_v58  ;;  %v5173_v58 = vld [vmem:[#allocation2 + $0xe0] ss:$8 sps:$4 sm:$0xff]  }
 0x2aa   :  { %1080 = vmatprep.mubr.bf16.mxu0 %v5159_v17  ;;  %v5174_v17 = vld [vmem:[#allocation2 + $0xf4] ss:$8 sps:$4 sm:$0xff]  }
 0x2b1   :  { %1081 = vmatmul.mubr.bf16.gmra.mrb[72].mxu0 %v5161_v0  ;;  %v5176_v0 = vld [vmem:[#allocation2 + $0xf0] ss:$8 sps:$4 sm:$0xff]  }
 0x2b2   :  { %1088 = vmatprep.mubr.bf16.mxu0 %v5162_v37  ;;  %v8405_v37 = vsub.s32 1, %v5674_v46 }
 0x2b9   :  { %1089 = vmatmul.mubr.bf16.gmra.mrb[76].mxu0 %v5164_v44  ;;  %v5910_v44 = vrot.slane %v5680_v48, %v8405_v37 }
 0x2ba   :  { %1096 = vmatprep.mubr.bf16.mxu0 %v5165_v57 }
 0x2bb   :  { %v604_v47 = vadd.f32 %v5689_v52, %v5910_v44  ;;  %v614_v37 = vadd.f32 %v5702_v59, %v5910_v44  ;;  %v618_v41 = vadd.f32 %v5710_v63, %v5910_v44  ;;  %v624_v59 = vadd.f32 %v5714_v2, %v5910_v44 }
 0x2c1   :  { %1097 = vmatmul.mubr.bf16.gmra.mrb[80].mxu0 %v5167_v15 }
 0x2c2   :  { %1104 = vmatprep.mubr.bf16.mxu0 %v5168_v1 }
 0x2c9   :  { %1105 = vmatmul.mubr.bf16.gmra.mrb[84].mxu0 %v5170_v49 }
 0x2ca   :  { %1112 = vmatprep.mubr.bf16.mxu0 %v5171_v24  ;;  %v608_v24 = vadd.f32 %v5698_v56, %v5910_v44 }
 0x2d1   :  { %1113 = vmatmul.mubr.bf16.gmra.mrb[88].mxu0 %v5173_v58 }
 0x2d2   :  { %1120 = vmatprep.mubr.bf16.mxu0 %v5174_v17 }
 0x2d9   :  { %1121 = vmatmul.mubr.bf16.gmra.mrb[92].mxu0 %v5176_v0 }
 0x2da   :  { %2843 = vmatprep.mubr.bf16.mxu0 %v5687_v51 }
 0x334   :  { %v4787_v57 = vpop.f32.mrb[32].mxu0 }
 0x335   :  { %v4788_v50 = vpop.f32.mrb[33].mxu0 }
 0x336   :  { %v4789_v15 = vadd.f32 %v4788_v50, %v4787_v57  ;;  %v4790_v1 = vpop.f32.mrb[34].mxu0 }
 0x337   :  { %v4791_v49 = vpop.f32.mrb[35].mxu0 }
 0x338   :  { %v4792_v58 = vadd.f32 %v4791_v49, %v4790_v1  ;;  %v1003_v51 = vadd.f32 %v4789_v15, %v604_v47 }
 0x33a   :  { %v1006_v17 = vadd.f32 %v4792_v58, %v608_v24  ;;  %v1129_v0 = vmax.f32 %v1003_v51, 0.0 }
 0x33c   :  { %v1130_v53 = vmax.f32 %v1006_v17, 0.0  ;;  %v4793_v46 = vpop.f32.mrb[36].mxu0  ;;  %1193 = vrot.lane.b32.xlu0 %v1129_v0, %s5428_s1  ;;  %v2172_v1 = vmul.f32 0.5, %v1129_v0 }
 0x33d   :  { %v4794_v48 = vpop.f32.mrb[37].mxu0 }
 0x33e   :  { %v4795_v42 = vadd.f32 %v4794_v48, %v4793_v46  ;;  %v4796_v52 = vpop.f32.mrb[38].mxu0  ;;  %v2173_v57 = vmul.f32 0.5, %v1130_v53 }
 0x33f   :  { %v4797_v50 = vpop.f32.mrb[39].mxu0 }
 0x340   :  { %v4798_v56 = vadd.f32 %v4797_v50, %v4796_v52  ;;  %2238 = vrot.lane.b32.xlu1 %v2173_v57, %s5428_s1  ;;  %1195 = vrot.lane.b32.xlu0 %v1130_v53, %s5428_s1  ;;  %v1011_v47 = vadd.f32 %v4795_v42, %v614_v37  ;;  %v628_v42 = vadd.f32 %v5722_v6, %v5910_v44 }
 0x341   :  { %v634_v50 = vadd.f32 %v5726_v9, %v5910_v44 }
 0x342   :  { %v1131_v15 = vmax.f32 %v1011_v47, 0.0  ;;  %v1014_v49 = vadd.f32 %v4798_v56, %v618_v41 }
 0x344   :  { %v4799_v24 = vpop.f32.mrb[40].mxu0  ;;  %1197 = vrot.lane.b32.xlu1 %v1131_v15, %s5428_s1  ;;  %2236 = vrot.lane.b32.xlu0 %v2172_v1, %s5428_s1  ;;  %v1132_v51 = vmax.f32 %v1014_v49, 0.0  ;;  %v2174_v17 = vmul.f32 0.5, %v1131_v15  ;;  %v638_v49 = vadd.f32 %v5734_v13, %v5910_v44 }
 0x345   :  { %v4800_v46 = vpop.f32.mrb[41].mxu0 }
 0x346   :  { %v4801_v58 = vadd.f32 %v4800_v46, %v4799_v24  ;;  %v4802_v63 = vpop.f32.mrb[42].mxu0  ;;  %v2175_v37 = vmul.f32 0.5, %v1132_v51 }
 0x347   :  { %v4803_v48 = vpop.f32.mrb[43].mxu0 }
 0x348   :  { %v4804_v53 = vadd.f32 %v4803_v48, %v4802_v63  ;;  %1199 = vrot.lane.b32.xlu1 %v1132_v51, %s5428_s1  ;;  %2240 = vrot.lane.b32.xlu0 %v2174_v17, %s5428_s1  ;;  %v1019_v41 = vadd.f32 %v4801_v58, %v624_v59  ;;  %v644_v17 = vadd.f32 %v5738_v16, %v5910_v44 }
 0x34a   :  { %v1133_v0 = vmax.f32 %v1019_v41, 0.0  ;;  %v1022_v52 = vadd.f32 %v4804_v53, %v628_v42 }
 0x34c   :  { %v4805_v57 = vpop.f32.mrb[44].mxu0  ;;  %2242 = vrot.lane.b32.xlu1 %v2175_v37, %s5428_s1  ;;  %1201 = vrot.lane.b32.xlu0 %v1133_v0, %s5428_s1  ;;  %v1134_v47 = vmax.f32 %v1022_v52, 0.0  ;;  %v2176_v15 = vmul.f32 0.5, %v1133_v0  ;;  %v648_v37 = vadd.f32 %v5746_v20, %v5910_v44 }
 0x34d   :  { %v4806_v2 = vpop.f32.mrb[45].mxu0 }
 0x34e   :  { %v4807_v56 = vadd.f32 %v4806_v2, %v4805_v57  ;;  %v4808_v6 = vpop.f32.mrb[46].mxu0  ;;  %v2177_v59 = vmul.f32 0.5, %v1134_v47 }
 0x34f   :  { %v4809_v1 = vpop.f32.mrb[47].mxu0 }
 0x350   :  { %v4810_v24 = vadd.f32 %v4809_v1, %v4808_v6  ;;  %1203 = vrot.lane.b32.xlu1 %v1134_v47, %s5428_s1  ;;  %2244 = vrot.lane.b32.xlu0 %v2176_v15, %s5428_s1  ;;  %v1027_v46 = vadd.f32 %v4807_v56, %v634_v50  ;;  %v654_v47 = vadd.f32 %v5750_v23, %v5910_v44 }
 0x352   :  { %v1135_v58 = vmax.f32 %v1027_v46, 0.0  ;;  %v1030_v63 = vadd.f32 %v4810_v24, %v638_v49  ;;  %v658_v24 = vadd.f32 %v5758_v29, %v5910_v44 }
 0x354   :  { %v4811_v51 = vpop.f32.mrb[48].mxu0  ;;  %2246 = vrot.lane.b32.xlu1 %v2177_v59, %s5428_s1  ;;  %1205 = vrot.lane.b32.xlu0 %v1135_v58, %s5428_s1  ;;  %v1136_v42 = vmax.f32 %v1030_v63, 0.0  ;;  %v2178_v53 = vmul.f32 0.5, %v1135_v58 }
 0x355   :  { %v4812_v9 = vpop.f32.mrb[49].mxu0 }
 0x356   :  { %v4813_v48 = vadd.f32 %v4812_v9, %v4811_v51  ;;  %v4814_v13 = vpop.f32.mrb[50].mxu0  ;;  %v2179_v57 = vmul.f32 0.5, %v1136_v42 }
 0x357   :  { %v4815_v41 = vpop.f32.mrb[51].mxu0 }
 0x358   :  { %v4816_v0 = vadd.f32 %v4815_v41, %v4814_v13  ;;  %1207 = vrot.lane.b32.xlu1 %v1136_v42, %s5428_s1  ;;  %2248 = vrot.lane.b32.xlu0 %v2178_v53, %s5428_s1  ;;  %v1035_v52 = vadd.f32 %v4813_v48, %v644_v17  ;;  %v664_v48 = vadd.f32 %v5762_v32, %v5910_v44 }
 0x359   :  { %v668_v41 = vadd.f32 %v5770_v36, %v5910_v44 }
 0x35a   :  { %v1137_v2 = vmax.f32 %v1035_v52, 0.0  ;;  %v1038_v50 = vadd.f32 %v4816_v0, %v648_v37 }
 0x35c   :  { %v4817_v56 = vpop.f32.mrb[52].mxu0  ;;  %2250 = vrot.lane.b32.xlu1 %v2179_v57, %s5428_s1  ;;  %1209 = vrot.lane.b32.xlu0 %v1137_v2, %s5428_s1  ;;  %v1138_v16 = vmax.f32 %v1038_v50, 0.0  ;;  %v2180_v58 = vmul.f32 0.5, %v1137_v2 }
 0x35d   :  { %v4818_v6 = vpop.f32.mrb[53].mxu0 }
 0x35e   :  { %v4819_v20 = vadd.f32 %v4818_v6, %v4817_v56  ;;  %v4820_v15 = vpop.f32.mrb[54].mxu0  ;;  %v2181_v1 = vmul.f32 0.5, %v1138_v16 }
 0x35f   :  { %v4821_v49 = vpop.f32.mrb[55].mxu0 }
 0x360   :  { %v4822_v46 = vadd.f32 %v4821_v49, %v4820_v15  ;;  %1211 = vrot.lane.b32.xlu1 %v1138_v16, %s5428_s1  ;;  %2254 = vrot.lane.b32.xlu0 %v2181_v1, %s5428_s1  ;;  %v1043_v59 = vadd.f32 %v4819_v20, %v654_v47  ;;  %v674_v16 = vadd.f32 %v5774_v39, %v5910_v44 }
 0x361   :  { %v678_v15 = vadd.f32 %v5782_v43, %v5910_v44 }
 0x362   :  { %v1139_v63 = vmax.f32 %v1043_v59, 0.0  ;;  %v1046_v51 = vadd.f32 %v4822_v46, %v658_v24 }
 0x364   :  { %v4823_v9 = vpop.f32.mrb[56].mxu0  ;;  %2252 = vrot.lane.b32.xlu1 %v2180_v58, %s5428_s1  ;;  %1213 = vrot.lane.b32.xlu0 %v1139_v63, %s5428_s1  ;;  %v1140_v23 = vmax.f32 %v1046_v51, 0.0  ;;  %v2182_v52 = vmul.f32 0.5, %v1139_v63  ;;  %v684_v51 = vadd.f32 %v5786_v28, %v5910_v44 }
 0x365   :  { %v4824_v17 = vpop.f32.mrb[57].mxu0 }
 0x366   :  { %v4825_v29 = vadd.f32 %v4824_v17, %v4823_v9  ;;  %v4826_v13 = vpop.f32.mrb[58].mxu0  ;;  %v2183_v42 = vmul.f32 0.5, %v1140_v23 }
 0x367   :  { %v4827_v53 = vpop.f32.mrb[59].mxu0 }
 0x368   :  { %v4828_v37 = vadd.f32 %v4827_v53, %v4826_v13  ;;  %1215 = vrot.lane.b32.xlu1 %v1140_v23, %s5428_s1  ;;  %2258 = vrot.lane.b32.xlu0 %v2183_v42, %s5428_s1  ;;  %v1051_v0 = vadd.f32 %v4825_v29, %v664_v48  ;;  %v688_v48 = vadd.f32 %v5794_v60, %v5910_v44 }
 0x36a   :  { %v1141_v57 = vmax.f32 %v1051_v0, 0.0  ;;  %v1054_v2 = vadd.f32 %v4828_v37, %v668_v41  ;;  %v694_v37 = vadd.f32 %v5798_v8, %v5910_v44 }
 0x36c   :  { %v4829_v50 = vpop.f32.mrb[60].mxu0  ;;  %2256 = vrot.lane.b32.xlu1 %v2182_v52, %s5428_s1  ;;  %1217 = vrot.lane.b32.xlu0 %v1141_v57, %s5428_s1  ;;  %v1142_v32 = vmax.f32 %v1054_v2, 0.0  ;;  %v2184_v24 = vmul.f32 0.5, %v1141_v57 }
 0x36d   :  { %v4830_v56 = vpop.f32.mrb[61].mxu0 }
 0x36e   :  { %v4831_v36 = vadd.f32 %v4830_v56, %v4829_v50  ;;  %v4832_v6 = vpop.f32.mrb[62].mxu0  ;;  %v2185_v47 = vmul.f32 0.5, %v1142_v32  ;;  %v698_v50 = vadd.f32 %v5806_v22, %v5910_v44  ;;  %v704_v22 = vadd.f32 %v5810_v33, %v5910_v44 }
 0x36f   :  { %v4833_v20 = vpop.f32.mrb[63].mxu0 }
 0x370   :  { %v4834_v1 = vadd.f32 %v4833_v20, %v4832_v6  ;;  %1219 = vrot.lane.b32.xlu1 %v1142_v32, %s5428_s1  ;;  %2262 = vrot.lane.b32.xlu0 %v2185_v47, %s5428_s1  ;;  %v1059_v49 = vadd.f32 %v4831_v36, %v674_v16 }
 0x372   :  { %v1143_v46 = vmax.f32 %v1059_v49, 0.0  ;;  %v1062_v59 = vadd.f32 %v4834_v1, %v678_v15  ;;  %v708_v49 = vadd.f32 %v5818_v45, %v5910_v44 }
 0x374   :  { %v4835_v58 = vpop.f32.mrb[64].mxu0  ;;  %2260 = vrot.lane.b32.xlu1 %v2184_v24, %s5428_s1  ;;  %1221 = vrot.lane.b32.xlu0 %v1143_v46, %s5428_s1  ;;  %v1144_v39 = vmax.f32 %v1062_v59, 0.0  ;;  %v2186_v42 = vmul.f32 0.5, %v1143_v46 }
 0x375   :  { %v4836_v63 = vpop.f32.mrb[65].mxu0 }
 0x376   :  { %v4837_v43 = vadd.f32 %v4836_v63, %v4835_v58  ;;  %v4838_v9 = vpop.f32.mrb[66].mxu0  ;;  %v2187_v23 = vmul.f32 0.5, %v1144_v39 }
 0x377   :  { %v4839_v17 = vpop.f32.mrb[67].mxu0 }
 0x378   :  { %v4840_v29 = vadd.f32 %v4839_v17, %v4838_v9  ;;  %1223 = vrot.lane.b32.xlu1 %v1144_v39, %s5428_s1  ;;  %2266 = vrot.lane.b32.xlu0 %v2187_v23, %s5428_s1  ;;  %v5979_v13 = vadd.f32 %v4837_v43, %v684_v51  ;;  %v714_v51 = vadd.f32 %v5822_v3, %v5910_v44 }
 0x379   :  { %v718_v23 = vadd.f32 %v5830_v31, %v5910_v44 }
 0x37a   :  { %v8422_v53 = vmax.f32 %v5979_v13, 0.0  ;;  %v5982_v41 = vadd.f32 %v4840_v29, %v688_v48 }
 0x37c   :  { %v4841_v28 = vpop.f32.mrb[68].mxu0  ;;  %2264 = vrot.lane.b32.xlu1 %v2186_v42, %s5428_s1  ;;  %1225 = vrot.lane.b32.xlu0 %v8422_v53, %s5428_s1  ;;  %v8423_v57 = vmax.f32 %v5982_v41, 0.0 }
 0x37d   :  { %v4842_v60 = vpop.f32.mrb[69].mxu0 }
 0x37e   :  { %v4843_v0 = vadd.f32 %v4842_v60, %v4841_v28  ;;  %v4844_v52 = vpop.f32.mrb[70].mxu0 }
 0x37f   :  { %v4845_v2 = vpop.f32.mrb[71].mxu0 }
 0x380   :  { %v4846_v32 = vadd.f32 %v4845_v2, %v4844_v52  ;;  %1227 = vrot.lane.b32.xlu1 %v8423_v57, %s5428_s1  ;;  %v5996_v56 = vadd.f32 %v4843_v0, %v694_v37  ;;  %v724_v37 = vadd.f32 %v5837_v7, %v5910_v44  ;;  %v728_v2 = vadd.f32 %v5845_v26, %v5910_v44 }
 0x382   :  { %v8420_v16 = vmax.f32 %v5996_v56, 0.0  ;;  %v5999_v36 = vadd.f32 %v4846_v32, %v698_v50 }
 0x384   :  { %v4847_v8 = vpop.f32.mrb[72].mxu0  ;;  %1229 = vrot.lane.b32.xlu0 %v8420_v16, %s5428_s1  ;;  %v8421_v6 = vmax.f32 %v5999_v36, 0.0 }
 0x385   :  { %v4848_v47 = vpop.f32.mrb[73].mxu0 }
 0x386   :  { %v4849_v20 = vadd.f32 %v4848_v47, %v4847_v8  ;;  %v4850_v15 = vpop.f32.mrb[74].mxu0  ;;  %1231 = vrot.lane.b32.xlu1 %v8421_v6, %s5428_s1  ;;  %v8568_v6 = vld [vmem:[#allocation16_spill] sm:$0xff] }
 0x387   :  { %v4851_v1 = vpop.f32.mrb[75].mxu0 }
 0x388   :  { %v4852_v24 = vadd.f32 %v4851_v1, %v4850_v15  ;;  %v6012_v46 = vadd.f32 %v4849_v20, %v704_v22  ;;  %v734_v15 = vadd.f32 %v5852_v14, %v5910_v44 }
 0x38a   :  { %v8419_v59 = vmax.f32 %v6012_v46, 0.0  ;;  %v6015_v58 = vadd.f32 %v4852_v24, %v708_v49  ;;  %v738_v24 = vadd.f32 %v5860_v30, %v5910_v44 }
 0x38c   :  { %v4853_v39 = vpop.f32.mrb[76].mxu0  ;;  %1233 = vrot.lane.b32.xlu0 %v8419_v59, %s5428_s1  ;;  %v8418_v33 = vmax.f32 %v6015_v58, 0.0  ;;  %v8564_v59 = vld [vmem:[#allocation15_spill] sm:$0xff] }
 0x38d   :  { %v4854_v63 = vpop.f32.mrb[77].mxu0 }
 0x38e   :  { %v4855_v43 = vadd.f32 %v4854_v63, %v4853_v39  ;;  %v4856_v45 = vpop.f32.mrb[78].mxu0  ;;  %1235 = vrot.lane.b32.xlu1 %v8418_v33, %s5428_s1 }
 0x38f   :  { %v4857_v9 = vpop.f32.mrb[79].mxu0 }
 0x390   :  { %v4858_v17 = vadd.f32 %v4857_v9, %v4856_v45  ;;  %v6028_v48 = vadd.f32 %v4855_v43, %v714_v51 }
 0x392   :  { %v8416_v29 = vmax.f32 %v6028_v48, 0.0  ;;  %v6031_v42 = vadd.f32 %v4858_v17, %v718_v23  ;;  %v744_v23 = vadd.f32 %v5867_v21, %v5910_v44 }
 0x394   :  { %v4859_v28 = vpop.f32.mrb[80].mxu0  ;;  %1237 = vrot.lane.b32.xlu0 %v8416_v29, %s5428_s1  ;;  %v8417_v3 = vmax.f32 %v6031_v42, 0.0 }
 0x395   :  { %v4860_v60 = vpop.f32.mrb[81].mxu0 }
 0x396   :  { %v4861_v0 = vadd.f32 %v4860_v60, %v4859_v28  ;;  %v4862_v31 = vpop.f32.mrb[82].mxu0  ;;  %1239 = vrot.lane.b32.xlu1 %v8417_v3, %s5428_s1  ;;  %v6074_v28 = vpop.permute.xlu1 %2096 }
 0x397   :  { %v4863_v52 = vpop.f32.mrb[83].mxu0 }
 0x398   :  { %v4864_v50 = vadd.f32 %v4863_v52, %v4862_v31  ;;  %v6044_v32 = vadd.f32 %v4861_v0, %v724_v37  ;;  %v748_v37 = vadd.f32 %v5875_v38, %v5910_v44  ;;  %v754_v38 = vadd.f32 %v5882_v10, %v5910_v44 }
 0x39a   :  { %v8415_v8 = vmax.f32 %v6044_v32, 0.0  ;;  %v6047_v47 = vadd.f32 %v4864_v50, %v728_v2  ;;  %v6086_v50 = vpop.permute.xlu1 %2137 }
 0x39c   :  { %8545 = vst [vmem:[#allocation30_spill] sm:$0xff] %v6047_v47  ;;  %v4865_v22 = vpop.f32.mrb[84].mxu0  ;;  %1241 = vrot.lane.b32.xlu0 %v8415_v8, %s5428_s1  ;;  %v8413_v7 = vmax.f32 %v6047_v47, 0.0 }
 0x39d   :  { %v4866_v20 = vpop.f32.mrb[85].mxu0 }
 0x39e   :  { %v4867_v1 = vadd.f32 %v4866_v20, %v4865_v22  ;;  %v4868_v26 = vpop.f32.mrb[86].mxu0  ;;  %1243 = vrot.lane.b32.xlu1 %v8413_v7, %s5428_s1  ;;  %v760_v20 = vmax.f32 %v5693_v54, 0.0  ;;  %v761_v54 = vmax.f32 %v5696_v55, 0.0 }
 0x39f   :  { %v4869_v49 = vpop.f32.mrb[87].mxu0 }
 0x3a0   :  { %v4870_v39 = vadd.f32 %v4869_v49, %v4868_v26  ;;  %v6060_v63 = vadd.f32 %v4867_v1, %v734_v15 }
 0x3a2   :  { %8546 = vst [vmem:[#allocation31_spill] sm:$0xff] %v6060_v63  ;;  %v8414_v51 = vmax.f32 %v6060_v63, 0.0  ;;  %v6063_v43 = vadd.f32 %v4870_v39, %v738_v24 }
 0x3a4   :  { %8547 = vst [vmem:[#allocation32_spill] sm:$0xff] %v6063_v43  ;;  %v4871_v45 = vpop.f32.mrb[88].mxu0  ;;  %1245 = vrot.lane.b32.xlu0 %v8414_v51, %s5428_s1  ;;  %v8411_v14 = vmax.f32 %v6063_v43, 0.0 }
 0x3a5   :  { %v4872_v9 = vpop.f32.mrb[89].mxu0 }
 0x3a6   :  { %v4873_v17 = vadd.f32 %v4872_v9, %v4871_v45  ;;  %v4874_v30 = vpop.f32.mrb[90].mxu0  ;;  %1247 = vrot.lane.b32.xlu1 %v8411_v14, %s5428_s1  ;;  %v758_v45 = vadd.f32 %v5890_v40, %v5910_v44 }
 0x3a7   :  { %v4875_v60 = vpop.f32.mrb[91].mxu0 }
 0x3a8   :  { %v4876_v0 = vadd.f32 %v4875_v60, %v4874_v30  ;;  %v6078_v31 = vadd.f32 %v4873_v17, %v744_v23 }
 0x3aa   :  { %8548 = vst [vmem:[#allocation33_spill] sm:$0xff] %v6078_v31  ;;  %v8409_v52 = vmax.f32 %v6078_v31, 0.0  ;;  %v6081_v2 = vadd.f32 %v4876_v0, %v748_v37 }
 0x3ac   :  { %8549 = vst [vmem:[#allocation34_spill] sm:$0xff] %v6081_v2  ;;  %v4877_v21 = vpop.f32.mrb[92].mxu0  ;;  %1249 = vrot.lane.b32.xlu0 %v8409_v52, %s5428_s1  ;;  %v8412_v22 = vmax.f32 %v6081_v2, 0.0 }
 0x3ad   :  { %v4878_v15 = vpop.f32.mrb[93].mxu0 }
 0x3ae   :  { %v4879_v1 = vadd.f32 %v4878_v15, %v4877_v21  ;;  %v4880_v26 = vpop.f32.mrb[94].mxu0  ;;  %1251 = vrot.lane.b32.xlu1 %v8412_v22, %s5428_s1  ;;  %v1194_v49 = vpop.permute.xlu0 %1193  ;;  %v762_v21 = vmax.f32 %v5705_v61, 0.0 }
 0x3af   :  { %v6095_v24 = vmul.f32 %v1194_v49, %v760_v20  ;;  %v4881_v39 = vpop.f32.mrb[95].mxu0 }
 0x3b0   :  { %v4882_v9 = vadd.f32 %v4881_v39, %v4880_v26  ;;  %v6099_v23 = vadd.f32 %v4879_v1, %v754_v38  ;;  %v763_v26 = vmax.f32 %v5708_v62, 0.0 }
 0x3b1   :  { %1353 = vrot.lane.b32.xlu0 %v6095_v24, %s5428_s1  ;;  %v1578_v37 = vmul.f32 %v6095_v24, %v6095_v24 }
 0x3b2   :  { %8550 = vst [vmem:[#allocation35_spill] sm:$0xff] %v6099_v23  ;;  %v6104_v10 = vpop.permute.xlu1 %2238  ;;  %v1196_v17 = vpop.permute.xlu0 %1195  ;;  %v6106_v30 = vadd.f32 %v4882_v9, %v758_v45  ;;  %v8410_v0 = vmax.f32 %v6099_v23, 0.0  ;;  %v764_v9 = vmax.f32 %v5717_v4, 0.0 }
 0x3b3   :  { %v6108_v60 = vmul.f32 %v1196_v17, %v761_v54 }
 0x3b4   :  { %8551 = vst [vmem:[#allocation36_spill] sm:$0xff] %v6106_v30  ;;  %v8408_v1 = vmax.f32 %v6106_v30, 0.0 }
 0x3b5   :  { %1355 = vrot.lane.b32.xlu1 %v6108_v60, %s5428_s1  ;;  %1642 = vrot.lane.b32.xlu0 %v1578_v37, %s5428_s1  ;;  %v1579_v44 = vmul.f32 %v6108_v60, %v6108_v60 }
 0x3b6   :  { %v1198_v40 = vpop.permute.xlu1 %1197  ;;  %v6115_v55 = vpop.permute.xlu0 %2236 }
 0x3b7   :  { %v6127_v38 = vmul.f32 %v1198_v40, %v762_v21  ;;  %v765_v40 = vmax.f32 %v5720_v5, 0.0 }
 0x3b9   :  { %1644 = vrot.lane.b32.xlu1 %v1579_v44, %s5428_s1  ;;  %1253 = vrot.lane.b32.xlu0 %v8410_v0, %s5428_s1  ;;  %v1580_v45 = vmul.f32 %v6127_v38, %v6127_v38 }
 0x3ba   :  { %v1200_v20 = vpop.permute.xlu1 %1199  ;;  %v6125_v15 = vpop.permute.xlu0 %2240 }
 0x3bb   :  { %v6138_v39 = vmul.f32 %v1200_v20, %v763_v26  ;;  %v766_v26 = vmax.f32 %v5729_v11, 0.0 }
 0x3bd   :  { %1255 = vrot.lane.b32.xlu1 %v8408_v1, %s5428_s1  ;;  %1357 = vrot.lane.b32.xlu0 %v6127_v38, %s5428_s1  ;;  %v1581_v37 = vmul.f32 %v6138_v39, %v6138_v39 }
 0x3be   :  { %v6136_v61 = vpop.permute.xlu1 %2242  ;;  %v1202_v49 = vpop.permute.xlu0 %1201 }
 0x3bf   :  { %v6148_v17 = vmul.f32 %v1202_v49, %v764_v9 }
 0x3c1   :  { %1359 = vrot.lane.b32.xlu1 %v6138_v39, %s5428_s1  ;;  %1646 = vrot.lane.b32.xlu0 %v1580_v45, %s5428_s1  ;;  %v1582_v20 = vmul.f32 %v6148_v17, %v6148_v17 }
 0x3c2   :  { %v1204_v62 = vpop.permute.xlu1 %1203  ;;  %v6146_v54 = vpop.permute.xlu0 %2244 }
 0x3c3   :  { %v6158_v21 = vmul.f32 %v1204_v62, %v765_v40  ;;  %v767_v62 = vmax.f32 %v5732_v12, 0.0 }
 0x3c5   :  { %1648 = vrot.lane.b32.xlu1 %v1581_v37, %s5428_s1  ;;  %1361 = vrot.lane.b32.xlu0 %v6148_v17, %s5428_s1  ;;  %v1583_v9 = vmul.f32 %v6158_v21, %v6158_v21 }
 0x3c6   :  { %v6156_v4 = vpop.permute.xlu1 %2246  ;;  %v1206_v44 = vpop.permute.xlu0 %1205 }
 0x3c7   :  { %v6168_v45 = vmul.f32 %v1206_v44, %v766_v26  ;;  %v768_v44 = vmax.f32 %v5741_v18, 0.0 }
 0x3c9   :  { %1363 = vrot.lane.b32.xlu1 %v6158_v21, %s5428_s1  ;;  %1650 = vrot.lane.b32.xlu0 %v1582_v20, %s5428_s1  ;;  %v1584_v20 = vmul.f32 %v6168_v45, %v6168_v45 }
 0x3ca   :  { %v1208_v5 = vpop.permute.xlu1 %1207  ;;  %v6166_v49 = vpop.permute.xlu0 %2248 }
 0x3cb   :  { %v6178_v40 = vmul.f32 %v1208_v5, %v767_v62  ;;  %v769_v5 = vmax.f32 %v5744_v19, 0.0 }
 0x3cd   :  { %1652 = vrot.lane.b32.xlu1 %v1583_v9, %s5428_s1  ;;  %1365 = vrot.lane.b32.xlu0 %v6168_v45, %s5428_s1  ;;  %v1585_v1 = vmul.f32 %v6178_v40, %v6178_v40 }
 0x3ce   :  { %v6176_v11 = vpop.permute.xlu1 %2250  ;;  %v1210_v37 = vpop.permute.xlu0 %1209 }
 0x3cf   :  { %v6188_v9 = vmul.f32 %v1210_v37, %v768_v44  ;;  %v770_v37 = vmax.f32 %v5753_v25, 0.0 }
 0x3d1   :  { %1367 = vrot.lane.b32.xlu1 %v6178_v40, %s5428_s1  ;;  %1654 = vrot.lane.b32.xlu0 %v1584_v20, %s5428_s1  ;;  %v1586_v20 = vmul.f32 %v6188_v9, %v6188_v9 }
 0x3d2   :  { %v1212_v12 = vpop.permute.xlu1 %1211  ;;  %v6186_v26 = vpop.permute.xlu0 %2254 }
 0x3d3   :  { %v6198_v52 = vmul.f32 %v1212_v12, %v769_v5  ;;  %v771_v12 = vmax.f32 %v5756_v27, 0.0 }
 0x3d5   :  { %1656 = vrot.lane.b32.xlu1 %v1585_v1, %s5428_s1  ;;  %1369 = vrot.lane.b32.xlu0 %v6188_v9, %s5428_s1  ;;  %v1587_v0 = vmul.f32 %v6198_v52, %v6198_v52 }
 0x3d6   :  { %v6196_v18 = vpop.permute.xlu1 %2252  ;;  %v1214_v62 = vpop.permute.xlu0 %1213 }
 0x3d7   :  { %v6208_v44 = vmul.f32 %v1214_v62, %v770_v37  ;;  %v772_v62 = vmax.f32 %v5765_v34, 0.0 }
 0x3d9   :  { %1371 = vrot.lane.b32.xlu1 %v6198_v52, %s5428_s1  ;;  %1658 = vrot.lane.b32.xlu0 %v1586_v20, %s5428_s1  ;;  %v1588_v20 = vmul.f32 %v6208_v44, %v6208_v44 }
 0x3da   :  { %v1216_v19 = vpop.permute.xlu1 %1215  ;;  %v6206_v1 = vpop.permute.xlu0 %2258 }
 0x3db   :  { %8552 = vst [vmem:[#allocation37_spill] sm:$0xff] %v6206_v1  ;;  %v6218_v14 = vmul.f32 %v1216_v19, %v771_v12  ;;  %v773_v19 = vmax.f32 %v5768_v35, 0.0 }
 0x3dd   :  { %1660 = vrot.lane.b32.xlu1 %v1587_v0, %s5428_s1  ;;  %1373 = vrot.lane.b32.xlu0 %v6208_v44, %s5428_s1  ;;  %v1589_v22 = vmul.f32 %v6218_v14, %v6218_v14 }
 0x3de   :  { %v6216_v25 = vpop.permute.xlu1 %2256  ;;  %v1218_v5 = vpop.permute.xlu0 %1217 }
 0x3df   :  { %8553 = vst [vmem:[#allocation38_spill] sm:$0xff] %v6216_v25  ;;  %v6228_v37 = vmul.f32 %v1218_v5, %v772_v62  ;;  %v8556_v5 = vld [vmem:[#allocation12_spill] sm:$0xff] }
 0x3e0   :  { %v774_v62 = vmax.f32 %v8556_v5, 0.0 }
 0x3e1   :  { %1375 = vrot.lane.b32.xlu1 %v6218_v14, %s5428_s1  ;;  %1662 = vrot.lane.b32.xlu0 %v1588_v20, %s5428_s1  ;;  %v1590_v20 = vmul.f32 %v6228_v37, %v6228_v37 }
 0x3e2   :  { %v1220_v27 = vpop.permute.xlu1 %1219  ;;  %v6226_v0 = vpop.permute.xlu0 %2262 }
 0x3e3   :  { %8554 = vst [vmem:[#allocation39_spill] sm:$0xff] %v6226_v0  ;;  %v6238_v7 = vmul.f32 %v1220_v27, %v773_v19  ;;  %v8559_v27 = vld [vmem:[#allocation13_spill] sm:$0xff] }
 0x3e4   :  { %v775_v19 = vmax.f32 %v8559_v27, 0.0 }
 0x3e5   :  { %1664 = vrot.lane.b32.xlu1 %v1589_v22, %s5428_s1  ;;  %1377 = vrot.lane.b32.xlu0 %v6228_v37, %s5428_s1  ;;  %v1591_v8 = vmul.f32 %v6238_v7, %v6238_v7 }
 0x3e6   :  { %v6236_v34 = vpop.permute.xlu1 %2260  ;;  %v1222_v12 = vpop.permute.xlu0 %1221 }
 0x3e7   :  { %8555 = vst [vmem:[#allocation40_spill] sm:$0xff] %v6236_v34  ;;  %v6248_v51 = vmul.f32 %v1222_v12, %v774_v62  ;;  %v8562_v12 = vld [vmem:[#allocation14_spill] sm:$0xff] }
 0x3e8   :  { %v776_v62 = vmax.f32 %v8562_v12, 0.0 }
 0x3e9   :  { %1379 = vrot.lane.b32.xlu1 %v6238_v7, %s5428_s1  ;;  %1666 = vrot.lane.b32.xlu0 %v1590_v20, %s5428_s1  ;;  %8558 = vst [vmem:[#allocation41_spill] sm:$0xff] %v6248_v51  ;;  %v1592_v20 = vmul.f32 %v6248_v51, %v6248_v51 }
 0x3ea   :  { %v1224_v35 = vpop.permute.xlu1 %1223  ;;  %v6246_v22 = vpop.permute.xlu0 %2266 }
 0x3eb   :  { %8557 = vst [vmem:[#allocation12_spill] sm:$0xff] %v6246_v22  ;;  %v6258_v29 = vmul.f32 %v1224_v35, %v775_v19  ;;  %v777_v35 = vmax.f32 %v8564_v59, 0.0 }
 0x3ed   :  { %1668 = vrot.lane.b32.xlu1 %v1591_v8, %s5428_s1  ;;  %1381 = vrot.lane.b32.xlu0 %v6248_v51, %s5428_s1  ;;  %8561 = vst [vmem:[#allocation42_spill] sm:$0xff] %v6258_v29  ;;  %v1593_v8 = vmul.f32 %v6258_v29, %v6258_v29 }
 0x3ee   :  { %v6256_v5 = vpop.permute.xlu1 %2264  ;;  %v1226_v3 = vpop.permute.xlu0 %1225 }
 0x3ef   :  { %8560 = vst [vmem:[#allocation13_spill] sm:$0xff] %v6256_v5  ;;  %v6266_v27 = vmul.f32 %v1226_v3, %v776_v62 }
 0x3f1   :  { %1383 = vrot.lane.b32.xlu1 %v6258_v29, %s5428_s1  ;;  %1670 = vrot.lane.b32.xlu0 %v1592_v20, %s5428_s1  ;;  %8563 = vst [vmem:[#allocation14_spill] sm:$0xff] %v6266_v27  ;;  %v1594_v12 = vmul.f32 %v6266_v27, %v6266_v27  ;;  %v8566_v20 = vld [vmem:[#allocation17_spill] sm:$0xff] }
 0x3f2   :  { %v1228_v33 = vpop.permute.xlu1 %1227  ;;  %v779_v3 = vmax.f32 %v8566_v20, 0.0 }
 0x3f3   :  { %v6274_v19 = vmul.f32 %v1228_v33, %v777_v35  ;;  %v778_v33 = vmax.f32 %v8568_v6, 0.0  ;;  %v8569_v35 = vld [vmem:[#allocation19_spill] sm:$0xff]  ;;  %v8572_v6 = vld [vmem:[#allocation21_spill] sm:$0xff] }
 0x3f4   :  { %v781_v20 = vmax.f32 %v8569_v35, 0.0 }
 0x3f5   :  { %1672 = vrot.lane.b32.xlu1 %v1593_v8, %s5428_s1  ;;  %1385 = vrot.lane.b32.xlu0 %v6266_v27, %s5428_s1  ;;  %8565 = vst [vmem:[#allocation15_spill] sm:$0xff] %v6274_v19  ;;  %v1595_v59 = vmul.f32 %v6274_v19, %v6274_v19 }
 0x3f6   :  { %v1230_v8 = vpop.permute.xlu0 %1229 }
 0x3f7   :  { %v6291_v53 = vmul.f32 %v1230_v8, %v778_v33 }
 0x3f8   :  { %v1232_v16 = vpop.permute.xlu1 %1231 }
 0x3f9   :  { %1387 = vrot.lane.b32.xlu1 %v6274_v19, %s5428_s1  ;;  %1674 = vrot.lane.b32.xlu0 %v1594_v12, %s5428_s1  ;;  %v6282_v62 = vmul.f32 %v1232_v16, %v779_v3  ;;  %8570 = vst [vmem:[#allocation16_spill] sm:$0xff] %v6291_v53  ;;  %v1596_v16 = vmul.f32 %v6291_v53, %v6291_v53  ;;  %v783_v12 = vmax.f32 %v8572_v6, 0.0  ;;  %v8576_v6 = vld [vmem:[#allocation23_spill] sm:$0xff] }
 0x3fa   :  { %v785_v22 = vmax.f32 %v8576_v6, 0.0 }
 0x3fb   :  { %8567 = vst [vmem:[#allocation17_spill] sm:$0xff] %v6282_v62  ;;  %v1597_v3 = vmul.f32 %v6282_v62, %v6282_v62 }
 0x3fd   :  { %1676 = vrot.lane.b32.xlu1 %v1595_v59, %s5428_s1  ;;  %1391 = vrot.lane.b32.xlu0 %v6282_v62, %s5428_s1 }
 0x3fe   :  { %v1234_v59 = vpop.permute.xlu0 %1233 }
 0x400   :  { %v1236_v57 = vpop.permute.xlu1 %1235 }
 0x401   :  { %v6293_v30 = vmul.f32 %v1236_v57, %v781_v20  ;;  %1389 = vrot.lane.b32.xlu1 %v6291_v53, %s5428_s1  ;;  %v8573_v57 = vld [vmem:[#allocation18_spill] sm:$0xff]  ;;  %v8590_v53 = vld [vmem:[#allocation28_spill] sm:$0xff] }
 0x402   :  { %v780_v33 = vmax.f32 %v8573_v57, 0.0  ;;  %v790_v43 = vmax.f32 %v8590_v53, 0.0 }
 0x403   :  { %8571 = vst [vmem:[#allocation19_spill] sm:$0xff] %v6293_v30  ;;  %1395 = vrot.lane.b32.xlu0 %v6293_v30, %s5428_s1 }
 0x404   :  { %v6309_v20 = vmul.f32 %v1234_v59, %v780_v33  ;;  %v8578_v59 = vld [vmem:[#allocation20_spill] sm:$0xff] }
 0x405   :  { %1678 = vrot.lane.b32.xlu1 %v1596_v16, %s5428_s1 }
 0x406   :  { %8575 = vst [vmem:[#allocation18_spill] sm:$0xff] %v6309_v20  ;;  %v1238_v16 = vpop.permute.xlu0 %1237  ;;  %v1598_v5 = vmul.f32 %v6309_v20, %v6309_v20 }
 0x408   :  { %v1240_v8 = vpop.permute.xlu1 %1239 }
 0x409   :  { %v6306_v35 = vmul.f32 %v1240_v8, %v783_v12  ;;  %1680 = vrot.lane.b32.xlu1 %v1597_v3, %s5428_s1  ;;  %v1599_v3 = vmul.f32 %v6293_v30, %v6293_v30  ;;  %v782_v8 = vmax.f32 %v8578_v59, 0.0  ;;  %v8582_v59 = vld [vmem:[#allocation26_spill] sm:$0xff] }
 0x40b   :  { %8574 = vst [vmem:[#allocation21_spill] sm:$0xff] %v6306_v35  ;;  %1399 = vrot.lane.b32.xlu0 %v6306_v35, %s5428_s1 }
 0x40d   :  { %1393 = vrot.lane.b32.xlu1 %v6309_v20, %s5428_s1  ;;  %v8579_v20 = vld [vmem:[#allocation24_spill] sm:$0xff] }
 0x40e   :  { %v1242_v12 = vpop.permute.xlu0 %1241 }
 0x410   :  { %v1244_v31 = vpop.permute.xlu1 %1243 }
 0x411   :  { %v6318_v57 = vmul.f32 %v1244_v31, %v785_v22  ;;  %1682 = vrot.lane.b32.xlu1 %v1598_v5, %s5428_s1  ;;  %v786_v31 = vmax.f32 %v8579_v20, 0.0  ;;  %v6330_v22 = vmul.f32 %v1238_v16, %v782_v8  ;;  %v788_v8 = vmax.f32 %v8582_v59, 0.0  ;;  %v8586_v59 = vld [vmem:[#allocation25_spill] sm:$0xff] }
 0x413   :  { %8577 = vst [vmem:[#allocation23_spill] sm:$0xff] %v6318_v57  ;;  %1403 = vrot.lane.b32.xlu0 %v6318_v57, %s5428_s1  ;;  %v1603_v33 = vmul.f32 %v6318_v57, %v6318_v57  ;;  %8580 = vst [vmem:[#allocation20_spill] sm:$0xff] %v6330_v22 }
 0x415   :  { %1684 = vrot.lane.b32.xlu1 %v1599_v3, %s5428_s1  ;;  %v1600_v3 = vmul.f32 %v6330_v22, %v6330_v22 }
 0x416   :  { %v1246_v6 = vpop.permute.xlu0 %1245 }
 0x417   :  { %1692 = vrot.lane.b32.xlu0 %v1603_v33, %s5428_s1  ;;  %v6333_v5 = vmul.f32 %v1246_v6, %v786_v31  ;;  %v1601_v33 = vmul.f32 %v6306_v35, %v6306_v35  ;;  %v8583_v6 = vld [vmem:[#allocation22_spill] sm:$0xff] }
 0x418   :  { %v784_v31 = vmax.f32 %v8583_v6, 0.0 }
 0x419   :  { %8581 = vst [vmem:[#allocation24_spill] sm:$0xff] %v6333_v5  ;;  %1397 = vrot.lane.b32.xlu1 %v6330_v22, %s5428_s1  ;;  %v1604_v20 = vmul.f32 %v6333_v5, %v6333_v5  ;;  %v1248_v22 = vpop.permute.xlu1 %1247 }
 0x41a   :  { %v6352_v30 = vmul.f32 %v1242_v12, %v784_v31 }
 0x41b   :  { %1405 = vrot.lane.b32.xlu0 %v6333_v5, %s5428_s1 }
 0x41c   :  { %8585 = vst [vmem:[#allocation22_spill] sm:$0xff] %v6352_v30 }
 0x41d   :  { %1686 = vrot.lane.b32.xlu1 %v1600_v3, %s5428_s1 }
 0x41e   :  { %v1250_v16 = vpop.permute.xlu0 %1249 }
 0x41f   :  { %1694 = vrot.lane.b32.xlu0 %v1604_v20, %s5428_s1  ;;  %v6349_v57 = vmul.f32 %v1250_v16, %v788_v8  ;;  %v1602_v16 = vmul.f32 %v6352_v30, %v6352_v30  ;;  %v787_v8 = vmax.f32 %v8586_v59, 0.0 }
 0x420   :  { %v1252_v20 = vpop.permute.xlu1 %1251 }
 0x421   :  { %8584 = vst [vmem:[#allocation26_spill] sm:$0xff] %v6349_v57  ;;  %1688 = vrot.lane.b32.xlu1 %v1601_v33, %s5428_s1  ;;  %v1606_v3 = vmul.f32 %v6349_v57, %v6349_v57  ;;  %v6365_v33 = vmul.f32 %v1248_v22, %v787_v8 }
 0x423   :  { %1409 = vrot.lane.b32.xlu0 %v6349_v57, %s5428_s1  ;;  %8587 = vst [vmem:[#allocation25_spill] sm:$0xff] %v6365_v33  ;;  %v1605_v6 = vmul.f32 %v6365_v33, %v6365_v33  ;;  %v8588_v57 = vld [vmem:[#allocation27_spill] sm:$0xff]  ;;  %v1354_v8 = vpop.permute.xlu0 %1353 }
 0x424   :  { %v789_v5 = vmax.f32 %v8588_v57, 0.0 }
 0x425   :  { %1401 = vrot.lane.b32.xlu1 %v6352_v30, %s5428_s1 }
 0x427   :  { %1698 = vrot.lane.b32.xlu0 %v1606_v3, %s5428_s1  ;;  %v1356_v12 = vpop.permute.xlu1 %1355  ;;  %v6373_v3 = vmul.f32 %v1252_v20, %v789_v5  ;;  %v1643_v35 = vpop.permute.xlu0 %1642 }
 0x428   :  { %v1738_v5 = vsel %vm518_vm1, %v1643_v35, 0.0 }
 0x429   :  { %1690 = vrot.lane.b32.xlu1 %v1602_v16, %s5428_s1  ;;  %8589 = vst [vmem:[#allocation27_spill] sm:$0xff] %v6373_v3  ;;  %v1607_v22 = vmul.f32 %v6373_v3, %v6373_v3 }
 0x42b   :  { %v1645_v31 = vpop.permute.xlu1 %1644  ;;  %v1254_v23 = vpop.permute.xlu0 %1253 }
 0x42d   :  { %1407 = vrot.lane.b32.xlu1 %v6365_v33, %s5428_s1  ;;  %v1449_v33 = vsel %vm518_vm1, %v1354_v8, 0.0 }
 0x42f   :  { %v1256_v16 = vpop.permute.xlu1 %1255  ;;  %v1358_v53 = vpop.permute.xlu0 %1357 }
 0x430   :  { %v1455_v19 = vsel %vm518_vm1, %v1358_v53, 0.0 }
 0x431   :  { %1696 = vrot.lane.b32.xlu1 %v1605_v6, %s5428_s1 }
 0x433   :  { %v1360_v59 = vpop.permute.xlu1 %1359 }
 0x435   :  { %1411 = vrot.lane.b32.xlu1 %v6373_v3, %s5428_s1  ;;  %v1452_v3 = vsel %vm518_vm1, %v1356_v12, 0.0  ;;  %v8592_v12 = vld [vmem:[#allocation29_spill] sm:$0xff] }
 0x437   :  { %v1649_v30 = vpop.permute.xlu1 %1648 }
 0x438   :  { %v1747_v47 = vsel %vm518_vm1, %v1649_v30, 0.0 }
 0x439   :  { %1700 = vrot.lane.b32.xlu1 %v1607_v22, %s5428_s1  ;;  %v6384_v22 = vmul.f32 %v1254_v23, %v790_v43  ;;  %v1647_v43 = vpop.permute.xlu0 %1646 }
 0x43b   :  { %v1364_v57 = vpop.permute.xlu1 %1363  ;;  %8591 = vst [vmem:[#allocation28_spill] sm:$0xff] %v6384_v22  ;;  %v1608_v35 = vmul.f32 %v6384_v22, %v6384_v22 }
 0x43f   :  { %v1653_v20 = vpop.permute.xlu1 %1652 }
 0x443   :  { %v1368_v6 = vpop.permute.xlu1 %1367 }
 0x446   :  { %1450 = vadd.xlane.f32.xlu0 %v1449_v33  ;;  %v1741_v33 = vsel %vm518_vm1, %v1645_v31, 0.0  ;;  %v1362_v31 = vpop.permute.xlu0 %1361 }
 0x447   :  { %v1657_v62 = vpop.permute.xlu1 %1656 }
 0x44a   :  { %1739 = vadd.xlane.f32.xlu0 %v1738_v5 }
 0x44b   :  { %v1372_v2 = vpop.permute.xlu1 %1371 }
 0x44f   :  { %v6392_v8 = vpop.permute.xlu1 %1660 }
 0x453   :  { %v1376_v5 = vpop.permute.xlu1 %1375 }
 0x457   :  { %v1665_v1 = vpop.permute.xlu1 %1664 }
 0x45d   :  { %1453 = vadd.xlane.f32.xlu1 %v1452_v3  ;;  %v791_v3 = vmax.f32 %v8592_v12, 0.0 }
 0x45f   :  { %v6395_v23 = vmul.f32 %v1256_v16, %v791_v3  ;;  %v1744_v3 = vsel %vm518_vm1, %v1647_v43, 0.0  ;;  %v1458_v43 = vsel %vm518_vm1, %v1360_v59, 0.0 }
 0x460   :  { %1413 = vrot.lane.b32.xlu0 %v6384_v22, %s5428_s1  ;;  %v1651_v22 = vpop.permute.xlu0 %1650 }
 0x461   :  { %1742 = vadd.xlane.f32.xlu1 %v1741_v33  ;;  %8593 = vst [vmem:[#allocation29_spill] sm:$0xff] %v6395_v23  ;;  %v1609_v33 = vmul.f32 %v6395_v23, %v6395_v23  ;;  %v1750_v51 = vsel %vm518_vm1, %v1651_v22, 0.0 }
 0x464   :  { %1702 = vrot.lane.b32.xlu0 %v1608_v35, %s5428_s1  ;;  %v1380_v35 = vpop.permute.xlu1 %1379  ;;  %v1366_v0 = vpop.permute.xlu0 %1365 }
 0x465   :  { %v1467_v30 = vsel %vm518_vm1, %v1366_v0, 0.0  ;;  %v1476_v0 = vsel %vm518_vm1, %v1372_v2, 0.0  ;;  %v1765_v2 = vsel %vm518_vm1, %v6392_v8, 0.0 }
 0x468   :  { %v1669_v25 = vpop.permute.xlu1 %1668  ;;  %v1655_v16 = vpop.permute.xlu0 %1654 }
 0x469   :  { %v1756_v22 = vsel %vm518_vm1, %v1655_v16, 0.0 }
 0x46c   :  { %v1384_v12 = vpop.permute.xlu1 %1383  ;;  %v1370_v34 = vpop.permute.xlu0 %1369 }
 0x470   :  { %v1673_v29 = vpop.permute.xlu1 %1672  ;;  %v1659_v27 = vpop.permute.xlu0 %1658 }
 0x472   :  { %1415 = vrot.lane.b32.xlu1 %v6395_v23, %s5428_s1  ;;  %v1461_v23 = vsel %vm518_vm1, %v1362_v31, 0.0 }
 0x474   :  { %v1374_v63 = vpop.permute.xlu0 %1373 }
 0x476   :  { %1704 = vrot.lane.b32.xlu1 %v1609_v33, %s5428_s1  ;;  %v1388_v33 = vpop.permute.xlu1 %1387 }
 0x478   :  { %v1663_v31 = vpop.permute.xlu0 %1662 }
 0x47a   :  { %v1677_v53 = vpop.permute.xlu1 %1676 }
 0x47c   :  { %v1378_v59 = vpop.permute.xlu0 %1377 }
 0x47d   :  { %v1485_v8 = vsel %vm518_vm1, %v1378_v59, 0.0 }
 0x480   :  { %v1667_v16 = vpop.permute.xlu0 %1666 }
 0x483   :  { %1456 = vadd.xlane.f32.xlu0 %v1455_v19  ;;  %v1753_v19 = vsel %vm518_vm1, %v1653_v20, 0.0 }
 0x487   :  { %1745 = vadd.xlane.f32.xlu0 %v1744_v3  ;;  %v1759_v3 = vsel %vm518_vm1, %v1657_v62, 0.0 }
 0x48b   :  { %1748 = vadd.xlane.f32.xlu0 %v1747_v47  ;;  %v6410_v47 = vpop.permute.xlu1 %1389 }
 0x48f   :  { %1462 = vadd.xlane.f32.xlu0 %v1461_v23  ;;  %v1464_v23 = vsel %vm518_vm1, %v1364_v57, 0.0  ;;  %v1679_v20 = vpop.permute.xlu1 %1678 }
 0x493   :  { %1751 = vadd.xlane.f32.xlu0 %v1750_v51  ;;  %v1470_v51 = vsel %vm518_vm1, %v1368_v6, 0.0  ;;  %v6418_v57 = vpop.permute.xlu1 %1680  ;;  %v1762_v6 = vsel %vm518_vm1, %v1659_v27, 0.0 }
 0x497   :  { %1754 = vadd.xlane.f32.xlu0 %v1753_v19  ;;  %v1473_v19 = vsel %vm518_vm1, %v1370_v34, 0.0  ;;  %v1394_v62 = vpop.permute.xlu1 %1393  ;;  %v1488_v34 = vsel %vm518_vm1, %v1380_v35, 0.0 }
 0x49a   :  { %1459 = vadd.xlane.f32.xlu1 %v1458_v43  ;;  %v1482_v43 = vsel %vm518_vm1, %v1376_v5, 0.0 }
 0x49b   :  { %1468 = vadd.xlane.f32.xlu0 %v1467_v30  ;;  %v1771_v30 = vsel %vm518_vm1, %v1665_v1, 0.0  ;;  %v1683_v5 = vpop.permute.xlu1 %1682  ;;  %v1768_v1 = vsel %vm518_vm1, %v1663_v31, 0.0 }
 0x49e   :  { %1465 = vadd.xlane.f32.xlu1 %v1464_v23  ;;  %v1382_v23 = vpop.permute.xlu0 %1381 }
 0x49f   :  { %1757 = vadd.xlane.f32.xlu0 %v1756_v22  ;;  %v1479_v22 = vsel %vm518_vm1, %v1374_v63, 0.0  ;;  %v1774_v63 = vsel %vm518_vm1, %v1667_v16, 0.0  ;;  %v1491_v31 = vsel %vm518_vm1, %v1382_v23, 0.0 }
 0x4a2   :  { %1471 = vadd.xlane.f32.xlu1 %v1470_v51  ;;  %v1777_v51 = vsel %vm518_vm1, %v1669_v25, 0.0  ;;  %v1671_v27 = vpop.permute.xlu0 %1670 }
 0x4a3   :  { %1760 = vadd.xlane.f32.xlu0 %v1759_v3  ;;  %v1494_v3 = vsel %vm518_vm1, %v1384_v12, 0.0  ;;  %v1789_v12 = vsel %vm518_vm1, %v1677_v53, 0.0  ;;  %v1780_v59 = vsel %vm518_vm1, %v1671_v27, 0.0 }
 0x4a6   :  { %1477 = vadd.xlane.f32.xlu1 %v1476_v0  ;;  %v1685_v0 = vpop.permute.xlu1 %1684  ;;  %v1386_v35 = vpop.permute.xlu0 %1385 }
 0x4a7   :  { %1474 = vadd.xlane.f32.xlu0 %v1473_v19  ;;  %v1783_v19 = vsel %vm518_vm1, %v1673_v29, 0.0  ;;  %v1497_v16 = vsel %vm518_vm1, %v1386_v35, 0.0 }
 0x4aa   :  { %1483 = vadd.xlane.f32.xlu1 %v1482_v43  ;;  %v1398_v25 = vpop.permute.xlu1 %1397  ;;  %v1500_v43 = vsel %vm518_vm1, %v1388_v33, 0.0 }
 0x4ab   :  { %1763 = vadd.xlane.f32.xlu0 %v1762_v6  ;;  %v1675_v6 = vpop.permute.xlu0 %1674 }
 0x4ac   :  { %v1786_v23 = vsel %vm518_vm1, %v1675_v6, 0.0 }
 0x4ae   :  { %1772 = vadd.xlane.f32.xlu1 %v1771_v30  ;;  %v1687_v30 = vpop.permute.xlu1 %1686 }
 0x4af   :  { %1766 = vadd.xlane.f32.xlu0 %v1765_v2  ;;  %v1392_v29 = vpop.permute.xlu0 %1391  ;;  %v1792_v2 = vsel %vm518_vm1, %v1679_v20, 0.0  ;;  %v1503_v20 = vsel %vm518_vm1, %v6410_v47, 0.0  ;;  %v1804_v35 = vsel %vm518_vm1, %v1687_v30, 0.0 }
 0x4b2   :  { %1489 = vadd.xlane.f32.xlu1 %v1488_v34  ;;  %v1689_v34 = vpop.permute.xlu1 %1688 }
 0x4b3   :  { %1480 = vadd.xlane.f32.xlu0 %v1479_v22  ;;  %v1396_v33 = vpop.permute.xlu0 %1395  ;;  %v1509_v22 = vsel %vm518_vm1, %v1394_v62, 0.0 }
 0x4b6   :  { %1778 = vadd.xlane.f32.xlu1 %v1777_v51  ;;  %v1798_v51 = vsel %vm518_vm1, %v1683_v5, 0.0  ;;  %v1402_v27 = vpop.permute.xlu1 %1401  ;;  %v1795_v5 = vsel %vm518_vm1, %v6418_v57, 0.0 }
 0x4b7   :  { %1769 = vadd.xlane.f32.xlu0 %v1768_v1  ;;  %v1400_v53 = vpop.permute.xlu0 %1399 }
 0x4b8   :  { %v1518_v57 = vsel %vm518_vm1, %v1400_v53, 0.0 }
 0x4ba   :  { %1495 = vadd.xlane.f32.xlu1 %v1494_v3  ;;  %v1515_v3 = vsel %vm518_vm1, %v1398_v25, 0.0  ;;  %v1691_v62 = vpop.permute.xlu1 %1690 }
 0x4bb   :  { %1486 = vadd.xlane.f32.xlu0 %v1485_v8  ;;  %v1404_v1 = vpop.permute.xlu0 %1403  ;;  %v1506_v8 = vsel %vm518_vm1, %v1392_v29, 0.0  ;;  %v1810_v6 = vsel %vm518_vm1, %v1691_v62, 0.0  ;;  %v1807_v29 = vsel %vm518_vm1, %v1689_v34, 0.0 }
 0x4be   :  { %1784 = vadd.xlane.f32.xlu1 %v1783_v19  ;;  %v1408_v47 = vpop.permute.xlu1 %1407 }
 0x4bf   :  { %1775 = vadd.xlane.f32.xlu0 %v1774_v63  ;;  %v1693_v19 = vpop.permute.xlu0 %1692  ;;  %v1521_v63 = vsel %vm518_vm1, %v1402_v27, 0.0 }
 0x4c0   :  { %v1813_v53 = vsel %vm518_vm1, %v1693_v19, 0.0 }
 0x4c2   :  { %1501 = vadd.xlane.f32.xlu1 %v1500_v43  ;;  %v1512_v43 = vsel %vm518_vm1, %v1396_v33, 0.0 }
 0x4c3   :  { %1492 = vadd.xlane.f32.xlu0 %v1491_v31  ;;  %v1406_v25 = vpop.permute.xlu0 %1405  ;;  %v1801_v31 = vsel %vm518_vm1, %v1685_v0, 0.0  ;;  %v8594_v0 = vmax.f32 %v5982_v41, 0.0 }
 0x4c4   :  { %v1527_v27 = vsel %vm518_vm1, %v1406_v25, 0.0 }
 0x4c6   :  { %1790 = vadd.xlane.f32.xlu1 %v1789_v12  ;;  %v6453_v12 = vpop.permute.xlu1 %1696 }
 0x4c7   :  { %1781 = vadd.xlane.f32.xlu0 %v1780_v59  ;;  %v1695_v30 = vpop.permute.xlu0 %1694 }
 0x4ca   :  { %1793 = vadd.xlane.f32.xlu1 %v1792_v2  ;;  %v6456_v59 = vpop.permute.xlu1 %1411 }
 0x4cb   :  { %1498 = vadd.xlane.f32.xlu0 %v1497_v16  ;;  %v6459_v2 = vpop.permute.xlu0 %1409  ;;  %v1524_v16 = vsel %vm518_vm1, %v1404_v1, 0.0  ;;  %v1530_v1 = vsel %vm518_vm1, %v1408_v47, 0.0  ;;  %v8595_v47 = vmax.f32 %v5979_v13, 0.0  ;;  %v5180_v13 = vld [vmem:[%s8377_s4 + $0x50] ss:$8 sps:$4 sm:$0xff]  }
 0x4ce   :  { %1510 = vadd.xlane.f32.xlu1 %v1509_v22  ;;  %v6462_v33 = vpop.permute.xlu1 %1700  ;;  %v2189_v22 = vmul.f32 0.5, %v8594_v0  ;;  %v2188_v0 = vmul.f32 0.5, %v8595_v47 }
 0x4cf   :  { %1787 = vadd.xlane.f32.xlu0 %v1786_v23  ;;  %v6466_v23 = vpop.permute.xlu0 %1698 }
 0x4d2   :  { %1799 = vadd.xlane.f32.xlu1 %v1798_v51 }
 0x4d3   :  { %1504 = vadd.xlane.f32.xlu0 %v1503_v20  ;;  %v1451_v34 = vpop.xlane.xlu0 %1450 }
 0x4d4   :  { %v1546_v41 = vmul.f32 0.015625, %v1451_v34  ;;  %v5182_v34 = vld [vmem:[%s8377_s4 + $0x54] ss:$8 sps:$4 sm:$0xff]  }
 0x4d6   :  { %1516 = vadd.xlane.f32.xlu1 %v1515_v3 }
 0x4d7   :  { %1507 = vadd.xlane.f32.xlu0 %v1506_v8  ;;  %v1740_v8 = vpop.xlane.xlu0 %1739 }
 0x4da   :  { %1805 = vadd.xlane.f32.xlu1 %v1804_v35  ;;  %v1834_v35 = vmul.f32 0.015625, %v1740_v8 }
 0x4db   :  { %1796 = vadd.xlane.f32.xlu0 %v1795_v5 }
 0x4de   :  { %1522 = vadd.xlane.f32.xlu1 %v1521_v63  ;;  %v1866_v63 = vmul.f32 %v1546_v41, %v1546_v41 }
 0x4df   :  { %1513 = vadd.xlane.f32.xlu0 %v1512_v43 }
 0x4e0   :  { %v1898_v43 = vsub.f32 %v1834_v35, %v1866_v63  ;;  %v1962_v63 = vsub.f32 %v6095_v24, %v1546_v41 }
 0x4e2   :  { %1811 = vadd.xlane.f32.xlu1 %v1810_v6 }
 0x4e3   :  { %1802 = vadd.xlane.f32.xlu0 %v1801_v31  ;;  %v6472_v31 = vpop.permute.xlu0 %1413 }
 0x4e7   :  { %1519 = vadd.xlane.f32.xlu0 %v1518_v57  ;;  %v1930_v57 = vmax.f32 %v1898_v43, 0.0 }
 0x4e9   :  { %v1994_v25 = vadd.f32 1e-05, %v1930_v57 }
 0x4ea   :  { %v1454_v51 = vpop.xlane.xlu1 %1453 }
 0x4eb   :  { %1808 = vadd.xlane.f32.xlu0 %v1807_v29  ;;  %v1547_v3 = vmul.f32 0.015625, %v1454_v51 }
 0x4ed   :  { %v1867_v5 = vmul.f32 %v1547_v3, %v1547_v3  ;;  %v1963_v8 = vsub.f32 %v6108_v60, %v1547_v3 }
 0x4ee   :  { %v1743_v20 = vpop.xlane.xlu1 %1742 }
 0x4ef   :  { %1525 = vadd.xlane.f32.xlu0 %v1524_v16  ;;  %v1835_v62 = vmul.f32 0.015625, %v1743_v20  ;;  %v6474_v16 = vpop.permute.xlu0 %1702  ;;  %v1816_v20 = vsel %vm518_vm1, %v1695_v30, 0.0 }
 0x4f1   :  { %v1899_v19 = vsub.f32 %v1835_v62, %v1867_v5 }
 0x4f3   :  { %2270 = vrot.lane.b32.xlu1 %v2189_v22, %s5428_s1  ;;  %1814 = vadd.xlane.f32.xlu0 %v1813_v53  ;;  %v1931_v6 = vmax.f32 %v1899_v19, 0.0  ;;  %v5177_v22 = vld [vmem:[%s8377_s4 + $0x40] ss:$8 sps:$4 sm:$0xff]   ;;  %v5179_v53 = vld [vmem:[%s8377_s4 + $0x44] ss:$8 sps:$4 sm:$0xff]  }
 0x4f4   :  { %2570 = vmatprep.subr.bf16.mxu1 %v5179_v53 }
 0x4f5   :  { %v1995_v29 = vadd.f32 1e-05, %v1931_v6  ;;  %2571 = vmatpush1.bf16.msra.mxu1 %v5177_v22 }
 0x4f6   :  { %2572 = vmatprep.subr.bf16.mxu1 %v5182_v34  ;;  %v5183_v34 = vld [vmem:[%s8377_s4 + $0x60] ss:$8 sps:$4 sm:$0xff]  }
 0x4f7   :  { %1528 = vadd.xlane.f32.xlu0 %v1527_v27  ;;  %5193 = vrsqrt.f32 %v1995_v29  ;;  %v6496_v29 = vpop.permute.xlu1 %1415 }
 0x4f8   :  { %5195 = vrsqrt.f32 %v1994_v25 }
 0x4f9   :  { %2573 = vmatpush1.bf16.msra.mxu1 %v5180_v13  ;;  %v8596_v13 = vmax.f32 %v5999_v36, 0.0  ;;  %v5186_v36 = vld [vmem:[%s8377_s4 + $0x70] ss:$8 sps:$4 sm:$0xff]  }
 0x4fb   :  { %1531 = vadd.xlane.f32.xlu0 %v1530_v1  ;;  %v6503_v22 = vpop.permute.xlu1 %1704 }
 0x501   :  { %v5194_v1 = vpop.eup %5193 }
 0x502   :  { %v5196_v35 = vpop.eup %5195  ;;  %v2059_v19 = vmul.f32 %v5194_v1, %v1963_v8 }
 0x503   :  { %v2058_v57 = vmul.f32 %v5196_v35, %v1962_v63 }
 0x504   :  { %v2100_v30 = vmul.f32 %v6074_v28, %v2059_v19  ;;  %v5188_v19 = vld [vmem:[%s8377_s4 + $0x74] ss:$8 sps:$4 sm:$0xff]  }
 0x505   :  { %v2099_v60 = vmul.f32 %v6074_v28, %v2058_v57 }
 0x506   :  { %v2141_v3 = vadd.f32 %v6086_v50, %v2100_v30 }
 0x507   :  { %v2140_v53 = vadd.f32 %v6086_v50, %v2099_v60  ;;  %v1819_v60 = vsel %vm518_vm1, %v6453_v12, 0.0 }
 0x509   :  { %v6521_v63 = vadd.f32 %v6115_v55, %v2140_v53 }
 0x50b   :  { %8598 = vst [vmem:[#allocation44_spill] sm:$0xff] %v6521_v63 }
 0x510   :  { %v1457_v51 = vpop.xlane.xlu0 %1456 }
 0x511   :  { %2268 = vrot.lane.b32.xlu0 %v2188_v0, %s5428_s1  ;;  %v1548_v5 = vmul.f32 0.015625, %v1457_v51  ;;  %v5185_v51 = vld [vmem:[%s8377_s4 + $0x64] ss:$8 sps:$4 sm:$0xff]  }
 0x512   :  { %2574 = vmatprep.subr.bf16.mxu1 %v5185_v51 }
 0x513   :  { %v1868_v25 = vmul.f32 %v1548_v5, %v1548_v5  ;;  %2575 = vmatpush1.bf16.msra.mxu1 %v5183_v34  ;;  %v1964_v34 = vsub.f32 %v6127_v38, %v1548_v5 }
 0x514   :  { %v1746_v27 = vpop.xlane.xlu0 %1745  ;;  %2576 = vmatprep.subr.bf16.mxu1 %v5188_v19 }
 0x515   :  { %v1836_v43 = vmul.f32 0.015625, %v1746_v27  ;;  %v2191_v27 = vmul.f32 0.5, %v8596_v13  ;;  %v1536_v13 = vsel %vm518_vm1, %v6456_v59, 0.0 }
 0x517   :  { %1817 = vadd.xlane.f32.xlu1 %v1816_v20  ;;  %v1900_v47 = vsub.f32 %v1836_v43, %v1868_v25  ;;  %v6517_v20 = vadd.f32 %v6104_v10, %v2141_v3  ;;  %2577 = vmatpush1.bf16.msra.mxu1 %v5186_v36 }
 0x518   :  { %v1749_v62 = vpop.xlane.xlu0 %1748 }
 0x519   :  { %v1932_v24 = vmax.f32 %v1900_v47, 0.0  ;;  %8597 = vst [vmem:[#allocation43_spill] sm:$0xff] %v6517_v20  ;;  %v1837_v10 = vmul.f32 0.015625, %v1749_v62  ;;  %v2407_v25 = vpack.c.bf16 %v6517_v20, %v6521_v63  ;;  %v1533_v62 = vsel %vm518_vm1, %v6459_v2, 0.0 }
 0x51b   :  { %v1996_v1 = vadd.f32 1e-05, %v1932_v24 }
 0x51c   :  { %v6494_v6 = vpop.xlane.xlu0 %1462 }
 0x51d   :  { %5197 = vrsqrt.f32 %v1996_v1 }
 0x520   :  { %v6499_v0 = vpop.xlane.xlu0 %1751 }
 0x524   :  { %v6505_v41 = vpop.xlane.xlu0 %1754 }
 0x527   :  { %v1460_v8 = vpop.xlane.xlu1 %1459  ;;  %v5198_v53 = vpop.eup %5197 }
 0x528   :  { %v1549_v35 = vmul.f32 0.015625, %v1460_v8  ;;  %2274 = vrot.lane.b32.xlu1 %v2191_v27, %s5428_s1  ;;  %v6526_v43 = vpop.xlane.xlu0 %1468  ;;  %v2060_v27 = vmul.f32 %v5198_v53, %v1964_v34 }
 0x52a   :  { %v1869_v57 = vmul.f32 %v1549_v35, %v1549_v35  ;;  %v1965_v12 = vsub.f32 %v6138_v39, %v1549_v35  ;;  %v2101_v2 = vmul.f32 %v6074_v28, %v2060_v27  ;;  %v1839_v27 = vmul.f32 0.015625, %v6505_v41 }
 0x52b   :  { %v1466_v24 = vpop.xlane.xlu1 %1465 }
 0x52c   :  { %v1901_v55 = vsub.f32 %v1837_v10, %v1869_v57  ;;  %2450 = vrot.lane.b32.xlu1 %v2407_v25, %s5428_s1  ;;  %v6534_v47 = vpop.xlane.xlu0 %1757  ;;  %v2142_v38 = vadd.f32 %v6086_v50, %v2101_v2 }
 0x52e   :  { %v1933_v30 = vmax.f32 %v1901_v55, 0.0  ;;  %v6559_v25 = vadd.f32 %v6125_v15, %v2142_v38 }
 0x52f   :  { %v6545_v1 = vpop.xlane.xlu1 %1471 }
 0x530   :  { %v1997_v3 = vadd.f32 1e-05, %v1933_v30  ;;  %1820 = vadd.xlane.f32.xlu0 %v1819_v60  ;;  %v6540_v51 = vpop.xlane.xlu0 %1760  ;;  %8599 = vst [vmem:[#allocation45_spill] sm:$0xff] %v6559_v25  ;;  %v1551_v60 = vmul.f32 0.015625, %v1466_v24 }
 0x532   :  { %5199 = vrsqrt.f32 %v1997_v3  ;;  %v8601_v3 = vmax.f32 %v5996_v56, 0.0  ;;  %v1871_v34 = vmul.f32 %v1551_v60, %v1551_v60 }
 0x533   :  { %v6552_v57 = vpop.xlane.xlu1 %1477 }
 0x534   :  { %1534 = vadd.xlane.f32.xlu0 %v1533_v62  ;;  %v6548_v8 = vpop.xlane.xlu0 %1474  ;;  %v2190_v62 = vmul.f32 0.5, %v8601_v3 }
 0x537   :  { %v6564_v35 = vpop.xlane.xlu1 %1483 }
 0x538   :  { %1537 = vadd.xlane.f32.xlu0 %v1536_v13  ;;  %v6555_v5 = vpop.xlane.xlu0 %1763  ;;  %v1838_v13 = vmul.f32 0.015625, %v6499_v0 }
 0x53b   :  { %v6573_v53 = vpop.xlane.xlu1 %1772 }
 0x53c   :  { %v5200_v19 = vpop.eup %5199  ;;  %v6568_v30 = vpop.xlane.xlu0 %1766 }
 0x53d   :  { %v2061_v36 = vmul.f32 %v5200_v19, %v1965_v12  ;;  %v1903_v19 = vsub.f32 %v1839_v27, %v1871_v34 }
 0x53f   :  { %v2102_v10 = vmul.f32 %v6074_v28, %v2061_v36  ;;  %v6581_v2 = vpop.xlane.xlu1 %1489  ;;  %v1935_v36 = vmax.f32 %v1903_v19, 0.0 }
 0x540   :  { %v6575_v15 = vpop.xlane.xlu0 %1480  ;;  %v6686_v20 = vmul.f32 0.015625, %v6581_v2 }
 0x541   :  { %v2143_v59 = vadd.f32 %v6086_v50, %v2102_v10 }
 0x543   :  { %v6562_v39 = vadd.f32 %v6136_v61, %v2143_v59  ;;  %v1550_v61 = vmul.f32 0.015625, %v6494_v6  ;;  %v6585_v38 = vpop.xlane.xlu1 %1778  ;;  %v1999_v6 = vadd.f32 1e-05, %v1935_v36 }
 0x544   :  { %v6583_v24 = vpop.xlane.xlu0 %1769 }
 0x545   :  { %8600 = vst [vmem:[#allocation46_spill] sm:$0xff] %v6562_v39  ;;  %v2408_v55 = vpack.c.bf16 %v6562_v39, %v6559_v25  ;;  %v1870_v12 = vmul.f32 %v1550_v61, %v1550_v61  ;;  %5201 = vrsqrt.f32 %v1999_v6  ;;  %v1966_v19 = vsub.f32 %v6148_v17, %v1550_v61 }
 0x546   :  { %v1825_v6 = vsel %vm518_vm1, %v6462_v33, 0.0 }
 0x547   :  { %2452 = vrot.lane.b32.xlu1 %v2408_v55, %s5428_s1  ;;  %v1902_v56 = vsub.f32 %v1838_v13, %v1870_v12  ;;  %v6589_v3 = vpop.xlane.xlu1 %1495  ;;  %v1967_v13 = vsub.f32 %v6158_v21, %v1551_v60  ;;  %v1539_v60 = vsel %vm518_vm1, %v6472_v31, 0.0 }
 0x548   :  { %v6587_v59 = vpop.xlane.xlu0 %1486 }
 0x549   :  { %v1934_v10 = vmax.f32 %v1902_v56, 0.0 }
 0x54b   :  { %v1998_v55 = vadd.f32 1e-05, %v1934_v10  ;;  %v6593_v41 = vpop.xlane.xlu1 %1784  ;;  %v1822_v10 = vsel %vm518_vm1, %v6466_v23, 0.0 }
 0x54c   :  { %v6591_v0 = vpop.xlane.xlu0 %1775 }
 0x54d   :  { %5203 = vrsqrt.f32 %v1998_v55 }
 0x54e   :  { %2272 = vrot.lane.b32.xlu0 %v2190_v62, %s5428_s1 }
 0x54f   :  { %v5202_v34 = vpop.eup %5201  ;;  %v6598_v12 = vpop.xlane.xlu1 %1501 }
 0x550   :  { %v6595_v62 = vpop.xlane.xlu0 %1492  ;;  %v2063_v56 = vmul.f32 %v5202_v34, %v1967_v13  ;;  %v1542_v34 = vsel %vm518_vm1, %v6496_v29, 0.0  ;;  %v8604_v29 = vmax.f32 %v6012_v46, 0.0  ;;  %v8606_v46 = vmax.f32 %v6015_v58, 0.0 }
 0x551   :  { %v6668_v58 = vmul.f32 0.015625, %v6548_v8 }
 0x552   :  { %v2104_v39 = vmul.f32 %v6074_v28, %v2063_v56 }
 0x553   :  { %v6608_v21 = vpop.xlane.xlu1 %1790 }
 0x554   :  { %v6601_v36 = vpop.xlane.xlu0 %1781  ;;  %v2145_v23 = vadd.f32 %v6086_v50, %v2104_v39 }
 0x557   :  { %v5204_v27 = vpop.eup %5203  ;;  %v6619_v13 = vpop.xlane.xlu1 %1793 }
 0x558   :  { %v2062_v55 = vmul.f32 %v5204_v27, %v1966_v19  ;;  %v6612_v17 = vpop.xlane.xlu0 %1498  ;;  %v6624_v19 = vadd.f32 %v6156_v4, %v2145_v23  ;;  %v6642_v4 = vmul.f32 0.015625, %v6545_v1  ;;  %v1841_v23 = vmul.f32 0.015625, %v6540_v51 }
 0x55a   :  { %v2103_v61 = vmul.f32 %v6074_v28, %v2062_v55  ;;  %8602 = vst [vmem:[#allocation47_spill] sm:$0xff] %v6624_v19 }
 0x55b   :  { %v6631_v39 = vpop.xlane.xlu1 %1510 }
 0x55c   :  { %v2144_v33 = vadd.f32 %v6086_v50, %v2103_v61  ;;  %v6621_v27 = vpop.xlane.xlu0 %1787  ;;  %v1873_v61 = vmul.f32 %v6642_v4, %v6642_v4 }
 0x55e   :  { %v6627_v31 = vadd.f32 %v6146_v54, %v2144_v33  ;;  %v2193_v33 = vmul.f32 0.5, %v8606_v46 }
 0x55f   :  { %v6639_v55 = vpop.xlane.xlu1 %1799 }
 0x560   :  { %8603 = vst [vmem:[#allocation48_spill] sm:$0xff] %v6627_v31  ;;  %v2409_v56 = vpack.c.bf16 %v6624_v19, %v6627_v31  ;;  %v6663_v19 = vmul.f32 0.015625, %v6552_v57  ;;  %v1874_v57 = vmul.f32 %v6668_v58, %v6668_v58 }
 0x56b   :  { %1823 = vadd.xlane.f32.xlu1 %v1822_v10  ;;  %v6633_v10 = vpop.xlane.xlu0 %1504 }
 0x56d   :  { %1826 = vadd.xlane.f32.xlu0 %v1825_v6  ;;  %v2192_v6 = vmul.f32 0.5, %v8604_v29 }
 0x56f   :  { %v6644_v54 = vpop.xlane.xlu0 %1507 }
 0x571   :  { %1540 = vadd.xlane.f32.xlu0 %v1539_v60  ;;  %v6647_v60 = vmul.f32 0.015625, %v6526_v43 }
 0x573   :  { %v6657_v29 = vpop.xlane.xlu0 %1796  ;;  %v1872_v1 = vmul.f32 %v6647_v60, %v6647_v60 }
 0x575   :  { %1543 = vadd.xlane.f32.xlu0 %v1542_v34  ;;  %v6652_v34 = vpop.xlane.xlu1 %1516 }
 0x576   :  { %8605 = vst [vmem:[#allocation49_spill] sm:$0xff] %v6652_v34 }
 0x577   :  { %v6671_v46 = vpop.xlane.xlu0 %1513 }
 0x579   :  { %v6665_v51 = vpop.xlane.xlu1 %1805 }
 0x57a   :  { %8607 = vst [vmem:[#allocation50_spill] sm:$0xff] %v6665_v51 }
 0x57b   :  { %v6680_v63 = vpop.xlane.xlu0 %1802 }
 0x57c   :  { %2454 = vrot.lane.b32.xlu1 %v2409_v56, %s5428_s1  ;;  %v1840_v56 = vmul.f32 0.015625, %v6534_v47  ;;  %v1843_v47 = vmul.f32 0.015625, %v6568_v30 }
 0x57e   :  { %v1904_v43 = vsub.f32 %v1840_v56, %v1872_v1  ;;  %v6678_v1 = vpop.xlane.xlu1 %1522 }
 0x57f   :  { %8608 = vst [vmem:[#allocation51_spill] sm:$0xff] %v6678_v1 }
 0x580   :  { %2276 = vrot.lane.b32.xlu1 %v2192_v6, %s5428_s1  ;;  %v1905_v6 = vsub.f32 %v1841_v23, %v1873_v61  ;;  %v1936_v25 = vmax.f32 %v1904_v43, 0.0  ;;  %v1875_v61 = vmul.f32 %v6663_v19, %v6663_v19  ;;  %v1842_v23 = vmul.f32 0.015625, %v6555_v5 }
 0x581   :  { %v6683_v43 = vmul.f32 0.015625, %v6587_v59  ;;  %v1844_v59 = vmul.f32 0.015625, %v6583_v24 }
 0x582   :  { %v1937_v31 = vmax.f32 %v1905_v6, 0.0  ;;  %v1907_v56 = vsub.f32 %v1843_v47, %v1875_v61  ;;  %v2000_v6 = vadd.f32 1e-05, %v1936_v25  ;;  %v1906_v8 = vsub.f32 %v1842_v23, %v1874_v57  ;;  %v6693_v61 = vpop.xlane.xlu1 %1811  ;;  %v6701_v57 = vpop.xlane.xlu0 %1519 }
 0x583   :  { %v1846_v47 = vmul.f32 0.015625, %v6591_v0  ;;  %v1847_v25 = vmul.f32 0.015625, %v6585_v38  ;;  %8609 = vst [vmem:[#allocation52_spill] sm:$0xff] %v6693_v61  ;;  %v6696_v23 = vmul.f32 0.015625, %v6564_v35  ;;  %v1878_v2 = vmul.f32 %v6683_v43, %v6683_v43  ;;  %8610 = vst [vmem:[#allocation53_spill] sm:$0xff] %v6701_v57 }
 0x584   :  { %v1939_v30 = vmax.f32 %v1907_v56, 0.0  ;;  %v1938_v5 = vmax.f32 %v1906_v8, 0.0  ;;  %v1845_v0 = vmul.f32 0.015625, %v6573_v53  ;;  %v1969_v53 = vsub.f32 %v6178_v40, %v6642_v4 }
 0x585   :  { %v1877_v8 = vmul.f32 %v6696_v23, %v6696_v23  ;;  %v6729_v4 = vmul.f32 0.015625, %v6589_v3  ;;  %v1849_v3 = vmul.f32 0.015625, %v6593_v41 }
 0x586   :  { %v2002_v56 = vadd.f32 1e-05, %v1938_v5  ;;  %v6712_v57 = vpop.xlane.xlu0 %1808 }
 0x587   :  { %v1909_v1 = vsub.f32 %v1845_v0, %v1877_v8 }
 0x58b   :  { %2278 = vrot.lane.b32.xlu0 %v2193_v33, %s5428_s1  ;;  %v2001_v33 = vadd.f32 1e-05, %v1937_v31  ;;  %v6689_v31 = vmul.f32 0.015625, %v6575_v15  ;;  %v1879_v15 = vmul.f32 %v6686_v20, %v6686_v20 }
 0x58d   :  { %5205 = vrsqrt.f32 %v2001_v33  ;;  %v2003_v33 = vadd.f32 1e-05, %v1939_v30  ;;  %v1876_v38 = vmul.f32 %v6689_v31, %v6689_v31  ;;  %v1911_v35 = vsub.f32 %v1847_v25, %v1879_v15  ;;  %v6710_v30 = vpop.permute.xlu1 %2270 }
 0x58e   :  { %5207 = vrsqrt.f32 %v2000_v6  ;;  %v1910_v6 = vsub.f32 %v1846_v47, %v1878_v2  ;;  %v1968_v25 = vsub.f32 %v6168_v45, %v6647_v60  ;;  %v1828_v2 = vsel %vm518_vm1, %v6474_v16, 0.0 }
 0x58f   :  { %5209 = vrsqrt.f32 %v2003_v33  ;;  %v1908_v24 = vsub.f32 %v1844_v59, %v1876_v38  ;;  %v1943_v5 = vmax.f32 %v1911_v35, 0.0  ;;  %v6719_v33 = vmul.f32 0.015625, %v6595_v62 }
 0x590   :  { %5211 = vrsqrt.f32 %v2002_v56  ;;  %v1942_v51 = vmax.f32 %v1910_v6, 0.0  ;;  %v1941_v56 = vmax.f32 %v1909_v1, 0.0  ;;  %v6726_v38 = vmul.f32 0.015625, %v6612_v17 }
 0x591   :  { %v1940_v47 = vmax.f32 %v1908_v24, 0.0  ;;  %v2007_v40 = vadd.f32 1e-05, %v1943_v5  ;;  %v1848_v45 = vmul.f32 0.015625, %v6601_v36  ;;  %v6733_v6 = vmul.f32 0.015625, %v6598_v12 }
 0x592   :  { %v2006_v0 = vadd.f32 1e-05, %v1942_v51  ;;  %v1850_v16 = vmul.f32 0.015625, %v6621_v27  ;;  %v1831_v17 = vsel %vm518_vm1, %v6503_v22, 0.0  ;;  %v1971_v51 = vsub.f32 %v6198_v52, %v6663_v19 }
 0x593   :  { %v2004_v60 = vadd.f32 1e-05, %v1940_v47  ;;  %v1880_v36 = vmul.f32 %v6719_v33, %v6719_v33  ;;  %v2005_v35 = vadd.f32 1e-05, %v1941_v56  ;;  %v1851_v27 = vmul.f32 0.015625, %v6608_v21 }
 0x594   :  { %5213 = vrsqrt.f32 %v2006_v0  ;;  %v1882_v22 = vmul.f32 %v6726_v38, %v6726_v38  ;;  %v1881_v52 = vmul.f32 %v6729_v4, %v6729_v4  ;;  %v1883_v24 = vmul.f32 %v6733_v6, %v6733_v6 }
 0x595   :  { %5215 = vrsqrt.f32 %v2007_v40  ;;  %v1912_v41 = vsub.f32 %v1848_v45, %v1880_v36  ;;  %v1970_v21 = vsub.f32 %v6188_v9, %v6668_v58  ;;  %v6760_v56 = vmul.f32 0.015625, %v6633_v10 }
 0x596   :  { %5217 = vrsqrt.f32 %v2004_v60  ;;  %v1913_v5 = vsub.f32 %v1849_v3, %v1881_v52  ;;  %v6774_v3 = vmul.f32 0.015625, %v6644_v54 }
 0x597   :  { %v5206_v61 = vpop.eup %5205  ;;  %5219 = vrsqrt.f32 %v2005_v35  ;;  %v1944_v40 = vmax.f32 %v1912_v41, 0.0  ;;  %v1884_v10 = vmul.f32 %v6760_v56, %v6760_v56 }
 0x598   :  { %v5208_v34 = vpop.eup %5207  ;;  %v2065_v15 = vmul.f32 %v5206_v61, %v1969_v53  ;;  %v6736_v61 = vpop.xlane.xlu0 %1525  ;;  %v1914_v53 = vsub.f32 %v1850_v16, %v1882_v22  ;;  %v1945_v60 = vmax.f32 %v1913_v5, 0.0  ;;  %v1853_v22 = vmul.f32 0.015625, %v6657_v29 }
 0x599   :  { %v2064_v62 = vmul.f32 %v5208_v34, %v1968_v25  ;;  %v5210_v1 = vpop.eup %5209  ;;  %v2008_v36 = vadd.f32 1e-05, %v1944_v40  ;;  %v1885_v29 = vmul.f32 %v6774_v3, %v6774_v3  ;;  %v1972_v5 = vsub.f32 %v6208_v44, %v6689_v31 }
 0x59a   :  { %v2106_v12 = vmul.f32 %v6074_v28, %v2065_v15  ;;  %v5212_v8 = vpop.eup %5211  ;;  %v1915_v15 = vsub.f32 %v1851_v27, %v1883_v24  ;;  %v1946_v58 = vmax.f32 %v1914_v53, 0.0  ;;  %v1852_v27 = vmul.f32 0.015625, %v6619_v13 }
 0x59b   :  { %v2105_v19 = vmul.f32 %v6074_v28, %v2064_v62  ;;  %v8611_v62 = vmov 0   ;;  %v2066_v9 = vmul.f32 %v5212_v8, %v1970_v21  ;;  %v2009_v54 = vadd.f32 1e-05, %v1945_v60 }
 0x59c   :  { %v2147_v25 = vadd.f32 %v6086_v50, %v2106_v12  ;;  %v6762_v0 = vpop.xlane.xlu0 %1814  ;;  %v1975_v53 = vsub.f32 %v6238_v7, %v6686_v20  ;;  %v1916_v21 = vsub.f32 %v1852_v27, %v1884_v10  ;;  %5221 = vrsqrt.f32 %v2008_v36 }
 0x59d   :  { %v2146_v45 = vadd.f32 %v6086_v50, %v2105_v19  ;;  %v1974_v19 = vsub.f32 %v6228_v37, %v6683_v43  ;;  %v1973_v7 = vsub.f32 %v6218_v14, %v6696_v23  ;;  %v1917_v20 = vsub.f32 %v1853_v22, %v1885_v29  ;;  %v8622_v29 = vld [vmem:[#allocation14_spill] sm:$0xff] }
 0x59e   :  { %v6768_v16 = vadd.f32 %v6176_v11, %v2147_v25  ;;  %v5214_v35 = vpop.eup %5213  ;;  %v2010_v11 = vadd.f32 1e-05, %v1946_v58  ;;  %v8614_v25 = vmax.f32 %v6031_v42, 0.0  ;;  %v1948_v40 = vmax.f32 %v1916_v21, 0.0 }
 0x59f   :  { %v6777_v12 = vadd.f32 %v6166_v49, %v2146_v45  ;;  %v5216_v41 = vpop.eup %5215  ;;  %v2070_v43 = vmul.f32 %v5214_v35, %v1974_v19  ;;  %v1949_v58 = vmax.f32 %v1917_v20, 0.0  ;;  %v8617_v10 = vmax.f32 %v6028_v48, 0.0  ;;  %v8627_v20 = vld [vmem:[#allocation42_spill] sm:$0xff] }
 0x5a0   :  { %8612 = vst [vmem:[#allocation54_spill] sm:$0xff] %v6768_v16  ;;  %v6782_v52 = vpop.xlane.xlu0 %1528  ;;  %v5218_v24 = vpop.eup %5217  ;;  %5223 = vrsqrt.f32 %v2010_v11  ;;  %v2071_v44 = vmul.f32 %v5216_v41, %v1975_v53  ;;  %v8618_v22 = vmax.f32 %v6044_v32, 0.0  ;;  %v8623_v32 = vld [vmem:[#allocation40_spill] sm:$0xff] }
 0x5a1   :  { %8613 = vst [vmem:[#allocation55_spill] sm:$0xff] %v6777_v12  ;;  %v2410_v8 = vpack.c.bf16 %v6768_v16, %v6777_v12  ;;  %5225 = vrsqrt.f32 %v2009_v54  ;;  %v2068_v31 = vmul.f32 %v5218_v24, %v1972_v5  ;;  %v2111_v14 = vmul.f32 %v6074_v28, %v2070_v43 }
 0x5a2   :  { %v2112_v60 = vmul.f32 %v6074_v28, %v2071_v44  ;;  %v2013_v35 = vadd.f32 1e-05, %v1949_v58  ;;  %v2196_v41 = vmul.f32 0.5, %v8618_v22  ;;  %v1978_v5 = vsub.f32 %v8622_v29, %v6726_v38 }
 0x5a3   :  { %v2152_v36 = vadd.f32 %v6086_v50, %v2111_v14  ;;  %v1977_v44 = vsub.f32 %v8627_v20, %v6729_v4 }
 0x5a4   :  { %v6721_v59 = vpop.xlane.xlu1 %1817  ;;  %1829 = vadd.xlane.f32.xlu1 %v1828_v2  ;;  %v2067_v2 = vmul.f32 %v5210_v1, %v1971_v51  ;;  %v1947_v51 = vmax.f32 %v1915_v15, 0.0  ;;  %v2107_v1 = vmul.f32 %v6074_v28, %v2066_v9  ;;  %v6804_v45 = vpop.xlane.xlu0 %1531  ;;  %v2153_v19 = vadd.f32 %v6086_v50, %v2112_v60 }
 0x5a6   :  { %v2011_v13 = vadd.f32 1e-05, %v1947_v51  ;;  %v2148_v37 = vadd.f32 %v6086_v50, %v2107_v1  ;;  %v2012_v51 = vadd.f32 1e-05, %v1948_v40 }
 0x5a8   :  { %v6745_v34 = vpop.permute.xlu1 %2274  ;;  %5227 = vrsqrt.f32 %v2011_v13  ;;  %v6808_v42 = vadd.f32 %v6196_v18, %v2148_v37  ;;  %v2194_v18 = vmul.f32 0.5, %v8617_v10  ;;  %v2269_v27 = vpop.permute.xlu0 %2268  ;;  %v8621_v13 = vld [vmem:[#allocation41_spill] sm:$0xff]  ;;  %v6835_v37 = vadd.f32 %v8623_v32, %v2152_v36 }
 0x5a9   :  { %5229 = vrsqrt.f32 %v2012_v51  ;;  %v1976_v21 = vsub.f32 %v8621_v13, %v6719_v33 }
 0x5aa   :  { %1832 = vadd.xlane.f32.xlu0 %v1831_v17  ;;  %v2108_v17 = vmul.f32 %v6074_v28, %v2067_v2  ;;  %v2195_v2 = vmul.f32 0.5, %v8614_v25  ;;  %8616 = vst [vmem:[#allocation57_spill] sm:$0xff] %v6808_v42  ;;  %v8625_v25 = vld [vmem:[#allocation30_spill] sm:$0xff]  ;;  %5231 = vrsqrt.f32 %v2013_v35 }
 0x5ac   :  { %v2451_v47 = vpop.permute.xlu1 %2450  ;;  %v2149_v49 = vadd.f32 %v6086_v50, %v2108_v17  ;;  %v2109_v17 = vmul.f32 %v6074_v28, %v2068_v31  ;;  %v8628_v31 = vld [vmem:[#allocation15_spill] sm:$0xff] }
 0x5ad   :  { %4712 = vmatmul.mubr.msk.bf16.vlgmr.msra.gmra.mrb[64].mxu1 %vm518_vm1, %v2451_v47  ;;  %v5220_v47 = vpop.eup %5219  ;;  %v1979_v33 = vsub.f32 %v8628_v31, %v6733_v6  ;;  %v8633_v6 = vld [vmem:[#allocation37_spill] sm:$0xff] }
 0x5ae   :  { %2612 = vmatprep.mubr.bf16.mxu1 %v8611_v62  ;;  %v6802_v15 = vadd.f32 %v6186_v26, %v2149_v49  ;;  %v2069_v23 = vmul.f32 %v5220_v47, %v1973_v7  ;;  %v5222_v11 = vpop.eup %5221  ;;  %v2150_v54 = vadd.f32 %v6086_v50, %v2109_v17  ;;  %v8644_v31 = vld [vmem:[#allocation33_spill] sm:$0xff] }
 0x5af   :  { %v5224_v48 = vpop.eup %5223 }
 0x5b0   :  { %8615 = vst [vmem:[#allocation56_spill] sm:$0xff] %v6802_v15  ;;  %v2411_v26 = vpack.c.bf16 %v6802_v15, %v6808_v42  ;;  %v2110_v1 = vmul.f32 %v6074_v28, %v2069_v23  ;;  %v5226_v53 = vpop.eup %5225  ;;  %v2074_v38 = vmul.f32 %v5224_v48, %v1978_v5  ;;  %v8631_v23 = vld [vmem:[#allocation38_spill] sm:$0xff]  ;;  %v8637_v48 = vld [vmem:[#allocation32_spill] sm:$0xff]  ;;  %v8640_v5 = vld [vmem:[#allocation35_spill] sm:$0xff] }
 0x5b1   :  { %v6851_v58 = vadd.f32 %v8631_v23, %v2150_v54  ;;  %v2073_v60 = vmul.f32 %v5226_v53, %v1977_v44  ;;  %v8641_v32 = vmax.f32 %v8640_v5, 0.0 }
 0x5b2   :  { %v2151_v43 = vadd.f32 %v6086_v50, %v2110_v1  ;;  %v5228_v47 = vpop.eup %5227  ;;  %v2115_v10 = vmul.f32 %v6074_v28, %v2074_v38 }
 0x5b3   :  { %8632 = vst [vmem:[#allocation14_spill] sm:$0xff] %v6851_v58  ;;  %v2075_v17 = vmul.f32 %v5228_v47, %v1979_v33  ;;  %v2114_v35 = vmul.f32 %v6074_v28, %v2073_v60  ;;  %v5230_v54 = vpop.eup %5229  ;;  %v8645_v33 = vmax.f32 %v8644_v31, 0.0 }
 0x5b4   :  { %v6857_v51 = vadd.f32 %v8633_v6, %v2151_v43  ;;  %v2156_v13 = vadd.f32 %v6086_v50, %v2115_v10  ;;  %v5232_v29 = vpop.eup %5231  ;;  %v2202_v43 = vmul.f32 0.5, %v8641_v32 }
 0x5b5   :  { %2456 = vrot.lane.b32.xlu1 %v2410_v8, %s5428_s1  ;;  %v8619_v8 = vld [vmem:[#allocation31_spill] sm:$0xff]  ;;  %v2155_v47 = vadd.f32 %v6086_v50, %v2114_v35  ;;  %v2200_v38 = vmul.f32 0.5, %v8645_v33 }
 0x5b6   :  { %v8620_v49 = vmax.f32 %v8619_v8, 0.0  ;;  %8624 = vst [vmem:[#allocation31_spill] sm:$0xff] %v6835_v37  ;;  %8634 = vst [vmem:[#allocation40_spill] sm:$0xff] %v6857_v51  ;;  %v8638_v8 = vmax.f32 %v8637_v48, 0.0  ;;  %v6884_v44 = vadd.f32 %v2269_v27, %v2156_v13  ;;  %v1566_v48 = vmul.f32 0.015625, %v6631_v39 }
 0x5b8   :  { %v2198_v24 = vmul.f32 0.5, %v8620_v49  ;;  %v2199_v49 = vmul.f32 0.5, %v8638_v8  ;;  %8643 = vst [vmem:[#allocation30_spill] sm:$0xff] %v6884_v44  ;;  %v1567_v8 = vmul.f32 0.015625, %v6671_v46 }
 0x5b9   :  { %v2453_v9 = vpop.permute.xlu1 %2452  ;;  %2282 = vrot.lane.b32.xlu1 %v2195_v2, %s5428_s1  ;;  %v8626_v2 = vmax.f32 %v8625_v25, 0.0 }
 0x5ba   :  { %4713 = vmatmul.mubr.msk.bf16.gmra.mrb[68].mxu1 %vm518_vm1, %v2453_v9  ;;  %v8629_v9 = vld [vmem:[#allocation39_spill] sm:$0xff]  ;;  %v1887_v13 = vmul.f32 %v1567_v8, %v1567_v8 }
 0x5bb   :  { %2622 = vmatprep.mubr.bf16.mxu1 %v8611_v62  ;;  %v2197_v7 = vmul.f32 0.5, %v8626_v2  ;;  %v6848_v14 = vadd.f32 %v8629_v9, %v2153_v19  ;;  %v2116_v19 = vmul.f32 %v6074_v28, %v2075_v17  ;;  %v8642_v2 = vld [vmem:[#allocation17_spill] sm:$0xff]  ;;  %v8649_v17 = vld [vmem:[#allocation12_spill] sm:$0xff] }
 0x5bd   :  { %2458 = vrot.lane.b32.xlu1 %v2411_v26, %s5428_s1  ;;  %v6844_v40 = vpop.xlane.xlu0 %1820  ;;  %8630 = vst [vmem:[#allocation41_spill] sm:$0xff] %v6848_v14  ;;  %v2072_v26 = vmul.f32 %v5222_v11, %v1976_v21  ;;  %v2413_v4 = vpack.c.bf16 %v6848_v14, %v6835_v37  ;;  %v8635_v11 = vld [vmem:[#allocation34_spill] sm:$0xff]  ;;  %v2157_v20 = vadd.f32 %v6086_v50, %v2116_v19 }
 0x5be   :  { %v8636_v22 = vmax.f32 %v8635_v11, 0.0 }
 0x5bf   :  { %v2113_v36 = vmul.f32 %v6074_v28, %v2072_v26  ;;  %v6892_v9 = vadd.f32 %v6710_v30, %v2157_v20  ;;  %v8647_v26 = vld [vmem:[#allocation13_spill] sm:$0xff]  ;;  %v8656_v20 = vld [vmem:[#allocation19_spill] sm:$0xff] }
 0x5c0   :  { %2280 = vrot.lane.b32.xlu0 %v2194_v18, %s5428_s1  ;;  %v2412_v18 = vpack.c.bf16 %v6857_v51, %v6851_v58 }
 0x5c1   :  { %2284 = vrot.lane.b32.xlu1 %v2196_v41, %s5428_s1  ;;  %v6864_v1 = vpop.xlane.xlu0 %1534  ;;  %v2201_v41 = vmul.f32 0.5, %v8636_v22  ;;  %v2154_v21 = vadd.f32 %v6086_v50, %v2113_v36  ;;  %8646 = vst [vmem:[#allocation42_spill] sm:$0xff] %v6892_v9  ;;  %v8651_v36 = vld [vmem:[#allocation36_spill] sm:$0xff] }
 0x5c2   :  { %v8652_v35 = vmax.f32 %v8651_v36, 0.0 }
 0x5c3   :  { %v6896_v60 = vadd.f32 %v8647_v26, %v2154_v21 }
 0x5c4   :  { %2288 = vrot.lane.b32.xlu0 %v2198_v24, %s5428_s1  ;;  %v8639_v24 = vld [vmem:[#allocation16_spill] sm:$0xff]  ;;  %v2203_v11 = vmul.f32 0.5, %v8652_v35  ;;  %v8659_v35 = vld [vmem:[#allocation49_spill] sm:$0xff] }
 0x5c5   :  { %2286 = vrot.lane.b32.xlu1 %v2197_v7, %s5428_s1  ;;  %v1980_v53 = vsub.f32 %v8639_v24, %v6760_v56  ;;  %v1981_v7 = vsub.f32 %v8642_v2, %v6774_v3  ;;  %v6887_v56 = vpop.xlane.xlu0 %1537  ;;  %8648 = vst [vmem:[#allocation15_spill] sm:$0xff] %v6896_v60  ;;  %v2415_v3 = vpack.c.bf16 %v6892_v9, %v6884_v44  ;;  %v1855_v24 = vmul.f32 0.015625, %v6680_v63  ;;  %v8655_v2 = vld [vmem:[#allocation18_spill] sm:$0xff] }
 0x5c7   :  { %v2076_v25 = vmul.f32 %v5230_v54, %v1980_v53  ;;  %v2077_v23 = vmul.f32 %v5232_v29, %v1981_v7  ;;  %v1886_v53 = vmul.f32 %v1566_v48, %v1566_v48  ;;  %v1982_v7 = vsub.f32 %v8655_v2, %v1566_v48  ;;  %v8661_v48 = vld [vmem:[#allocation50_spill] sm:$0xff] }
 0x5c8   :  { %2462 = vrot.lane.b32.xlu0 %v2413_v4, %s5428_s1  ;;  %v6903_v4 = vadd.f32 %v8649_v17, %v2155_v47 }
 0x5c9   :  { %2460 = vrot.lane.b32.xlu1 %v2412_v18, %s5428_s1  ;;  %v2117_v27 = vmul.f32 %v6074_v28, %v2076_v25  ;;  %v2118_v6 = vmul.f32 %v6074_v28, %v2077_v23  ;;  %v2273_v10 = vpop.permute.xlu0 %2272 }
 0x5ca   :  { %8650 = vst [vmem:[#allocation39_spill] sm:$0xff] %v6903_v4  ;;  %v2414_v30 = vpack.c.bf16 %v6903_v4, %v6896_v60 }
 0x5cb   :  { %v2158_v18 = vadd.f32 %v6086_v50, %v2117_v27  ;;  %v2159_v22 = vadd.f32 %v6086_v50, %v2118_v6 }
 0x5cc   :  { %2294 = vrot.lane.b32.xlu0 %v2201_v41, %s5428_s1 }
 0x5cd   :  { %2290 = vrot.lane.b32.xlu1 %v2199_v49, %s5428_s1  ;;  %v6914_v41 = vadd.f32 %v2273_v10, %v2158_v18  ;;  %v6917_v19 = vadd.f32 %v6745_v34, %v2159_v22  ;;  %v1854_v49 = vmul.f32 0.015625, %v6639_v55  ;;  %v1919_v34 = vsub.f32 %v1855_v24, %v1887_v13  ;;  %v8660_v22 = vld [vmem:[#allocation53_spill] sm:$0xff] }
 0x5ce   :  { %v1983_v55 = vsub.f32 %v8656_v20, %v1567_v8  ;;  %v1856_v8 = vmul.f32 0.015625, %v8661_v48 }
 0x5cf   :  { %8653 = vst [vmem:[#allocation38_spill] sm:$0xff] %v6914_v41  ;;  %8654 = vst [vmem:[#allocation37_spill] sm:$0xff] %v6917_v19  ;;  %v2416_v54 = vpack.c.bf16 %v6917_v19, %v6914_v41  ;;  %v1918_v21 = vsub.f32 %v1854_v49, %v1886_v53  ;;  %v1951_v5 = vmax.f32 %v1919_v34, 0.0  ;;  %v1857_v49 = vmul.f32 0.015625, %v6712_v57 }
 0x5d0   :  { %2296 = vrot.lane.b32.xlu0 %v2202_v43, %s5428_s1 }
 0x5d1   :  { %2292 = vrot.lane.b32.xlu1 %v2200_v38, %s5428_s1  ;;  %v1950_v29 = vmax.f32 %v1918_v21, 0.0  ;;  %v2015_v43 = vadd.f32 1e-05, %v1951_v5 }
 0x5d3   :  { %v2014_v32 = vadd.f32 1e-05, %v1950_v29  ;;  %v8662_v29 = vld [vmem:[#allocation51_spill] sm:$0xff] }
 0x5d4   :  { %2466 = vrot.lane.b32.xlu0 %v2415_v3, %s5428_s1  ;;  %v6951_v5 = vmul.f32 0.015625, %v8662_v29 }
 0x5d5   :  { %2464 = vrot.lane.b32.xlu1 %v2414_v30, %s5428_s1  ;;  %5233 = vrsqrt.f32 %v2014_v32 }
 0x5d6   :  { %5235 = vrsqrt.f32 %v2015_v43  ;;  %v6954_v43 = vmul.f32 0.015625, %v6736_v61  ;;  %v1890_v57 = vmul.f32 %v6951_v5, %v6951_v5  ;;  %v6966_v61 = vmul.f32 0.015625, %v6804_v45 }
 0x5d9   :  { %2298 = vrot.lane.b32.xlu1 %v2203_v11, %s5428_s1  ;;  %v1568_v11 = vmul.f32 0.015625, %v8659_v35 }
 0x5db   :  { %v1888_v24 = vmul.f32 %v1568_v11, %v1568_v11 }
 0x5dd   :  { %2468 = vrot.lane.b32.xlu1 %v2416_v54, %s5428_s1  ;;  %v1569_v54 = vmul.f32 0.015625, %v8660_v22  ;;  %v1920_v13 = vsub.f32 %v1856_v8, %v1888_v24 }
 0x5df   :  { %v5234_v47 = vpop.eup %5233  ;;  %v1889_v53 = vmul.f32 %v1569_v54, %v1569_v54  ;;  %v1952_v34 = vmax.f32 %v1920_v13, 0.0  ;;  %v8665_v13 = vld [vmem:[#allocation21_spill] sm:$0xff] }
 0x5e0   :  { %v5236_v25 = vpop.eup %5235  ;;  %v2078_v63 = vmul.f32 %v5234_v47, %v1982_v7  ;;  %v8663_v47 = vld [vmem:[#allocation52_spill] sm:$0xff]  ;;  %v1859_v7 = vmul.f32 0.015625, %v6762_v0  ;;  %v1860_v0 = vmul.f32 0.015625, %v6721_v59 }
 0x5e1   :  { %v2079_v33 = vmul.f32 %v5236_v25, %v1983_v55  ;;  %v1921_v21 = vsub.f32 %v1857_v49, %v1889_v53  ;;  %v1858_v25 = vmul.f32 0.015625, %v8663_v47  ;;  %v2016_v2 = vadd.f32 1e-05, %v1952_v34  ;;  %v8664_v49 = vld [vmem:[#allocation20_spill] sm:$0xff] }
 0x5e2   :  { %v2119_v23 = vmul.f32 %v6074_v28, %v2078_v63  ;;  %v1891_v55 = vmul.f32 %v6954_v43, %v6954_v43  ;;  %v1984_v24 = vsub.f32 %v8664_v49, %v1568_v11  ;;  %v8667_v49 = vld [vmem:[#allocation23_spill] sm:$0xff] }
 0x5e3   :  { %v2120_v26 = vmul.f32 %v6074_v28, %v2079_v33  ;;  %v1953_v32 = vmax.f32 %v1921_v21, 0.0  ;;  %5237 = vrsqrt.f32 %v2016_v2  ;;  %v6963_v33 = vmul.f32 0.015625, %v6782_v52 }
 0x5e4   :  { %v2160_v17 = vadd.f32 %v6086_v50, %v2119_v23  ;;  %v1923_v63 = vsub.f32 %v1859_v7, %v1891_v55  ;;  %v6978_v52 = vmul.f32 0.015625, %v6887_v56  ;;  %v1985_v56 = vsub.f32 %v8665_v13, %v1569_v54 }
 0x5e5   :  { %v2161_v6 = vadd.f32 %v6086_v50, %v2120_v26  ;;  %v2017_v20 = vadd.f32 1e-05, %v1953_v32 }
 0x5e6   :  { %v1955_v26 = vmax.f32 %v1923_v63, 0.0 }
 0x5e7   :  { %5239 = vrsqrt.f32 %v2017_v20 }
 0x5e8   :  { %v2019_v22 = vadd.f32 1e-05, %v1955_v26 }
 0x5ed   :  { %v5238_v8 = vpop.eup %5237 }
 0x5f1   :  { %v5240_v53 = vpop.eup %5239 }
 0x5f2   :  { %v2081_v47 = vmul.f32 %v5240_v53, %v1985_v56 }
 0x5f8   :  { %v1824_v39 = vpop.xlane.xlu1 %1823 }
 0x5f9   :  { %v1862_v35 = vmul.f32 0.015625, %v1824_v39 }
 0x5fa   :  { %v1827_v46 = vpop.xlane.xlu0 %1826 }
 0x5fb   :  { %v1863_v48 = vmul.f32 0.015625, %v1827_v46 }
 0x5fc   :  { %v2455_v31 = vpop.permute.xlu1 %2454 }
 0x5fd   :  { %4714 = vmatmul.mubr.msk.bf16.gmra.mrb[72].mxu1 %vm518_vm1, %v2455_v31  ;;  %v1922_v31 = vsub.f32 %v1858_v25, %v1890_v57  ;;  %v2080_v25 = vmul.f32 %v5238_v8, %v1984_v24  ;;  %v1987_v24 = vsub.f32 %v8667_v49, %v6954_v43 }
 0x5fe   :  { %v6930_v38 = vpop.xlane.xlu0 %1540  ;;  %2632 = vmatprep.mubr.bf16.mxu1 %v8611_v62 }
 0x5ff   :  { %v1954_v23 = vmax.f32 %v1922_v31, 0.0  ;;  %v6987_v46 = vmul.f32 0.015625, %v6930_v38  ;;  %v2121_v38 = vmul.f32 %v6074_v28, %v2080_v25 }
 0x600   :  { %v2277_v27 = vpop.permute.xlu1 %2276 }
 0x601   :  { %v6939_v10 = vadd.f32 %v2277_v27, %v2160_v17  ;;  %v1861_v27 = vmul.f32 0.015625, %v6844_v40  ;;  %v1892_v17 = vmul.f32 %v6963_v33, %v6963_v33  ;;  %v2018_v45 = vadd.f32 1e-05, %v1954_v23 }
 0x602   :  { %v6935_v3 = vpop.xlane.xlu0 %1543  ;;  %v1896_v55 = vmul.f32 %v6987_v46, %v6987_v46  ;;  %v2122_v23 = vmul.f32 %v6074_v28, %v2081_v47 }
 0x603   :  { %8657 = vst [vmem:[#allocation34_spill] sm:$0xff] %v6939_v10  ;;  %5241 = vrsqrt.f32 %v2018_v45  ;;  %v6992_v54 = vmul.f32 0.015625, %v6935_v3 }
 0x604   :  { %5243 = vrsqrt.f32 %v2019_v22 }
 0x606   :  { %v2279_v30 = vpop.permute.xlu0 %2278 }
 0x607   :  { %v6941_v18 = vadd.f32 %v2279_v30, %v2161_v6  ;;  %v6973_v6 = vmul.f32 0.015625, %v6864_v1  ;;  %v1893_v30 = vmul.f32 %v6966_v61, %v6966_v61  ;;  %v1895_v1 = vmul.f32 %v6978_v52, %v6978_v52 }
 0x609   :  { %8658 = vst [vmem:[#allocation32_spill] sm:$0xff] %v6941_v18  ;;  %v2417_v36 = vpack.c.bf16 %v6941_v18, %v6939_v10  ;;  %v1925_v59 = vsub.f32 %v1861_v27, %v1893_v30  ;;  %v1894_v40 = vmul.f32 %v6973_v6, %v6973_v6  ;;  %v1927_v29 = vsub.f32 %v1863_v48, %v1895_v1 }
 0x60a   :  { %v2162_v48 = vadd.f32 %v6086_v50, %v2121_v38 }
 0x60b   :  { %2470 = vrot.lane.b32.xlu0 %v2417_v36, %s5428_s1  ;;  %v1924_v36 = vsub.f32 %v1860_v0, %v1892_v17  ;;  %v1926_v34 = vsub.f32 %v1862_v35, %v1894_v40  ;;  %v1957_v39 = vmax.f32 %v1925_v59, 0.0  ;;  %v1959_v20 = vmax.f32 %v1927_v29, 0.0  ;;  %v8666_v40 = vld [vmem:[#allocation22_spill] sm:$0xff] }
 0x60c   :  { %v1897_v17 = vmul.f32 %v6992_v54, %v6992_v54  ;;  %v2163_v59 = vadd.f32 %v6086_v50, %v2122_v23  ;;  %v1986_v8 = vsub.f32 %v8666_v40, %v6951_v5 }
 0x60d   :  { %v1956_v21 = vmax.f32 %v1924_v36, 0.0  ;;  %v1958_v11 = vmax.f32 %v1926_v34, 0.0  ;;  %v2021_v57 = vadd.f32 1e-05, %v1957_v39  ;;  %v2023_v27 = vadd.f32 1e-05, %v1959_v20  ;;  %v5242_v3 = vpop.eup %5241 }
 0x60e   :  { %v5244_v45 = vpop.eup %5243  ;;  %v8671_v20 = vld [vmem:[#allocation25_spill] sm:$0xff] }
 0x60f   :  { %v2020_v2 = vadd.f32 1e-05, %v1956_v21  ;;  %v2022_v0 = vadd.f32 1e-05, %v1958_v11  ;;  %v2082_v21 = vmul.f32 %v5242_v3, %v1986_v8  ;;  %v2083_v34 = vmul.f32 %v5244_v45, %v1987_v24  ;;  %v8670_v11 = vld [vmem:[#allocation24_spill] sm:$0xff] }
 0x610   :  { %v8676_v24 = vld [vmem:[#allocation28_spill] sm:$0xff] }
 0x611   :  { %5245 = vrsqrt.f32 %v2020_v2  ;;  %v2123_v47 = vmul.f32 %v6074_v28, %v2082_v21  ;;  %v2124_v25 = vmul.f32 %v6074_v28, %v2083_v34 }
 0x612   :  { %5247 = vrsqrt.f32 %v2021_v57 }
 0x613   :  { %5249 = vrsqrt.f32 %v2022_v0  ;;  %v2164_v38 = vadd.f32 %v6086_v50, %v2123_v47  ;;  %v2165_v0 = vadd.f32 %v6086_v50, %v2124_v25 }
 0x614   :  { %5251 = vrsqrt.f32 %v2023_v27 }
 0x61b   :  { %v5246_v43 = vpop.eup %5245 }
 0x61c   :  { %v5248_v2 = vpop.eup %5247 }
 0x61d   :  { %v5250_v23 = vpop.eup %5249 }
 0x61e   :  { %v5252_v27 = vpop.eup %5251 }
 0x631   :  { %v1830_v32 = vpop.xlane.xlu1 %1829 }
 0x632   :  { %v1864_v7 = vmul.f32 0.015625, %v1830_v32 }
 0x634   :  { %v1928_v31 = vsub.f32 %v1864_v7, %v1896_v55  ;;  %v1988_v7 = vsub.f32 %v8670_v11, %v6963_v33  ;;  %v1989_v55 = vsub.f32 %v8671_v20, %v6966_v61  ;;  %v8673_v33 = vld [vmem:[#allocation27_spill] sm:$0xff] }
 0x635   :  { %v2457_v63 = vpop.permute.xlu1 %2456  ;;  %v1991_v45 = vsub.f32 %v8673_v33, %v6978_v52 }
 0x636   :  { %4715 = vmatmul.mubr.msk.bf16.gmra.mrb[76].mxu1 %vm518_vm1, %v2457_v63  ;;  %v1960_v36 = vmax.f32 %v1928_v31, 0.0  ;;  %v2084_v31 = vmul.f32 %v5246_v43, %v1988_v7 }
 0x637   :  { %v1833_v26 = vpop.xlane.xlu0 %1832  ;;  %2642 = vmatprep.mubr.bf16.mxu1 %v8611_v62 }
 0x638   :  { %v1865_v30 = vmul.f32 0.015625, %v1833_v26  ;;  %v2024_v39 = vadd.f32 1e-05, %v1960_v36  ;;  %v2085_v26 = vmul.f32 %v5248_v2, %v1989_v55 }
 0x639   :  { %v2283_v22 = vpop.permute.xlu1 %2282 }
 0x63a   :  { %v1929_v35 = vsub.f32 %v1865_v30, %v1897_v17  ;;  %v7006_v13 = vadd.f32 %v2283_v22, %v2163_v59  ;;  %5253 = vrsqrt.f32 %v2024_v39  ;;  %v8672_v30 = vld [vmem:[#allocation26_spill] sm:$0xff]  ;;  %v2087_v59 = vmul.f32 %v5252_v27, %v1991_v45  ;;  %v7084_v45 = vld [vmem:[%s8378_s5 + $0x2] sm:$0x3] }
 0x63b   :  { %v2281_v1 = vpop.permute.xlu0 %2280  ;;  %v1990_v3 = vsub.f32 %v8672_v30, %v6973_v6 }
 0x63c   :  { %v1961_v53 = vmax.f32 %v1929_v35, 0.0  ;;  %8668 = vst [vmem:[#allocation16_spill] sm:$0xff] %v7006_v13  ;;  %v7008_v56 = vadd.f32 %v2281_v1, %v2162_v48  ;;  %v2125_v35 = vmul.f32 %v6074_v28, %v2084_v31  ;;  %v2126_v48 = vmul.f32 %v6074_v28, %v2085_v26 }
 0x63d   :  { %v2459_v32 = vpop.permute.xlu1 %2458  ;;  %v2086_v40 = vmul.f32 %v5250_v23, %v1990_v3  ;;  %v1992_v1 = vsub.f32 %v8676_v24, %v6987_v46 }
 0x63e   :  { %8669 = vst [vmem:[#allocation35_spill] sm:$0xff] %v7008_v56  ;;  %v2418_v29 = vpack.c.bf16 %v7006_v13, %v7008_v56  ;;  %4716 = vmatmul.mubr.msk.bf16.gmra.mrb[80].mxu1 %vm518_vm1, %v2459_v32  ;;  %v2025_v5 = vadd.f32 1e-05, %v1961_v53  ;;  %v2166_v52 = vadd.f32 %v6086_v50, %v2125_v35  ;;  %v2128_v53 = vmul.f32 %v6074_v28, %v2087_v59  ;;  %v8677_v32 = vld [vmem:[#allocation29_spill] sm:$0xff] }
 0x63f   :  { %2652 = vmatprep.mubr.bf16.mxu1 %v8611_v62  ;;  %v2289_v63 = vpop.permute.xlu0 %2288  ;;  %v2167_v21 = vadd.f32 %v6086_v50, %v2126_v48  ;;  %v2127_v34 = vmul.f32 %v6074_v28, %v2086_v40 }
 0x640   :  { %2472 = vrot.lane.b32.xlu1 %v2418_v29, %s5428_s1  ;;  %5255 = vrsqrt.f32 %v2025_v5  ;;  %v1993_v5 = vsub.f32 %v8677_v32, %v6992_v54  ;;  %v7046_v43 = vadd.f32 %v2289_v63, %v2166_v52  ;;  %v2169_v11 = vadd.f32 %v6086_v50, %v2128_v53 }
 0x641   :  { %v2285_v57 = vpop.permute.xlu1 %2284  ;;  %v2168_v7 = vadd.f32 %v6086_v50, %v2127_v34 }
 0x642   :  { %v7027_v36 = vadd.f32 %v2285_v57, %v2164_v38  ;;  %8678 = vst [vmem:[#allocation13_spill] sm:$0xff] %v7046_v43 }
 0x643   :  { %v2463_v8 = vpop.permute.xlu0 %2462 }
 0x644   :  { %8674 = vst [vmem:[#allocation17_spill] sm:$0xff] %v7027_v36  ;;  %v5254_v6 = vpop.eup %5253 }
 0x645   :  { %v2287_v17 = vpop.permute.xlu1 %2286  ;;  %v2088_v47 = vmul.f32 %v5254_v6, %v1992_v1 }
 0x646   :  { %v7029_v61 = vadd.f32 %v2287_v17, %v2165_v0 }
 0x647   :  { %v2295_v2 = vpop.permute.xlu0 %2294  ;;  %v2129_v31 = vmul.f32 %v6074_v28, %v2088_v47 }
 0x648   :  { %8675 = vst [vmem:[#allocation33_spill] sm:$0xff] %v7029_v61  ;;  %v2419_v22 = vpack.c.bf16 %v7029_v61, %v7027_v36  ;;  %v7054_v55 = vadd.f32 %v2295_v2, %v2169_v11 }
 0x649   :  { %v2461_v49 = vpop.permute.xlu1 %2460  ;;  %v2170_v0 = vadd.f32 %v6086_v50, %v2129_v31 }
 0x64a   :  { %4717 = vmatmul.mubr.msk.bf16.gmra.mrb[84].mxu1 %vm518_vm1, %v2461_v49  ;;  %2474 = vrot.lane.b32.xlu0 %v2419_v22, %s5428_s1  ;;  %v5256_v39 = vpop.eup %5255  ;;  %8680 = vst [vmem:[#allocation36_spill] sm:$0xff] %v7054_v55  ;;  %v8684_v22 = vld [vmem:[#allocation11_spill] sm:$0xff] }
 0x64b   :  { %2662 = vmatprep.mubr.bf16.mxu1 %v8611_v62  ;;  %v2089_v57 = vmul.f32 %v5256_v39, %v1993_v5  ;;  %v2297_v26 = vpop.permute.xlu0 %2296  ;;  %v8685_v59 = vsub.s32 0, %v8684_v22 }
 0x64c   :  { %v7068_v30 = vadd.f32 %v2297_v26, %v2170_v0 }
 0x64d   :  { %v2291_v29 = vpop.permute.xlu1 %2290  ;;  %v2130_v23 = vmul.f32 %v6074_v28, %v2089_v57  ;;  %v7090_v48 = vrot.slane %v7084_v45, %v8685_v59 }
 0x64e   :  { %v7048_v25 = vadd.f32 %v2291_v29, %v2167_v21  ;;  %8682 = vst [vmem:[#allocation19_spill] sm:$0xff] %v7068_v30 }
 0x64f   :  { %v2171_v27 = vadd.f32 %v6086_v50, %v2130_v23  ;;  %v2467_v33 = vpop.permute.xlu0 %2466 }
 0x650   :  { %8679 = vst [vmem:[#allocation12_spill] sm:$0xff] %v7048_v25  ;;  %v2420_v46 = vpack.c.bf16 %v7048_v25, %v7046_v43 }
 0x651   :  { %v2293_v20 = vpop.permute.xlu1 %2292 }
 0x652   :  { %v7057_v54 = vadd.f32 %v2293_v20, %v2168_v7  ;;  %2476 = vrot.lane.b32.xlu1 %v2420_v46, %s5428_s1  ;;  %4718 = vmatmul.mubr.msk.bf16.gmra.mrb[88].mxu1 %vm518_vm1, %v2463_v8 }
 0x653   :  { %2672 = vmatprep.mubr.bf16.mxu1 %v8611_v62 }
 0x654   :  { %8681 = vst [vmem:[#allocation18_spill] sm:$0xff] %v7057_v54  ;;  %v2421_v63 = vpack.c.bf16 %v7054_v55, %v7057_v54 }
 0x655   :  { %v2465_v38 = vpop.permute.xlu1 %2464 }
 0x656   :  { %2478 = vrot.lane.b32.xlu0 %v2421_v63, %s5428_s1 }
 0x659   :  { %v2299_v17 = vpop.permute.xlu1 %2298 }
 0x65a   :  { %v7070_v3 = vadd.f32 %v2299_v17, %v2171_v27  ;;  %4719 = vmatmul.mubr.msk.bf16.gmra.mrb[92].mxu1 %vm518_vm1, %v2465_v38 }
 0x65b   :  { %2682 = vmatprep.mubr.bf16.mxu1 %v8611_v62 }
 0x65c   :  { %8683 = vst [vmem:[#allocation49_spill] sm:$0xff] %v7070_v3  ;;  %v2422_v28 = vpack.c.bf16 %v7070_v3, %v7068_v30 }
 0x65d   :  { %v2469_v50 = vpop.permute.xlu1 %2468 }
 0x65e   :  { %2480 = vrot.lane.b32.xlu1 %v2422_v28, %s5428_s1 }
 0x662   :  { %4720 = vmatmul.mubr.msk.bf16.gmra.mrb[96].mxu1 %vm518_vm1, %v2467_v33 }
 0x663   :  { %2692 = vmatprep.mubr.bf16.mxu1 %v8611_v62 }
 0x66a   :  { %4721 = vmatmul.mubr.msk.bf16.gmra.mrb[100].mxu1 %vm518_vm1, %v2469_v50 }
 0x66b   :  { %2702 = vmatprep.mubr.bf16.mxu1 %v8611_v62 }
 0x67d   :  { %v2471_v35 = vpop.permute.xlu0 %2470 }
 0x67e   :  { %4722 = vmatmul.mubr.msk.bf16.gmra.mrb[104].mxu1 %vm518_vm1, %v2471_v35 }
 0x67f   :  { %2712 = vmatprep.mubr.bf16.mxu1 %v8611_v62 }
 0x680   :  { %v2604_v40 = vpop.f32.mrb[64].mxu1 }
 0x681   :  { %v7093_v8 = vpop.f32.mrb[65].mxu1  ;;  %v7096_v6 = vadd.f32 %v2604_v40, %v7090_v48 }
 0x682   :  { %v2608_v49 = vpop.f32.mrb[66].mxu1 }
 0x683   :  { %v7099_v52 = vadd.f32 %v2608_v49, %v7090_v48  ;;  %v7101_v24 = vpop.f32.mrb[67].mxu1 }
 0x68d   :  { %v2614_v53 = vpop.f32.mrb[68].mxu1 }
 0x68e   :  { %v7105_v21 = vpop.f32.mrb[69].mxu1  ;;  %v7108_v39 = vadd.f32 %v2614_v53, %v7090_v48 }
 0x68f   :  { %v2618_v34 = vpop.f32.mrb[70].mxu1 }
 0x690   :  { %v7111_v29 = vadd.f32 %v2618_v34, %v7090_v48  ;;  %v7113_v32 = vpop.f32.mrb[71].mxu1 }
 0x6b2   :  { %v2473_v47 = vpop.permute.xlu1 %2472 }
 0x6b3   :  { %4723 = vmatmul.mubr.msk.bf16.gmra.mrb[108].mxu1 %vm518_vm1, %v2473_v47 }
 0x6b4   :  { %2722 = vmatprep.mubr.bf16.mxu1 %v8611_v62 }
 0x6bc   :  { %v2475_v2 = vpop.permute.xlu0 %2474 }
 0x6bd   :  { %4724 = vmatmul.mubr.msk.bf16.gmra.mrb[112].mxu1 %vm518_vm1, %v2475_v2 }
 0x6be   :  { %2732 = vmatprep.mubr.bf16.mxu1 %v8611_v62 }
 0x6c4   :  { %v2477_v11 = vpop.permute.xlu1 %2476 }
 0x6c5   :  { %4725 = vmatmul.mubr.msk.bf16.gmra.mrb[116].mxu1 %vm518_vm1, %v2477_v11 }
 0x6c6   :  { %2742 = vmatprep.mubr.bf16.mxu1 %v8611_v62 }
 0x6c8   :  { %v2479_v46 = vpop.permute.xlu0 %2478 }
 0x6cd   :  { %4726 = vmatmul.mubr.msk.bf16.gmra.mrb[120].mxu1 %vm518_vm1, %v2479_v46 }
 0x6ce   :  { %2752 = vmatprep.mubr.bf16.mxu1 %v8611_v62 }
 0x6d0   :  { %v2624_v7 = vpop.f32.mrb[72].mxu1  ;;  %v2481_v38 = vpop.permute.xlu1 %2480 }
 0x6d1   :  { %v7125_v57 = vpop.f32.mrb[73].mxu1  ;;  %v7128_v31 = vadd.f32 %v2624_v7, %v7090_v48 }
 0x6d2   :  { %v2628_v20 = vpop.f32.mrb[74].mxu1 }
 0x6d3   :  { %v7131_v63 = vadd.f32 %v2628_v20, %v7090_v48  ;;  %v7133_v23 = vpop.f32.mrb[75].mxu1 }
 0x6d5   :  { %v2797_v0 = vpack.c.bf16 %v7131_v63, %v7128_v31  ;;  %4727 = vmatmul.mubr.msk.bf16.gmra.mrb[124].mxu1 %vm518_vm1, %v2481_v38 }
 0x709   :  { %v2634_v26 = vpop.f32.mrb[76].mxu1 }
 0x70a   :  { %v7138_v62 = vpop.f32.mrb[77].mxu1  ;;  %v7141_v17 = vadd.f32 %v2634_v26, %v7090_v48 }
 0x70b   :  { %v2638_v27 = vpop.f32.mrb[78].mxu1 }
 0x70c   :  { %v7144_v28 = vadd.f32 %v2638_v27, %v7090_v48  ;;  %v7146_v33 = vpop.f32.mrb[79].mxu1 }
 0x711   :  { %v2644_v35 = vpop.f32.mrb[80].mxu1 }
 0x712   :  { %v7150_v59 = vpop.f32.mrb[81].mxu1  ;;  %v7153_v49 = vadd.f32 %v2644_v35, %v7090_v48 }
 0x713   :  { %v2648_v40 = vpop.f32.mrb[82].mxu1 }
 0x714   :  { %v7156_v53 = vadd.f32 %v2648_v40, %v7090_v48  ;;  %v7158_v34 = vpop.f32.mrb[83].mxu1 }
 0x71d   :  { %v2654_v2 = vpop.f32.mrb[84].mxu1 }
 0x71e   :  { %v7162_v11 = vpop.f32.mrb[85].mxu1  ;;  %v7165_v7 = vadd.f32 %v2654_v2, %v7090_v48 }
 0x71f   :  { %v2658_v46 = vpop.f32.mrb[86].mxu1 }
 0x720   :  { %v7168_v20 = vadd.f32 %v2658_v46, %v7090_v48  ;;  %v7170_v38 = vpop.f32.mrb[87].mxu1 }
 0x725   :  { %v2664_v27 = vpop.f32.mrb[88].mxu1 }
 0x726   :  { %v7174_v35 = vpop.f32.mrb[89].mxu1  ;;  %v7177_v47 = vadd.f32 %v2664_v27, %v7090_v48 }
 0x727   :  { %v2668_v40 = vpop.f32.mrb[90].mxu1 }
 0x728   :  { %v7180_v50 = vadd.f32 %v2668_v40, %v7090_v48  ;;  %v7182_v2 = vpop.f32.mrb[91].mxu1  ;;  %v8689_v40 = vpack.c.bf16 %v7099_v52, %v7096_v6 }
 0x72d   :  { %v2674_v5 = vpop.f32.mrb[92].mxu1 }
 0x72e   :  { %v7186_v1 = vpop.f32.mrb[93].mxu1  ;;  %v7189_v26 = vadd.f32 %v2674_v5, %v7090_v48 }
 0x72f   :  { %v2678_v3 = vpop.f32.mrb[94].mxu1 }
 0x730   :  { %v7192_v30 = vadd.f32 %v2678_v3, %v7090_v48  ;;  %v7194_v27 = vpop.f32.mrb[95].mxu1 }
 0x732   :  { %8686 = vst [vmem:[#allocation53_spill] sm:$0xff] %v7192_v30 }
 0x735   :  { %v2684_v55 = vpop.f32.mrb[96].mxu1 }
 0x736   :  { %v7198_v54 = vpop.f32.mrb[97].mxu1  ;;  %v7201_v46 = vadd.f32 %v2684_v55, %v7090_v48 }
 0x737   :  { %v2688_v25 = vpop.f32.mrb[98].mxu1 }
 0x738   :  { %8687 = vst [vmem:[#allocation50_spill] sm:$0xff] %v7201_v46  ;;  %v7204_v43 = vadd.f32 %v2688_v25, %v7090_v48  ;;  %v7206_v5 = vpop.f32.mrb[99].mxu1 }
 0x73a   :  { %8688 = vst [vmem:[#allocation51_spill] sm:$0xff] %v7204_v43  ;;  %v2803_v3 = vpack.c.bf16 %v7204_v43, %v7201_v46 }
 0x73c   :  { %4883 = vmatprep.subr.bf16.mxu0 %v2803_v3  ;;  %v8692_v3 = vpack.c.bf16 %v7111_v29, %v7108_v39 }
 0x73d   :  { %v2694_v61 = vpop.f32.mrb[100].mxu1  ;;  %4884 = vmatpush3.bf16.msra.mxu0 %v8689_v40 }
 0x73e   :  { %v7213_v36 = vpop.f32.mrb[101].mxu1  ;;  %v7216_v55 = vadd.f32 %v2694_v61, %v7090_v48 }
 0x73f   :  { %v2698_v13 = vpop.f32.mrb[102].mxu1 }
 0x740   :  { %8690 = vst [vmem:[#allocation52_spill] sm:$0xff] %v7216_v55  ;;  %v7219_v25 = vadd.f32 %v2698_v13, %v7090_v48  ;;  %v7221_v56 = vpop.f32.mrb[103].mxu1 }
 0x742   :  { %8691 = vst [vmem:[#allocation20_spill] sm:$0xff] %v7219_v25  ;;  %v2804_v18 = vpack.c.bf16 %v7219_v25, %v7216_v55  ;;  %v5327_v25 = vld [vmem:[#allocation2 + $0x30] ss:$8 sps:$4 sm:$0xff]  }
 0x744   :  { %4885 = vmatprep.subr.bf16.mxu0 %v2804_v18 }
 0x745   :  { %4886 = vmatpush3.bf16.msra.mxu0 %v8692_v3 }
 0x751   :  { %v2704_v40 = vpop.f32.mrb[104].mxu1 }
 0x752   :  { %v7228_v10 = vpop.f32.mrb[105].mxu1  ;;  %v7231_v61 = vadd.f32 %v2704_v40, %v7090_v48 }
 0x753   :  { %v2708_v19 = vpop.f32.mrb[106].mxu1 }
 0x754   :  { %8693 = vst [vmem:[#allocation21_spill] sm:$0xff] %v7231_v61  ;;  %v7234_v13 = vadd.f32 %v2708_v19, %v7090_v48  ;;  %v7236_v41 = vpop.f32.mrb[107].mxu1 }
 0x756   :  { %8694 = vst [vmem:[#allocation22_spill] sm:$0xff] %v7234_v13  ;;  %v2805_v9 = vpack.c.bf16 %v7234_v13, %v7231_v61  ;;  %v5323_v61 = vld [vmem:[#allocation2 + $0x10] ss:$8 sps:$4 sm:$0xff]  }
 0x758   :  { %4887 = vmatprep.subr.bf16.mxu0 %v2805_v9  ;;  %v8697_v9 = vpack.c.bf16 %v7144_v28, %v7141_v17 }
 0x759   :  { %4888 = vmatpush3.bf16.msra.mxu0 %v2797_v0 }
 0x786   :  { %v2714_v18 = vpop.f32.mrb[108].mxu1 }
 0x787   :  { %v7240_v44 = vpop.f32.mrb[109].mxu1  ;;  %v7243_v4 = vadd.f32 %v2714_v18, %v7090_v48 }
 0x788   :  { %v2718_v3 = vpop.f32.mrb[110].mxu1 }
 0x789   :  { %8695 = vst [vmem:[#allocation23_spill] sm:$0xff] %v7243_v4  ;;  %v7246_v40 = vadd.f32 %v2718_v3, %v7090_v48  ;;  %v7248_v60 = vpop.f32.mrb[111].mxu1 }
 0x78b   :  { %8696 = vst [vmem:[#allocation24_spill] sm:$0xff] %v7246_v40  ;;  %v2806_v19 = vpack.c.bf16 %v7246_v40, %v7243_v4 }
 0x78d   :  { %4889 = vmatprep.subr.bf16.mxu0 %v2806_v19 }
 0x78e   :  { %4890 = vmatpush3.bf16.msra.mxu0 %v8697_v9  ;;  %v8700_v9 = vpack.c.bf16 %v7156_v53, %v7153_v49 }
 0x790   :  { %v2724_v0 = vpop.f32.mrb[112].mxu1 }
 0x791   :  { %v7255_v14 = vpop.f32.mrb[113].mxu1  ;;  %v7258_v18 = vadd.f32 %v2724_v0, %v7090_v48 }
 0x792   :  { %v2728_v37 = vpop.f32.mrb[114].mxu1 }
 0x793   :  { %8698 = vst [vmem:[#allocation25_spill] sm:$0xff] %v7258_v18  ;;  %v7261_v3 = vadd.f32 %v2728_v37, %v7090_v48  ;;  %v7263_v51 = vpop.f32.mrb[115].mxu1 }
 0x795   :  { %8699 = vst [vmem:[#allocation26_spill] sm:$0xff] %v7261_v3  ;;  %v2807_v58 = vpack.c.bf16 %v7261_v3, %v7258_v18  ;;  %v8703_v3 = vpack.c.bf16 %v7168_v20, %v7165_v7 }
 0x797   :  { %4891 = vmatprep.subr.bf16.mxu0 %v2807_v58 }
 0x798   :  { %v2734_v19 = vpop.f32.mrb[116].mxu1  ;;  %4892 = vmatpush3.bf16.msra.mxu0 %v8700_v9 }
 0x799   :  { %v7270_v15 = vpop.f32.mrb[117].mxu1  ;;  %v7273_v0 = vadd.f32 %v2734_v19, %v7090_v48 }
 0x79a   :  { %v2738_v42 = vpop.f32.mrb[118].mxu1 }
 0x79b   :  { %8701 = vst [vmem:[#allocation27_spill] sm:$0xff] %v7273_v0  ;;  %v7276_v37 = vadd.f32 %v2738_v42, %v7090_v48  ;;  %v7278_v16 = vpop.f32.mrb[119].mxu1 }
 0x79d   :  { %8702 = vst [vmem:[#allocation28_spill] sm:$0xff] %v7276_v37  ;;  %v2808_v12 = vpack.c.bf16 %v7276_v37, %v7273_v0  ;;  %v8706_v0 = vpack.c.bf16 %v7180_v50, %v7177_v47 }
 0x79f   :  { %4893 = vmatprep.subr.bf16.mxu0 %v2808_v12 }
 0x7a0   :  { %v2744_v58 = vpop.f32.mrb[120].mxu1  ;;  %4894 = vmatpush3.bf16.msra.mxu0 %v8703_v3 }
 0x7a1   :  { %v7285_v9 = vpop.f32.mrb[121].mxu1  ;;  %v7288_v19 = vadd.f32 %v2744_v58, %v7090_v48 }
 0x7a2   :  { %v2748_v18 = vpop.f32.mrb[122].mxu1 }
 0x7a3   :  { %8704 = vst [vmem:[#allocation29_spill] sm:$0xff] %v7288_v19  ;;  %v7291_v42 = vadd.f32 %v2748_v18, %v7090_v48  ;;  %v7293_v40 = vpop.f32.mrb[123].mxu1 }
 0x7a5   :  { %8705 = vst [vmem:[#allocation11_spill] sm:$0xff] %v7291_v42  ;;  %v2809_v37 = vpack.c.bf16 %v7291_v42, %v7288_v19  ;;  %v5322_v19 = vld [vmem:[#allocation2 + $0x14] ss:$8 sps:$4 sm:$0xff]  }
 0x7a7   :  { %4895 = vmatprep.subr.bf16.mxu0 %v2809_v37  ;;  %v8709_v37 = vpack.c.bf16 %v7192_v30, %v7189_v26 }
 0x7a8   :  { %v2754_v12 = vpop.f32.mrb[124].mxu1  ;;  %4896 = vmatpush3.bf16.msra.mxu0 %v8706_v0  ;;  %v5321_v0 = vld [vmem:[#allocation2] ss:$8 sps:$4 sm:$0xff]  }
 0x7a9   :  { %v7300_v3 = vpop.f32.mrb[125].mxu1  ;;  %v7303_v58 = vadd.f32 %v2754_v12, %v7090_v48  ;;  %v5324_v12 = vld [vmem:[#allocation2 + $0x24] ss:$8 sps:$4 sm:$0xff]  }
 0x7aa   :  { %v2758_v4 = vpop.f32.mrb[126].mxu1 }
 0x7ab   :  { %8707 = vst [vmem:[#allocation58_spill] sm:$0xff] %v7303_v58  ;;  %v7306_v18 = vadd.f32 %v2758_v4, %v7090_v48  ;;  %v7308_v13 = vpop.f32.mrb[127].mxu1  ;;  %v5325_v4 = vld [vmem:[#allocation2 + $0x20] ss:$8 sps:$4 sm:$0xff]   ;;  %v5326_v48 = vld [vmem:[#allocation2 + $0x34] ss:$8 sps:$4 sm:$0xff]  }
 0x7ad   :  { %8708 = vst [vmem:[#allocation59_spill] sm:$0xff] %v7306_v18  ;;  %v2810_v42 = vpack.c.bf16 %v7306_v18, %v7303_v58  ;;  %v5328_v58 = vld [vmem:[#allocation2 + $0x44] ss:$8 sps:$4 sm:$0xff]   ;;  %v5330_v18 = vld [vmem:[#allocation2 + $0x54] ss:$8 sps:$4 sm:$0xff]  }
 0x7af   :  { %4897 = vmatprep.subr.bf16.mxu0 %v2810_v42  ;;  %v5329_v42 = vld [vmem:[#allocation2 + $0x40] ss:$8 sps:$4 sm:$0xff]  }
 0x7b0   :  { %4898 = vmatpush3.bf16.msra.mxu0 %v8709_v37  ;;  %v5331_v37 = vld [vmem:[#allocation2 + $0x50] ss:$8 sps:$4 sm:$0xff]  }
 0x7b3   :  { %2844 = vmatmul.mubr.bf16.vlgmr.msra.gmra.mrb[96].mxu0 %v5321_v0  ;;  %v5332_v0 = vld [vmem:[#allocation2 + $0x64] ss:$8 sps:$4 sm:$0xff]  }
 0x7b4   :  { %2851 = vmatprep.mubr.bf16.mxu0 %v5322_v19  ;;  %v5333_v19 = vld [vmem:[#allocation2 + $0x60] ss:$8 sps:$4 sm:$0xff]  }
 0x7bb   :  { %2852 = vmatmul.mubr.bf16.gmra.mrb[100].mxu0 %v5323_v61  ;;  %v5334_v61 = vld [vmem:[#allocation2 + $0x74] ss:$8 sps:$4 sm:$0xff]  }
 0x7bc   :  { %2859 = vmatprep.mubr.bf16.mxu0 %v5324_v12  ;;  %v5335_v12 = vld [vmem:[#allocation2 + $0x70] ss:$8 sps:$4 sm:$0xff]  }
 0x7c3   :  { %2860 = vmatmul.mubr.bf16.gmra.mrb[104].mxu0 %v5325_v4  ;;  %v5336_v4 = vld [vmem:[#allocation2 + $0x84] ss:$8 sps:$4 sm:$0xff]  }
 0x7c4   :  { %2867 = vmatprep.mubr.bf16.mxu0 %v5326_v48  ;;  %v5337_v48 = vld [vmem:[#allocation2 + $0x80] ss:$8 sps:$4 sm:$0xff]  }
 0x7cb   :  { %2868 = vmatmul.mubr.bf16.gmra.mrb[108].mxu0 %v5327_v25  ;;  %v5338_v25 = vld [vmem:[#allocation2 + $0x94] ss:$8 sps:$4 sm:$0xff]  }
 0x7cc   :  { %2875 = vmatprep.mubr.bf16.mxu0 %v5328_v58  ;;  %v5339_v58 = vld [vmem:[#allocation2 + $0x90] ss:$8 sps:$4 sm:$0xff]  }
 0x7d3   :  { %2876 = vmatmul.mubr.bf16.gmra.mrb[112].mxu0 %v5329_v42  ;;  %v5340_v42 = vld [vmem:[#allocation2 + $0xa4] ss:$8 sps:$4 sm:$0xff]  }
 0x7d4   :  { %2883 = vmatprep.mubr.bf16.mxu0 %v5330_v18  ;;  %v5341_v18 = vld [vmem:[#allocation2 + $0xa0] ss:$8 sps:$4 sm:$0xff]  }
 0x7db   :  { %2884 = vmatmul.mubr.bf16.gmra.mrb[116].mxu0 %v5331_v37  ;;  %v5342_v37 = vld [vmem:[#allocation2 + $0xb4] ss:$8 sps:$4 sm:$0xff]  }
 0x7dc   :  { %2891 = vmatprep.mubr.bf16.mxu0 %v5332_v0  ;;  %v4731_v0 = vld [vmem:[%s8380_s7 + $0x1] ss:$0 sm:$0xff] }
 0x7dd   :  { %3981 = vrot.lane.b32.xlu0 %v4731_v0, %s5428_s1  ;;  %v8710_v0 = vsub.s32 1, %v8684_v22 }
 0x7e3   :  { %2892 = vmatmul.mubr.bf16.gmra.mrb[120].mxu0 %v5333_v19  ;;  %v5343_v19 = vld [vmem:[#allocation2 + $0xb0] ss:$8 sps:$4 sm:$0xff]  }
 0x7e4   :  { %2899 = vmatprep.mubr.bf16.mxu0 %v5334_v61  ;;  %v5344_v61 = vld [vmem:[#allocation2 + $0xc4] ss:$8 sps:$4 sm:$0xff]  }
 0x7eb   :  { %2900 = vmatmul.mubr.bf16.gmra.mrb[124].mxu0 %v5335_v12  ;;  %v4729_v12 = vld [vmem:[%s8379_s6 + $0x1] ss:$0 sm:$0xff] }
 0x7ec   :  { %2907 = vmatprep.mubr.bf16.mxu0 %v5336_v4  ;;  %3939 = vrot.lane.b32.xlu1 %v4729_v12, %s5428_s1  ;;  %v5345_v4 = vld [vmem:[#allocation2 + $0xc0] ss:$8 sps:$4 sm:$0xff]  }
 0x7f3   :  { %2908 = vmatmul.mubr.bf16.gmra.mrb[128].mxu0 %v5337_v48  ;;  %v5346_v48 = vld [vmem:[#allocation2 + $0xd4] ss:$8 sps:$4 sm:$0xff]  }
 0x7f4   :  { %2915 = vmatprep.mubr.bf16.mxu0 %v5338_v25  ;;  %v5347_v25 = vld [vmem:[#allocation2 + $0xd0] ss:$8 sps:$4 sm:$0xff]  }
 0x7fb   :  { %2916 = vmatmul.mubr.bf16.gmra.mrb[132].mxu0 %v5339_v58  ;;  %v5348_v58 = vld [vmem:[#allocation2 + $0xe4] ss:$8 sps:$4 sm:$0xff]  }
 0x7fc   :  { %2923 = vmatprep.mubr.bf16.mxu0 %v5340_v42  ;;  %v5349_v42 = vld [vmem:[#allocation2 + $0xe0] ss:$8 sps:$4 sm:$0xff]  }
 0x803   :  { %2924 = vmatmul.mubr.bf16.gmra.mrb[136].mxu0 %v5341_v18  ;;  %v5350_v18 = vld [vmem:[#allocation2 + $0xf4] ss:$8 sps:$4 sm:$0xff]  }
 0x804   :  { %2931 = vmatprep.mubr.bf16.mxu0 %v5342_v37  ;;  %v5351_v37 = vld [vmem:[#allocation2 + $0xf0] ss:$8 sps:$4 sm:$0xff]  }
 0x80b   :  { %2932 = vmatmul.mubr.bf16.gmra.mrb[140].mxu0 %v5343_v19  ;;  %v7326_v19 = vrot.slane %v7084_v45, %v8710_v0 }
 0x80c   :  { %2939 = vmatprep.mubr.bf16.mxu0 %v5344_v61 }
 0x80d   :  { %v2617_v0 = vadd.f32 %v7105_v21, %v7326_v19 }
 0x813   :  { %2940 = vmatmul.mubr.bf16.gmra.mrb[144].mxu0 %v5345_v4  ;;  %v2607_v4 = vadd.f32 %v7093_v8, %v7326_v19 }
 0x814   :  { %2947 = vmatprep.mubr.bf16.mxu0 %v5346_v48 }
 0x81b   :  { %2948 = vmatmul.mubr.bf16.gmra.mrb[148].mxu0 %v5347_v25 }
 0x81c   :  { %2955 = vmatprep.mubr.bf16.mxu0 %v5348_v58  ;;  %v2611_v58 = vadd.f32 %v7101_v24, %v7326_v19  ;;  %v2621_v24 = vadd.f32 %v7113_v32, %v7326_v19 }
 0x823   :  { %2956 = vmatmul.mubr.bf16.gmra.mrb[152].mxu0 %v5349_v42 }
 0x824   :  { %2963 = vmatprep.mubr.bf16.mxu0 %v5350_v18 }
 0x82b   :  { %2964 = vmatmul.mubr.bf16.gmra.mrb[156].mxu0 %v5351_v37 }
 0x886   :  { %v4899_v61 = vpop.f32.mrb[96].mxu0 }
 0x887   :  { %v4900_v12 = vpop.f32.mrb[97].mxu0 }
 0x888   :  { %v4901_v48 = vadd.f32 %v4900_v12, %v4899_v61  ;;  %v4902_v25 = vpop.f32.mrb[98].mxu0 }
 0x889   :  { %v4903_v55 = vpop.f32.mrb[99].mxu0 }
 0x88a   :  { %v2846_v42 = vadd.f32 %v4901_v48, %v2607_v4  ;;  %v4904_v18 = vadd.f32 %v4903_v55, %v4902_v25 }
 0x88c   :  { %v2972_v43 = vmax.f32 %v2846_v42, 0.0  ;;  %v2849_v37 = vadd.f32 %v4904_v18, %v2611_v58 }
 0x88e   :  { %v2973_v46 = vmax.f32 %v2849_v37, 0.0  ;;  %v4905_v22 = vpop.f32.mrb[100].mxu0  ;;  %3036 = vrot.lane.b32.xlu0 %v2972_v43, %s5428_s1  ;;  %v4016_v48 = vmul.f32 0.5, %v2972_v43  ;;  %v2631_v43 = vadd.f32 %v7133_v23, %v7326_v19 }
 0x88f   :  { %v4906_v45 = vpop.f32.mrb[101].mxu0 }
 0x890   :  { %v4907_v30 = vadd.f32 %v4906_v45, %v4905_v22  ;;  %v4908_v8 = vpop.f32.mrb[102].mxu0  ;;  %3038 = vrot.lane.b32.xlu1 %v2973_v46, %s5428_s1  ;;  %v4017_v61 = vmul.f32 0.5, %v2973_v46  ;;  %v2627_v46 = vadd.f32 %v7125_v57, %v7326_v19 }
 0x891   :  { %v4909_v12 = vpop.f32.mrb[103].mxu0 }
 0x892   :  { %v2854_v55 = vadd.f32 %v4907_v30, %v2617_v0  ;;  %v4910_v4 = vadd.f32 %v4909_v12, %v4908_v8  ;;  %4082 = vrot.lane.b32.xlu0 %v4017_v61, %s5428_s1 }
 0x894   :  { %v2974_v25 = vmax.f32 %v2854_v55, 0.0  ;;  %v2857_v58 = vadd.f32 %v4910_v4, %v2621_v24  ;;  %4080 = vrot.lane.b32.xlu1 %v4016_v48, %s5428_s1  ;;  %v2637_v4 = vadd.f32 %v7138_v62, %v7326_v19 }
 0x896   :  { %v2975_v42 = vmax.f32 %v2857_v58, 0.0  ;;  %v4911_v21 = vpop.f32.mrb[104].mxu0  ;;  %3040 = vrot.lane.b32.xlu0 %v2974_v25, %s5428_s1  ;;  %v4018_v8 = vmul.f32 0.5, %v2974_v25  ;;  %v2641_v25 = vadd.f32 %v7146_v33, %v7326_v19 }
 0x897   :  { %v4912_v18 = vpop.f32.mrb[105].mxu0 }
 0x898   :  { %v4913_v37 = vadd.f32 %v4912_v18, %v4911_v21  ;;  %v4914_v22 = vpop.f32.mrb[106].mxu0  ;;  %3042 = vrot.lane.b32.xlu1 %v2975_v42, %s5428_s1  ;;  %v4019_v30 = vmul.f32 0.5, %v2975_v42 }
 0x899   :  { %v4915_v32 = vpop.f32.mrb[107].mxu0 }
 0x89a   :  { %v2862_v45 = vadd.f32 %v4913_v37, %v2627_v46  ;;  %v4916_v0 = vadd.f32 %v4915_v32, %v4914_v22  ;;  %4086 = vrot.lane.b32.xlu0 %v4019_v30, %s5428_s1 }
 0x89c   :  { %v2976_v61 = vmax.f32 %v2862_v45, 0.0  ;;  %v2865_v12 = vadd.f32 %v4916_v0, %v2631_v43  ;;  %4084 = vrot.lane.b32.xlu1 %v4018_v8, %s5428_s1  ;;  %v2647_v43 = vadd.f32 %v7150_v59, %v7326_v19 }
 0x89e   :  { %v2977_v24 = vmax.f32 %v2865_v12, 0.0  ;;  %v4917_v57 = vpop.f32.mrb[108].mxu0  ;;  %3044 = vrot.lane.b32.xlu0 %v2976_v61, %s5428_s1  ;;  %v4020_v46 = vmul.f32 0.5, %v2976_v61  ;;  %v2651_v61 = vadd.f32 %v7158_v34, %v7326_v19 }
 0x89f   :  { %v4918_v55 = vpop.f32.mrb[109].mxu0 }
 0x8a0   :  { %v4919_v48 = vadd.f32 %v4918_v55, %v4917_v57  ;;  %v4920_v58 = vpop.f32.mrb[110].mxu0  ;;  %3046 = vrot.lane.b32.xlu1 %v2977_v24, %s5428_s1  ;;  %v4021_v23 = vmul.f32 0.5, %v2977_v24 }
 0x8a1   :  { %v4921_v42 = vpop.f32.mrb[111].mxu0 }
 0x8a2   :  { %v2870_v21 = vadd.f32 %v4919_v48, %v2637_v4  ;;  %v4922_v18 = vadd.f32 %v4921_v42, %v4920_v58  ;;  %4090 = vrot.lane.b32.xlu0 %v4021_v23, %s5428_s1  ;;  %v2657_v23 = vadd.f32 %v7162_v11, %v7326_v19 }
 0x8a4   :  { %v2978_v37 = vmax.f32 %v2870_v21, 0.0  ;;  %v2873_v22 = vadd.f32 %v4922_v18, %v2641_v25  ;;  %4088 = vrot.lane.b32.xlu1 %v4020_v46, %s5428_s1  ;;  %v2661_v18 = vadd.f32 %v7170_v38, %v7326_v19 }
 0x8a6   :  { %v2979_v30 = vmax.f32 %v2873_v22, 0.0  ;;  %v4923_v62 = vpop.f32.mrb[112].mxu0  ;;  %3048 = vrot.lane.b32.xlu0 %v2978_v37, %s5428_s1  ;;  %v4022_v57 = vmul.f32 0.5, %v2978_v37 }
 0x8a7   :  { %v4924_v32 = vpop.f32.mrb[113].mxu0 }
 0x8a8   :  { %v4925_v45 = vadd.f32 %v4924_v32, %v4923_v62  ;;  %v4926_v0 = vpop.f32.mrb[114].mxu0  ;;  %3050 = vrot.lane.b32.xlu1 %v2979_v30, %s5428_s1  ;;  %v4023_v33 = vmul.f32 0.5, %v2979_v30 }
 0x8a9   :  { %v4927_v8 = vpop.f32.mrb[115].mxu0 }
 0x8aa   :  { %v2878_v12 = vadd.f32 %v4925_v45, %v2647_v43  ;;  %v4928_v24 = vadd.f32 %v4927_v8, %v4926_v0  ;;  %4094 = vrot.lane.b32.xlu0 %v4023_v33, %s5428_s1  ;;  %v2667_v45 = vadd.f32 %v7174_v35, %v7326_v19 }
 0x8ac   :  { %v2980_v55 = vmax.f32 %v2878_v12, 0.0  ;;  %v2881_v4 = vadd.f32 %v4928_v24, %v2651_v61  ;;  %4092 = vrot.lane.b32.xlu1 %v4022_v57, %s5428_s1  ;;  %v2671_v61 = vadd.f32 %v7182_v2, %v7326_v19 }
 0x8ae   :  { %v2981_v48 = vmax.f32 %v2881_v4, 0.0  ;;  %v4929_v59 = vpop.f32.mrb[116].mxu0  ;;  %3052 = vrot.lane.b32.xlu0 %v2980_v55, %s5428_s1  ;;  %v4024_v22 = vmul.f32 0.5, %v2980_v55 }
 0x8af   :  { %v4930_v58 = vpop.f32.mrb[117].mxu0 }
 0x8b0   :  { %v4931_v42 = vadd.f32 %v4930_v58, %v4929_v59  ;;  %v4932_v25 = vpop.f32.mrb[118].mxu0  ;;  %3054 = vrot.lane.b32.xlu1 %v2981_v48, %s5428_s1  ;;  %v4025_v34 = vmul.f32 0.5, %v2981_v48  ;;  %v2677_v58 = vadd.f32 %v7186_v1, %v7326_v19 }
 0x8b1   :  { %v4933_v21 = vpop.f32.mrb[119].mxu0 }
 0x8b2   :  { %v2886_v46 = vadd.f32 %v4931_v42, %v2657_v23  ;;  %v4934_v37 = vadd.f32 %v4933_v21, %v4932_v25  ;;  %4098 = vrot.lane.b32.xlu0 %v4025_v34, %s5428_s1  ;;  %v2681_v34 = vadd.f32 %v7194_v27, %v7326_v19 }
 0x8b4   :  { %v2982_v30 = vmax.f32 %v2886_v46, 0.0  ;;  %v2889_v62 = vadd.f32 %v4934_v37, %v2661_v18  ;;  %4096 = vrot.lane.b32.xlu1 %v4024_v22, %s5428_s1 }
 0x8b6   :  { %v2983_v32 = vmax.f32 %v2889_v62, 0.0  ;;  %v4935_v11 = vpop.f32.mrb[120].mxu0  ;;  %3056 = vrot.lane.b32.xlu0 %v2982_v30, %s5428_s1  ;;  %v4026_v57 = vmul.f32 0.5, %v2982_v30 }
 0x8b7   :  { %v4936_v43 = vpop.f32.mrb[121].mxu0 }
 0x8b8   :  { %v4937_v0 = vadd.f32 %v4936_v43, %v4935_v11  ;;  %v4938_v33 = vpop.f32.mrb[122].mxu0  ;;  %3058 = vrot.lane.b32.xlu1 %v2983_v32, %s5428_s1  ;;  %v4027_v38 = vmul.f32 0.5, %v2983_v32  ;;  %v2687_v32 = vadd.f32 %v7198_v54, %v7326_v19 }
 0x8b9   :  { %v4939_v8 = vpop.f32.mrb[123].mxu0 }
 0x8ba   :  { %v2894_v12 = vadd.f32 %v4937_v0, %v2667_v45  ;;  %v4940_v24 = vadd.f32 %v4939_v8, %v4938_v33  ;;  %4102 = vrot.lane.b32.xlu0 %v4027_v38, %s5428_s1  ;;  %v2691_v45 = vadd.f32 %v7206_v5, %v7326_v19 }
 0x8bc   :  { %v2984_v55 = vmax.f32 %v2894_v12, 0.0  ;;  %v2897_v4 = vadd.f32 %v4940_v24, %v2671_v61  ;;  %4100 = vrot.lane.b32.xlu1 %v4026_v57, %s5428_s1  ;;  %v2697_v57 = vadd.f32 %v7213_v36, %v7326_v19 }
 0x8be   :  { %v2985_v48 = vmax.f32 %v2897_v4, 0.0  ;;  %v4941_v35 = vpop.f32.mrb[124].mxu0  ;;  %3060 = vrot.lane.b32.xlu0 %v2984_v55, %s5428_s1  ;;  %v4028_v46 = vmul.f32 0.5, %v2984_v55 }
 0x8bf   :  { %v4942_v59 = vpop.f32.mrb[125].mxu0 }
 0x8c0   :  { %v4943_v23 = vadd.f32 %v4942_v59, %v4941_v35  ;;  %v4944_v42 = vpop.f32.mrb[126].mxu0  ;;  %3062 = vrot.lane.b32.xlu1 %v2985_v48, %s5428_s1  ;;  %v4029_v2 = vmul.f32 0.5, %v2985_v48  ;;  %v2701_v35 = vadd.f32 %v7221_v56, %v7326_v19 }
 0x8c1   :  { %v4945_v25 = vpop.f32.mrb[127].mxu0 }
 0x8c2   :  { %v2902_v21 = vadd.f32 %v4943_v23, %v2677_v58  ;;  %v4946_v18 = vadd.f32 %v4945_v25, %v4944_v42  ;;  %4106 = vrot.lane.b32.xlu0 %v4029_v2, %s5428_s1 }
 0x8c4   :  { %v2986_v37 = vmax.f32 %v2902_v21, 0.0  ;;  %v2905_v22 = vadd.f32 %v4946_v18, %v2681_v34  ;;  %4104 = vrot.lane.b32.xlu1 %v4028_v46, %s5428_s1  ;;  %v2707_v21 = vadd.f32 %v7228_v10, %v7326_v19 }
 0x8c6   :  { %v2987_v30 = vmax.f32 %v2905_v22, 0.0  ;;  %v4947_v1 = vpop.f32.mrb[128].mxu0  ;;  %3064 = vrot.lane.b32.xlu0 %v2986_v37, %s5428_s1  ;;  %v4030_v38 = vmul.f32 0.5, %v2986_v37  ;;  %v2711_v22 = vadd.f32 %v7236_v41, %v7326_v19 }
 0x8c7   :  { %v4948_v62 = vpop.f32.mrb[129].mxu0 }
 0x8c8   :  { %v4949_v11 = vadd.f32 %v4948_v62, %v4947_v1  ;;  %v4950_v43 = vpop.f32.mrb[130].mxu0  ;;  %3066 = vrot.lane.b32.xlu1 %v2987_v30, %s5428_s1  ;;  %v4031_v24 = vmul.f32 0.5, %v2987_v30 }
 0x8c9   :  { %v4951_v27 = vpop.f32.mrb[131].mxu0 }
 0x8ca   :  { %v2910_v0 = vadd.f32 %v4949_v11, %v2687_v32  ;;  %v4952_v33 = vadd.f32 %v4951_v27, %v4950_v43 }
 0x8cc   :  { %v2988_v8 = vmax.f32 %v2910_v0, 0.0  ;;  %v2913_v61 = vadd.f32 %v4952_v33, %v2691_v45  ;;  %4108 = vrot.lane.b32.xlu1 %v4030_v38, %s5428_s1  ;;  %v2717_v45 = vadd.f32 %v7240_v44, %v7326_v19 }
 0x8ce   :  { %v4953_v12 = vpop.f32.mrb[132].mxu0  ;;  %3068 = vrot.lane.b32.xlu0 %v2988_v8, %s5428_s1  ;;  %v4032_v5 = vmul.f32 0.5, %v2988_v8  ;;  %v2989_v59 = vmax.f32 %v2913_v61, 0.0  ;;  %v2721_v8 = vadd.f32 %v7248_v60, %v7326_v19 }
 0x8cf   :  { %v4954_v54 = vpop.f32.mrb[133].mxu0 }
 0x8d0   :  { %v4955_v55 = vadd.f32 %v4954_v54, %v4953_v12  ;;  %v4956_v4 = vpop.f32.mrb[134].mxu0  ;;  %4110 = vrot.lane.b32.xlu1 %v4031_v24, %s5428_s1  ;;  %v4033_v36 = vmul.f32 0.5, %v2989_v59 }
 0x8d1   :  { %v4957_v48 = vpop.f32.mrb[135].mxu0 }
 0x8d2   :  { %v2918_v58 = vadd.f32 %v4955_v55, %v2697_v57  ;;  %v4958_v23 = vadd.f32 %v4957_v48, %v4956_v4  ;;  %4112 = vrot.lane.b32.xlu0 %v4032_v5, %s5428_s1  ;;  %v2727_v5 = vadd.f32 %v7255_v14, %v7326_v19 }
 0x8d4   :  { %v2990_v42 = vmax.f32 %v2918_v58, 0.0  ;;  %v2921_v2 = vadd.f32 %v4958_v23, %v2701_v35  ;;  %3070 = vrot.lane.b32.xlu1 %v2989_v59, %s5428_s1  ;;  %v2731_v58 = vadd.f32 %v7263_v51, %v7326_v19 }
 0x8d6   :  { %v4959_v25 = vpop.f32.mrb[136].mxu0  ;;  %3072 = vrot.lane.b32.xlu0 %v2990_v42, %s5428_s1  ;;  %v4034_v56 = vmul.f32 0.5, %v2990_v42  ;;  %v2991_v30 = vmax.f32 %v2921_v2, 0.0 }
 0x8d7   :  { %v4960_v34 = vpop.f32.mrb[137].mxu0 }
 0x8d8   :  { %v4961_v18 = vadd.f32 %v4960_v34, %v4959_v25  ;;  %v4962_v46 = vpop.f32.mrb[138].mxu0  ;;  %4114 = vrot.lane.b32.xlu1 %v4033_v36, %s5428_s1  ;;  %v4035_v10 = vmul.f32 0.5, %v2991_v30 }
 0x8d9   :  { %v4963_v37 = vpop.f32.mrb[139].mxu0 }
 0x8da   :  { %v2926_v1 = vadd.f32 %v4961_v18, %v2707_v21  ;;  %v4964_v62 = vadd.f32 %v4963_v37, %v4962_v46  ;;  %4116 = vrot.lane.b32.xlu0 %v4034_v56, %s5428_s1  ;;  %v2737_v18 = vadd.f32 %v7270_v15, %v7326_v19 }
 0x8dc   :  { %v2992_v32 = vmax.f32 %v2926_v1, 0.0  ;;  %v2929_v11 = vadd.f32 %v4964_v62, %v2711_v22  ;;  %3074 = vrot.lane.b32.xlu1 %v2991_v30, %s5428_s1  ;;  %v2741_v22 = vadd.f32 %v7278_v16, %v7326_v19  ;;  %v2747_v16 = vadd.f32 %v7285_v9, %v7326_v19  ;;  %v7459_v9 = vpop.permute.xlu1 %3939 }
 0x8de   :  { %v4965_v43 = vpop.f32.mrb[140].mxu0  ;;  %3076 = vrot.lane.b32.xlu0 %v2992_v32, %s5428_s1  ;;  %v4036_v41 = vmul.f32 0.5, %v2992_v32  ;;  %v2993_v61 = vmax.f32 %v2929_v11, 0.0 }
 0x8df   :  { %v4966_v27 = vpop.f32.mrb[141].mxu0 }
 0x8e0   :  { %v4967_v0 = vadd.f32 %v4966_v27, %v4965_v43  ;;  %v4968_v33 = vpop.f32.mrb[142].mxu0  ;;  %4118 = vrot.lane.b32.xlu1 %v4035_v10, %s5428_s1  ;;  %v4037_v44 = vmul.f32 0.5, %v2993_v61 }
 0x8e1   :  { %v4969_v38 = vpop.f32.mrb[143].mxu0 }
 0x8e2   :  { %v2934_v12 = vadd.f32 %v4967_v0, %v2717_v45  ;;  %v4970_v24 = vadd.f32 %v4969_v38, %v4968_v33  ;;  %4120 = vrot.lane.b32.xlu0 %v4036_v41, %s5428_s1  ;;  %v2751_v33 = vadd.f32 %v7293_v40, %v7326_v19 }
 0x8e4   :  { %v2994_v54 = vmax.f32 %v2934_v12, 0.0  ;;  %v2937_v57 = vadd.f32 %v4970_v24, %v2721_v8  ;;  %3078 = vrot.lane.b32.xlu1 %v2993_v61, %s5428_s1  ;;  %v7451_v61 = vpop.permute.xlu0 %3981 }
 0x8e6   :  { %v4971_v55 = vpop.f32.mrb[144].mxu0  ;;  %3080 = vrot.lane.b32.xlu0 %v2994_v54, %s5428_s1  ;;  %v4038_v60 = vmul.f32 0.5, %v2994_v54  ;;  %v2995_v23 = vmax.f32 %v2937_v57, 0.0  ;;  %v2763_v57 = vmax.f32 %v7096_v6, 0.0 }
 0x8e7   :  { %v4972_v4 = vpop.f32.mrb[145].mxu0 }
 0x8e8   :  { %v4973_v48 = vadd.f32 %v4972_v4, %v4971_v55  ;;  %v4974_v35 = vpop.f32.mrb[146].mxu0  ;;  %4122 = vrot.lane.b32.xlu1 %v4037_v44, %s5428_s1  ;;  %v4039_v14 = vmul.f32 0.5, %v2995_v23  ;;  %v2757_v44 = vadd.f32 %v7300_v3, %v7326_v19 }
 0x8e9   :  { %v4975_v59 = vpop.f32.mrb[147].mxu0 }
 0x8ea   :  { %v2942_v42 = vadd.f32 %v4973_v48, %v2727_v5  ;;  %v4976_v2 = vadd.f32 %v4975_v59, %v4974_v35  ;;  %4124 = vrot.lane.b32.xlu0 %v4038_v60, %s5428_s1  ;;  %v2764_v35 = vmax.f32 %v7099_v52, 0.0 }
 0x8ec   :  { %v2996_v25 = vmax.f32 %v2942_v42, 0.0  ;;  %v2945_v36 = vadd.f32 %v4976_v2, %v2731_v58  ;;  %3082 = vrot.lane.b32.xlu1 %v2995_v23, %s5428_s1  ;;  %v2761_v58 = vadd.f32 %v7308_v13, %v7326_v19 }
 0x8ee   :  { %v4977_v34 = vpop.f32.mrb[148].mxu0  ;;  %3084 = vrot.lane.b32.xlu0 %v2996_v25, %s5428_s1  ;;  %v4040_v51 = vmul.f32 0.5, %v2996_v25  ;;  %v2997_v30 = vmax.f32 %v2945_v36, 0.0 }
 0x8ef   :  { %v4978_v21 = vpop.f32.mrb[149].mxu0 }
 0x8f0   :  { %v4979_v46 = vadd.f32 %v4978_v21, %v4977_v34  ;;  %v4980_v56 = vpop.f32.mrb[150].mxu0  ;;  %4126 = vrot.lane.b32.xlu1 %v4039_v14, %s5428_s1  ;;  %v4041_v43 = vmul.f32 0.5, %v2997_v30  ;;  %v2765_v21 = vmax.f32 %v7108_v39, 0.0 }
 0x8f1   :  { %v4981_v37 = vpop.f32.mrb[151].mxu0 }
 0x8f2   :  { %v7433_v1 = vadd.f32 %v4979_v46, %v2737_v18  ;;  %v4982_v62 = vadd.f32 %v4981_v37, %v4980_v56  ;;  %4128 = vrot.lane.b32.xlu0 %v4040_v51, %s5428_s1  ;;  %v2766_v56 = vmax.f32 %v7111_v29, 0.0 }
 0x8f4   :  { %v8500_v32 = vmax.f32 %v7433_v1, 0.0  ;;  %v7437_v11 = vadd.f32 %v4982_v62, %v2741_v22  ;;  %3086 = vrot.lane.b32.xlu1 %v2997_v30, %s5428_s1  ;;  %v2767_v62 = vmax.f32 %v7128_v31, 0.0 }
 0x8f6   :  { %v4983_v15 = vpop.f32.mrb[152].mxu0  ;;  %3088 = vrot.lane.b32.xlu0 %v8500_v32, %s5428_s1  ;;  %v8503_v41 = vmax.f32 %v7437_v11, 0.0 }
 0x8f7   :  { %v4984_v10 = vpop.f32.mrb[153].mxu0 }
 0x8f8   :  { %v4985_v27 = vadd.f32 %v4984_v10, %v4983_v15  ;;  %v4986_v45 = vpop.f32.mrb[154].mxu0  ;;  %4130 = vrot.lane.b32.xlu1 %v4041_v43, %s5428_s1  ;;  %v2768_v10 = vmax.f32 %v7131_v63, 0.0  ;;  %v2769_v63 = vmax.f32 %v7141_v17, 0.0 }
 0x8f9   :  { %v4987_v0 = vpop.f32.mrb[155].mxu0 }
 0x8fa   :  { %v7449_v38 = vadd.f32 %v4985_v27, %v2747_v16  ;;  %v4988_v8 = vadd.f32 %v4987_v0, %v4986_v45 }
 0x8fc   :  { %v8499_v12 = vmax.f32 %v7449_v38, 0.0  ;;  %v7454_v24 = vadd.f32 %v4988_v8, %v2751_v33  ;;  %3090 = vrot.lane.b32.xlu1 %v8503_v41, %s5428_s1 }
 0x8fe   :  { %v8502_v54 = vmax.f32 %v7454_v24, 0.0  ;;  %v4989_v40 = vpop.f32.mrb[156].mxu0  ;;  %3092 = vrot.lane.b32.xlu0 %v8499_v12, %s5428_s1 }
 0x8ff   :  { %v4990_v55 = vpop.f32.mrb[157].mxu0 }
 0x900   :  { %v4991_v4 = vadd.f32 %v4990_v55, %v4989_v40  ;;  %v4992_v5 = vpop.f32.mrb[158].mxu0  ;;  %3094 = vrot.lane.b32.xlu1 %v8502_v54, %s5428_s1  ;;  %v3037_v48 = vpop.permute.xlu0 %3036 }
 0x901   :  { %v7472_v60 = vmul.f32 %v3037_v48, %v2763_v57  ;;  %v4993_v59 = vpop.f32.mrb[159].mxu0  ;;  %v2770_v57 = vmax.f32 %v7144_v28, 0.0  ;;  %v2771_v28 = vmax.f32 %v7153_v49, 0.0 }
 0x902   :  { %v7476_v6 = vadd.f32 %v4991_v4, %v2757_v44  ;;  %v4994_v23 = vadd.f32 %v4993_v59, %v4992_v5  ;;  %v3039_v42 = vpop.permute.xlu1 %3038 }
 0x903   :  { %v7478_v3 = vmul.f32 %v3039_v42, %v2764_v35  ;;  %3196 = vrot.lane.b32.xlu0 %v7472_v60, %s5428_s1  ;;  %v3420_v52 = vmul.f32 %v7472_v60, %v7472_v60 }
 0x904   :  { %v7482_v2 = vadd.f32 %v4994_v23, %v2761_v58  ;;  %v7484_v25 = vpop.permute.xlu0 %4082  ;;  %v8498_v34 = vmax.f32 %v7476_v6, 0.0  ;;  %v2772_v58 = vmax.f32 %v7156_v53, 0.0  ;;  %v2773_v53 = vmax.f32 %v7165_v7, 0.0 }
 0x905   :  { %3198 = vrot.lane.b32.xlu1 %v7478_v3, %s5428_s1  ;;  %v3421_v19 = vmul.f32 %v7478_v3, %v7478_v3 }
 0x906   :  { %v7490_v13 = vpop.permute.xlu1 %4080  ;;  %v8501_v18 = vmax.f32 %v7482_v2, 0.0 }
 0x907   :  { %3484 = vrot.lane.b32.xlu0 %v3420_v52, %s5428_s1 }
 0x908   :  { %v3041_v36 = vpop.permute.xlu0 %3040 }
 0x909   :  { %3486 = vrot.lane.b32.xlu1 %v3421_v19, %s5428_s1  ;;  %v7505_v51 = vmul.f32 %v3041_v36, %v2765_v21 }
 0x90a   :  { %v3043_v14 = vpop.permute.xlu1 %3042 }
 0x90b   :  { %3096 = vrot.lane.b32.xlu0 %v8498_v34, %s5428_s1  ;;  %v7512_v22 = vmul.f32 %v3043_v14, %v2766_v56  ;;  %v3422_v29 = vmul.f32 %v7505_v51, %v7505_v51  ;;  %v2774_v56 = vmax.f32 %v7168_v20, 0.0  ;;  %v2775_v20 = vmax.f32 %v7177_v47, 0.0 }
 0x90c   :  { %v7502_v46 = vpop.permute.xlu0 %4086 }
 0x90d   :  { %3098 = vrot.lane.b32.xlu1 %v8501_v18, %s5428_s1  ;;  %v3423_v15 = vmul.f32 %v7512_v22, %v7512_v22 }
 0x90e   :  { %v7510_v37 = vpop.permute.xlu1 %4084 }
 0x90f   :  { %3200 = vrot.lane.b32.xlu0 %v7505_v51, %s5428_s1 }
 0x910   :  { %v3045_v39 = vpop.permute.xlu0 %3044 }
 0x911   :  { %3202 = vrot.lane.b32.xlu1 %v7512_v22, %s5428_s1  ;;  %v7527_v16 = vmul.f32 %v3045_v39, %v2767_v62 }
 0x912   :  { %v3047_v30 = vpop.permute.xlu1 %3046 }
 0x913   :  { %3488 = vrot.lane.b32.xlu0 %v3422_v29, %s5428_s1  ;;  %v7532_v45 = vmul.f32 %v3047_v30, %v2768_v10  ;;  %v3424_v0 = vmul.f32 %v7527_v16, %v7527_v16 }
 0x914   :  { %v7524_v43 = vpop.permute.xlu0 %4090 }
 0x915   :  { %3490 = vrot.lane.b32.xlu1 %v3423_v15, %s5428_s1  ;;  %v3425_v8 = vmul.f32 %v7532_v45, %v7532_v45 }
 0x916   :  { %v7530_v27 = vpop.permute.xlu1 %4088 }
 0x917   :  { %3204 = vrot.lane.b32.xlu0 %v7527_v16, %s5428_s1 }
 0x918   :  { %v3049_v31 = vpop.permute.xlu0 %3048 }
 0x919   :  { %3206 = vrot.lane.b32.xlu1 %v7532_v45, %s5428_s1  ;;  %v7547_v55 = vmul.f32 %v3049_v31, %v2769_v63 }
 0x91a   :  { %v3051_v33 = vpop.permute.xlu1 %3050 }
 0x91b   :  { %3492 = vrot.lane.b32.xlu0 %v3424_v0, %s5428_s1  ;;  %v7552_v4 = vmul.f32 %v3051_v33, %v2770_v57  ;;  %v3426_v5 = vmul.f32 %v7547_v55, %v7547_v55  ;;  %v2776_v0 = vmax.f32 %v7180_v50, 0.0  ;;  %v2777_v50 = vmax.f32 %v7189_v26, 0.0 }
 0x91c   :  { %v7544_v40 = vpop.permute.xlu0 %4094 }
 0x91d   :  { %3494 = vrot.lane.b32.xlu1 %v3425_v8, %s5428_s1  ;;  %v3427_v35 = vmul.f32 %v7552_v4, %v7552_v4 }
 0x91e   :  { %v7550_v44 = vpop.permute.xlu1 %4092 }
 0x91f   :  { %3208 = vrot.lane.b32.xlu0 %v7547_v55, %s5428_s1 }
 0x920   :  { %v3053_v17 = vpop.permute.xlu0 %3052 }
 0x921   :  { %3210 = vrot.lane.b32.xlu1 %v7552_v4, %s5428_s1  ;;  %v7567_v23 = vmul.f32 %v3053_v17, %v2771_v28 }
 0x922   :  { %v3055_v48 = vpop.permute.xlu1 %3054 }
 0x923   :  { %3496 = vrot.lane.b32.xlu0 %v3426_v5, %s5428_s1  ;;  %v7572_v52 = vmul.f32 %v3055_v48, %v2772_v58  ;;  %v3428_v19 = vmul.f32 %v7567_v23, %v7567_v23  ;;  %v8715_v48 = vld [vmem:[#allocation53_spill] sm:$0xff] }
 0x924   :  { %v7564_v59 = vpop.permute.xlu0 %4098  ;;  %v2778_v28 = vmax.f32 %v8715_v48, 0.0 }
 0x925   :  { %3498 = vrot.lane.b32.xlu1 %v3427_v35, %s5428_s1  ;;  %v3429_v14 = vmul.f32 %v7572_v52, %v7572_v52 }
 0x926   :  { %v7570_v42 = vpop.permute.xlu1 %4096 }
 0x927   :  { %3212 = vrot.lane.b32.xlu0 %v7567_v23, %s5428_s1 }
 0x928   :  { %v3057_v49 = vpop.permute.xlu0 %3056 }
 0x929   :  { %3214 = vrot.lane.b32.xlu1 %v7572_v52, %s5428_s1  ;;  %v7587_v39 = vmul.f32 %v3057_v49, %v2773_v53  ;;  %v8720_v53 = vld [vmem:[#allocation50_spill] sm:$0xff] }
 0x92a   :  { %v3059_v36 = vpop.permute.xlu1 %3058 }
 0x92b   :  { %3500 = vrot.lane.b32.xlu0 %v3428_v19, %s5428_s1  ;;  %v7592_v30 = vmul.f32 %v3059_v36, %v2774_v56  ;;  %v3430_v62 = vmul.f32 %v7587_v39, %v7587_v39 }
 0x92c   :  { %v7584_v21 = vpop.permute.xlu0 %4102 }
 0x92d   :  { %8711 = vst [vmem:[#allocation60_spill] sm:$0xff] %v7584_v21  ;;  %3502 = vrot.lane.b32.xlu1 %v3429_v14, %s5428_s1  ;;  %v3431_v10 = vmul.f32 %v7592_v30, %v7592_v30  ;;  %v2779_v14 = vmax.f32 %v8720_v53, 0.0 }
 0x92e   :  { %v7590_v29 = vpop.permute.xlu1 %4100 }
 0x92f   :  { %3216 = vrot.lane.b32.xlu0 %v7587_v39, %s5428_s1 }
 0x930   :  { %v3061_v7 = vpop.permute.xlu0 %3060 }
 0x931   :  { %3218 = vrot.lane.b32.xlu1 %v7592_v30, %s5428_s1  ;;  %v7607_v33 = vmul.f32 %v3061_v7, %v2775_v20 }
 0x932   :  { %v3063_v15 = vpop.permute.xlu1 %3062 }
 0x933   :  { %3504 = vrot.lane.b32.xlu0 %v3430_v62, %s5428_s1  ;;  %v7612_v8 = vmul.f32 %v3063_v15, %v2776_v0  ;;  %v3432_v47 = vmul.f32 %v7607_v33, %v7607_v33  ;;  %v8722_v62 = vld [vmem:[#allocation51_spill] sm:$0xff] }
 0x934   :  { %v7604_v31 = vpop.permute.xlu0 %4106  ;;  %v2780_v15 = vmax.f32 %v8722_v62, 0.0 }
 0x935   :  { %8712 = vst [vmem:[#allocation61_spill] sm:$0xff] %v7604_v31  ;;  %3506 = vrot.lane.b32.xlu1 %v3431_v10, %s5428_s1  ;;  %8714 = vst [vmem:[#allocation63_spill] sm:$0xff] %v7612_v8  ;;  %v3433_v5 = vmul.f32 %v7612_v8, %v7612_v8 }
 0x936   :  { %v7610_v63 = vpop.permute.xlu1 %4104 }
 0x937   :  { %8713 = vst [vmem:[#allocation62_spill] sm:$0xff] %v7610_v63  ;;  %3220 = vrot.lane.b32.xlu0 %v7607_v33, %s5428_s1 }
 0x938   :  { %v3065_v57 = vpop.permute.xlu0 %3064 }
 0x939   :  { %3222 = vrot.lane.b32.xlu1 %v7612_v8, %s5428_s1  ;;  %v7625_v35 = vmul.f32 %v3065_v57, %v2777_v50  ;;  %v8726_v50 = vld [vmem:[#allocation52_spill] sm:$0xff] }
 0x93a   :  { %v3067_v17 = vpop.permute.xlu1 %3066 }
 0x93b   :  { %3508 = vrot.lane.b32.xlu0 %v3432_v47, %s5428_s1  ;;  %8716 = vst [vmem:[#allocation53_spill] sm:$0xff] %v7625_v35  ;;  %v7630_v49 = vmul.f32 %v3067_v17, %v2778_v28  ;;  %v3434_v26 = vmul.f32 %v7625_v35, %v7625_v35 }
 0x93d   :  { %3510 = vrot.lane.b32.xlu1 %v3433_v5, %s5428_s1  ;;  %8718 = vst [vmem:[#allocation65_spill] sm:$0xff] %v7630_v49  ;;  %v3435_v56 = vmul.f32 %v7630_v49, %v7630_v49  ;;  %v2781_v5 = vmax.f32 %v8726_v50, 0.0 }
 0x93e   :  { %v7628_v58 = vpop.permute.xlu1 %4108 }
 0x93f   :  { %8717 = vst [vmem:[#allocation64_spill] sm:$0xff] %v7628_v58  ;;  %3224 = vrot.lane.b32.xlu0 %v7625_v35, %s5428_s1 }
 0x940   :  { %v3069_v19 = vpop.permute.xlu0 %3068 }
 0x941   :  { %3226 = vrot.lane.b32.xlu1 %v7630_v49, %s5428_s1  ;;  %v7647_v20 = vmul.f32 %v3069_v19, %v2779_v14  ;;  %v8728_v19 = vld [vmem:[#allocation20_spill] sm:$0xff] }
 0x942   :  { %v7638_v36 = vpop.permute.xlu1 %4110 }
 0x943   :  { %8719 = vst [vmem:[#allocation66_spill] sm:$0xff] %v7638_v36  ;;  %3512 = vrot.lane.b32.xlu0 %v3434_v26, %s5428_s1  ;;  %8723 = vst [vmem:[#allocation51_spill] sm:$0xff] %v7647_v20  ;;  %v3436_v57 = vmul.f32 %v7647_v20, %v7647_v20  ;;  %v2782_v26 = vmax.f32 %v8728_v19, 0.0 }
 0x944   :  { %v7644_v7 = vpop.permute.xlu0 %4112 }
 0x945   :  { %8721 = vst [vmem:[#allocation50_spill] sm:$0xff] %v7644_v7  ;;  %3514 = vrot.lane.b32.xlu1 %v3435_v56, %s5428_s1 }
 0x946   :  { %v3071_v10 = vpop.permute.xlu1 %3070 }
 0x947   :  { %v7650_v0 = vmul.f32 %v3071_v10, %v2780_v15  ;;  %3228 = vrot.lane.b32.xlu0 %v7647_v20, %s5428_s1 }
 0x948   :  { %v3073_v47 = vpop.permute.xlu0 %3072 }
 0x949   :  { %8724 = vst [vmem:[#allocation67_spill] sm:$0xff] %v7650_v0  ;;  %3230 = vrot.lane.b32.xlu1 %v7650_v0, %s5428_s1  ;;  %v3437_v48 = vmul.f32 %v7650_v0, %v7650_v0  ;;  %v7667_v53 = vmul.f32 %v3073_v47, %v2781_v5 }
 0x94a   :  { %v7658_v17 = vpop.permute.xlu1 %4114 }
 0x94b   :  { %8725 = vst [vmem:[#allocation68_spill] sm:$0xff] %v7658_v17  ;;  %3516 = vrot.lane.b32.xlu0 %v3436_v57, %s5428_s1  ;;  %8729 = vst [vmem:[#allocation20_spill] sm:$0xff] %v7667_v53  ;;  %v3438_v15 = vmul.f32 %v7667_v53, %v7667_v53  ;;  %v8732_v57 = vld [vmem:[#allocation21_spill] sm:$0xff] }
 0x94c   :  { %v7664_v28 = vpop.permute.xlu0 %4116  ;;  %v2783_v47 = vmax.f32 %v8732_v57, 0.0 }
 0x94d   :  { %8727 = vst [vmem:[#allocation52_spill] sm:$0xff] %v7664_v28  ;;  %3518 = vrot.lane.b32.xlu1 %v3437_v48, %s5428_s1  ;;  %v8734_v48 = vld [vmem:[#allocation22_spill] sm:$0xff] }
 0x94e   :  { %v3075_v14 = vpop.permute.xlu1 %3074  ;;  %v2784_v19 = vmax.f32 %v8734_v48, 0.0  ;;  %v8738_v48 = vld [vmem:[#allocation23_spill] sm:$0xff]  ;;  %v8759_v28 = vld [vmem:[#allocation58_spill] sm:$0xff] }
 0x94f   :  { %v7670_v56 = vmul.f32 %v3075_v14, %v2782_v26  ;;  %3232 = vrot.lane.b32.xlu0 %v7667_v53, %s5428_s1  ;;  %v2793_v17 = vmax.f32 %v8759_v28, 0.0 }
 0x950   :  { %v3077_v62 = vpop.permute.xlu0 %3076 }
 0x951   :  { %8730 = vst [vmem:[#allocation69_spill] sm:$0xff] %v7670_v56  ;;  %3234 = vrot.lane.b32.xlu1 %v7670_v56, %s5428_s1  ;;  %v3439_v50 = vmul.f32 %v7670_v56, %v7670_v56  ;;  %v7687_v26 = vmul.f32 %v3077_v62, %v2783_v47  ;;  %v2785_v62 = vmax.f32 %v8738_v48, 0.0 }
 0x952   :  { %v7678_v10 = vpop.permute.xlu1 %4118 }
 0x953   :  { %8731 = vst [vmem:[#allocation70_spill] sm:$0xff] %v7678_v10  ;;  %3520 = vrot.lane.b32.xlu0 %v3438_v15, %s5428_s1  ;;  %8735 = vst [vmem:[#allocation22_spill] sm:$0xff] %v7687_v26  ;;  %v3440_v15 = vmul.f32 %v7687_v26, %v7687_v26 }
 0x954   :  { %v7684_v5 = vpop.permute.xlu0 %4120 }
 0x955   :  { %8733 = vst [vmem:[#allocation21_spill] sm:$0xff] %v7684_v5  ;;  %3522 = vrot.lane.b32.xlu1 %v3439_v50, %s5428_s1 }
 0x956   :  { %v3079_v14 = vpop.permute.xlu1 %3078 }
 0x957   :  { %v7690_v34 = vmul.f32 %v3079_v14, %v2784_v19  ;;  %3236 = vrot.lane.b32.xlu0 %v7687_v26, %s5428_s1  ;;  %v8740_v19 = vld [vmem:[#allocation24_spill] sm:$0xff] }
 0x958   :  { %v3081_v57 = vpop.permute.xlu0 %3080  ;;  %v2786_v14 = vmax.f32 %v8740_v19, 0.0  ;;  %v8744_v19 = vld [vmem:[#allocation25_spill] sm:$0xff] }
 0x959   :  { %8736 = vst [vmem:[#allocation71_spill] sm:$0xff] %v7690_v34  ;;  %3238 = vrot.lane.b32.xlu1 %v7690_v34, %s5428_s1  ;;  %v3441_v47 = vmul.f32 %v7690_v34, %v7690_v34  ;;  %v7707_v32 = vmul.f32 %v3081_v57, %v2785_v62  ;;  %v2787_v57 = vmax.f32 %v8744_v19, 0.0  ;;  %v8758_v34 = vld [vmem:[#allocation59_spill] sm:$0xff] }
 0x95a   :  { %v7698_v12 = vpop.permute.xlu1 %4122 }
 0x95b   :  { %8737 = vst [vmem:[#allocation72_spill] sm:$0xff] %v7698_v12  ;;  %3524 = vrot.lane.b32.xlu0 %v3440_v15, %s5428_s1  ;;  %8741 = vst [vmem:[#allocation24_spill] sm:$0xff] %v7707_v32  ;;  %v3442_v15 = vmul.f32 %v7707_v32, %v7707_v32 }
 0x95c   :  { %v7704_v50 = vpop.permute.xlu0 %4124 }
 0x95d   :  { %8739 = vst [vmem:[#allocation23_spill] sm:$0xff] %v7704_v50  ;;  %3526 = vrot.lane.b32.xlu1 %v3441_v47, %s5428_s1  ;;  %v8746_v47 = vld [vmem:[#allocation26_spill] sm:$0xff] }
 0x95e   :  { %v3083_v18 = vpop.permute.xlu1 %3082 }
 0x95f   :  { %v7710_v54 = vmul.f32 %v3083_v18, %v2786_v14  ;;  %3240 = vrot.lane.b32.xlu0 %v7707_v32, %s5428_s1  ;;  %v2788_v14 = vmax.f32 %v8746_v47, 0.0  ;;  %v8750_v47 = vld [vmem:[#allocation27_spill] sm:$0xff]  ;;  %v2794_v32 = vmax.f32 %v8758_v34, 0.0 }
 0x960   :  { %v3085_v48 = vpop.permute.xlu0 %3084 }
 0x961   :  { %8742 = vst [vmem:[#allocation73_spill] sm:$0xff] %v7710_v54  ;;  %3242 = vrot.lane.b32.xlu1 %v7710_v54, %s5428_s1  ;;  %v3443_v18 = vmul.f32 %v7710_v54, %v7710_v54  ;;  %v7727_v50 = vmul.f32 %v3085_v48, %v2787_v57  ;;  %v2789_v48 = vmax.f32 %v8750_v47, 0.0  ;;  %v8751_v57 = vld [vmem:[#allocation28_spill] sm:$0xff] }
 0x962   :  { %v7718_v41 = vpop.permute.xlu1 %4126 }
 0x963   :  { %8743 = vst [vmem:[#allocation74_spill] sm:$0xff] %v7718_v41  ;;  %3528 = vrot.lane.b32.xlu0 %v3442_v15, %s5428_s1  ;;  %8747 = vst [vmem:[#allocation26_spill] sm:$0xff] %v7727_v50  ;;  %v3444_v15 = vmul.f32 %v7727_v50, %v7727_v50 }
 0x964   :  { %v7724_v62 = vpop.permute.xlu0 %4128 }
 0x965   :  { %8745 = vst [vmem:[#allocation25_spill] sm:$0xff] %v7724_v62  ;;  %3530 = vrot.lane.b32.xlu1 %v3443_v18, %s5428_s1  ;;  %v2790_v18 = vmax.f32 %v8751_v57, 0.0 }
 0x966   :  { %v3087_v12 = vpop.permute.xlu1 %3086 }
 0x967   :  { %v7730_v5 = vmul.f32 %v3087_v12, %v2788_v14  ;;  %3244 = vrot.lane.b32.xlu0 %v7727_v50, %s5428_s1 }
 0x968   :  { %v3089_v19 = vpop.permute.xlu0 %3088 }
 0x969   :  { %8748 = vst [vmem:[#allocation75_spill] sm:$0xff] %v7730_v5  ;;  %3246 = vrot.lane.b32.xlu1 %v7730_v5, %s5428_s1  ;;  %v3445_v12 = vmul.f32 %v7730_v5, %v7730_v5  ;;  %v7745_v14 = vmul.f32 %v3089_v19, %v2789_v48 }
 0x96a   :  { %v7738_v62 = vpop.permute.xlu1 %4130 }
 0x96b   :  { %8749 = vst [vmem:[#allocation76_spill] sm:$0xff] %v7738_v62  ;;  %3532 = vrot.lane.b32.xlu0 %v3444_v15, %s5428_s1  ;;  %8752 = vst [vmem:[#allocation27_spill] sm:$0xff] %v7745_v14  ;;  %v3446_v15 = vmul.f32 %v7745_v14, %v7745_v14  ;;  %v8754_v62 = vld [vmem:[#allocation29_spill] sm:$0xff] }
 0x96c   :  { %v2791_v5 = vmax.f32 %v8754_v62, 0.0 }
 0x96d   :  { %3534 = vrot.lane.b32.xlu1 %v3445_v12, %s5428_s1 }
 0x96e   :  { %v3091_v41 = vpop.permute.xlu1 %3090 }
 0x96f   :  { %v7748_v54 = vmul.f32 %v3091_v41, %v2790_v18  ;;  %3248 = vrot.lane.b32.xlu0 %v7745_v14, %s5428_s1  ;;  %v8755_v41 = vld [vmem:[#allocation11_spill] sm:$0xff] }
 0x970   :  { %v3093_v47 = vpop.permute.xlu0 %3092  ;;  %v2792_v12 = vmax.f32 %v8755_v41, 0.0 }
 0x971   :  { %8753 = vst [vmem:[#allocation28_spill] sm:$0xff] %v7748_v54  ;;  %3250 = vrot.lane.b32.xlu1 %v7748_v54, %s5428_s1  ;;  %v3447_v19 = vmul.f32 %v7748_v54, %v7748_v54  ;;  %v7761_v57 = vmul.f32 %v3093_v47, %v2791_v5 }
 0x972   :  { %v3095_v48 = vpop.permute.xlu1 %3094 }
 0x973   :  { %3536 = vrot.lane.b32.xlu0 %v3446_v15, %s5428_s1  ;;  %8756 = vst [vmem:[#allocation29_spill] sm:$0xff] %v7761_v57  ;;  %v7764_v18 = vmul.f32 %v3095_v48, %v2792_v12  ;;  %v3448_v62 = vmul.f32 %v7761_v57, %v7761_v57 }
 0x975   :  { %3538 = vrot.lane.b32.xlu1 %v3447_v19, %s5428_s1  ;;  %8757 = vst [vmem:[#allocation11_spill] sm:$0xff] %v7764_v18  ;;  %v3449_v15 = vmul.f32 %v7764_v18, %v7764_v18  ;;  %v3197_v5 = vpop.permute.xlu0 %3196 }
 0x976   :  { %v3292_v41 = vsel %vm518_vm1, %v3197_v5, 0.0 }
 0x977   :  { %3252 = vrot.lane.b32.xlu0 %v7761_v57, %s5428_s1  ;;  %v3199_v54 = vpop.permute.xlu1 %3198 }
 0x979   :  { %3254 = vrot.lane.b32.xlu1 %v7764_v18, %s5428_s1  ;;  %v3485_v47 = vpop.permute.xlu0 %3484 }
 0x97a   :  { %v3580_v14 = vsel %vm518_vm1, %v3485_v47, 0.0 }
 0x97b   :  { %3540 = vrot.lane.b32.xlu0 %v3448_v62, %s5428_s1  ;;  %v3295_v62 = vsel %vm518_vm1, %v3199_v54, 0.0  ;;  %v3487_v18 = vpop.permute.xlu1 %3486 }
 0x97c   :  { %v3583_v36 = vsel %vm518_vm1, %v3487_v18, 0.0 }
 0x97d   :  { %3542 = vrot.lane.b32.xlu1 %v3449_v15, %s5428_s1  ;;  %v3097_v19 = vpop.permute.xlu0 %3096 }
 0x97f   :  { %v3099_v15 = vpop.permute.xlu1 %3098 }
 0x980   :  { %v7783_v56 = vmul.f32 %v3099_v15, %v2794_v32 }
 0x981   :  { %v7776_v48 = vpop.permute.xlu0 %3200 }
 0x982   :  { %8760 = vst [vmem:[#allocation59_spill] sm:$0xff] %v7783_v56  ;;  %v3451_v54 = vmul.f32 %v7783_v56, %v7783_v56 }
 0x983   :  { %v3203_v5 = vpop.permute.xlu1 %3202 }
 0x984   :  { %v3301_v0 = vsel %vm518_vm1, %v3203_v5, 0.0 }
 0x985   :  { %v3489_v12 = vpop.permute.xlu0 %3488 }
 0x986   :  { %v3586_v31 = vsel %vm518_vm1, %v3489_v12, 0.0 }
 0x987   :  { %v3491_v34 = vpop.permute.xlu1 %3490 }
 0x989   :  { %v3205_v57 = vpop.permute.xlu0 %3204 }
 0x98a   :  { %v3304_v20 = vsel %vm518_vm1, %v3205_v57, 0.0 }
 0x98b   :  { %v7794_v28 = vpop.permute.xlu1 %3206 }
 0x98d   :  { %v3493_v50 = vpop.permute.xlu0 %3492 }
 0x98f   :  { %v7796_v47 = vpop.permute.xlu1 %3494 }
 0x991   :  { %v3209_v10 = vpop.permute.xlu0 %3208 }
 0x992   :  { %v3310_v12 = vsel %vm518_vm1, %v3209_v10, 0.0 }
 0x995   :  { %v3497_v26 = vpop.permute.xlu0 %3496 }
 0x996   :  { %v3598_v57 = vsel %vm518_vm1, %v3497_v26, 0.0 }
 0x99a   :  { %3293 = vadd.xlane.f32.xlu0 %v3292_v41  ;;  %v7785_v41 = vmul.f32 %v3097_v19, %v2793_v17  ;;  %v7798_v19 = vpop.permute.xlu1 %3210 }
 0x99c   :  { %8761 = vst [vmem:[#allocation58_spill] sm:$0xff] %v7785_v41 }
 0x99e   :  { %3581 = vadd.xlane.f32.xlu0 %v3580_v14  ;;  %v3213_v14 = vpop.permute.xlu0 %3212  ;;  %v7800_v15 = vpop.permute.xlu1 %3498 }
 0x9a1   :  { %3296 = vadd.xlane.f32.xlu1 %v3295_v62 }
 0x9a2   :  { %v3501_v32 = vpop.permute.xlu0 %3500 }
 0x9a6   :  { %v3217_v17 = vpop.permute.xlu0 %3216 }
 0x9a7   :  { %v3322_v10 = vsel %vm518_vm1, %v3217_v17, 0.0  ;;  %v3298_v17 = vsel %vm518_vm1, %v7776_v48, 0.0 }
 0x9aa   :  { %v3505_v62 = vpop.permute.xlu0 %3504 }
 0x9ae   :  { %v3221_v7 = vpop.permute.xlu0 %3220 }
 0x9b2   :  { %3258 = vrot.lane.b32.xlu1 %v7783_v56, %s5428_s1  ;;  %v7803_v56 = vpop.permute.xlu1 %3214 }
 0x9b4   :  { %3256 = vrot.lane.b32.xlu0 %v7785_v41, %s5428_s1 }
 0x9b6   :  { %3546 = vrot.lane.b32.xlu1 %v3451_v54, %s5428_s1  ;;  %v3509_v54 = vpop.permute.xlu0 %3508  ;;  %v7806_v58 = vpop.permute.xlu1 %3502 }
 0x9ba   :  { %v3225_v53 = vpop.permute.xlu0 %3224  ;;  %v7809_v49 = vpop.permute.xlu1 %3218 }
 0x9be   :  { %v3513_v63 = vpop.permute.xlu0 %3512  ;;  %v7813_v18 = vpop.permute.xlu1 %3506 }
 0x9c2   :  { %v3229_v5 = vpop.permute.xlu0 %3228 }
 0x9c3   :  { %v3340_v48 = vsel %vm518_vm1, %v3229_v5, 0.0  ;;  %v3601_v5 = vsel %vm518_vm1, %v7800_v15, 0.0 }
 0x9c6   :  { %v3517_v21 = vpop.permute.xlu0 %3516 }
 0x9d3   :  { %3584 = vadd.xlane.f32.xlu0 %v3583_v36  ;;  %v3592_v36 = vsel %vm518_vm1, %v3493_v50, 0.0 }
 0x9da   :  { %3302 = vadd.xlane.f32.xlu1 %v3301_v0  ;;  %v3450_v0 = vmul.f32 %v7785_v41, %v7785_v41  ;;  %v3604_v41 = vsel %vm518_vm1, %v3501_v32, 0.0  ;;  %v3616_v32 = vsel %vm518_vm1, %v3509_v54, 0.0  ;;  %v3307_v54 = vsel %vm518_vm1, %v7794_v28, 0.0 }
 0x9de   :  { %3587 = vadd.xlane.f32.xlu1 %v3586_v31  ;;  %v7819_v31 = vpop.permute.xlu1 %3222 }
 0x9e2   :  { %3305 = vadd.xlane.f32.xlu1 %v3304_v20  ;;  %v3316_v20 = vsel %vm518_vm1, %v3213_v14, 0.0  ;;  %v7823_v50 = vpop.permute.xlu1 %3510  ;;  %v3328_v14 = vsel %vm518_vm1, %v3221_v7, 0.0  ;;  %v3622_v7 = vsel %vm518_vm1, %v3513_v63, 0.0  ;;  %v3313_v63 = vsel %vm518_vm1, %v7798_v19, 0.0 }
 0x9e6   :  { %3593 = vadd.xlane.f32.xlu1 %v3592_v36  ;;  %v3233_v36 = vpop.permute.xlu0 %3232  ;;  %v7826_v8 = vpop.permute.xlu1 %3226 }
 0x9e9   :  { %3544 = vrot.lane.b32.xlu0 %v3450_v0, %s5428_s1 }
 0x9ea   :  { %3311 = vadd.xlane.f32.xlu1 %v3310_v12  ;;  %v3521_v0 = vpop.permute.xlu0 %3520  ;;  %v3610_v12 = vsel %vm518_vm1, %v3505_v62, 0.0  ;;  %v7830_v26 = vpop.permute.xlu1 %3514 }
 0x9ee   :  { %3599 = vadd.xlane.f32.xlu1 %v3598_v57  ;;  %v3237_v57 = vpop.permute.xlu0 %3236 }
 0x9ef   :  { %v3352_v19 = vsel %vm518_vm1, %v3237_v57, 0.0  ;;  %v3613_v57 = vsel %vm518_vm1, %v7813_v18, 0.0 }
 0x9f2   :  { %3317 = vadd.xlane.f32.xlu1 %v3316_v20  ;;  %v7833_v20 = vpop.permute.xlu1 %3230 }
 0x9f6   :  { %3605 = vadd.xlane.f32.xlu1 %v3604_v41  ;;  %v3525_v41 = vpop.permute.xlu0 %3524  ;;  %v7839_v62 = vpop.permute.xlu1 %3518 }
 0x9f7   :  { %v3640_v15 = vsel %vm518_vm1, %v3525_v41, 0.0  ;;  %v3331_v41 = vsel %vm518_vm1, %v7819_v31, 0.0 }
 0x9fa   :  { %3323 = vadd.xlane.f32.xlu1 %v3322_v10  ;;  %v3334_v10 = vsel %vm518_vm1, %v3225_v53, 0.0  ;;  %v3241_v35 = vpop.permute.xlu0 %3240  ;;  %v3595_v53 = vsel %vm518_vm1, %v7796_v47, 0.0  ;;  %v3634_v47 = vsel %vm518_vm1, %v3521_v0, 0.0  ;;  %v3325_v0 = vsel %vm518_vm1, %v7809_v49, 0.0 }
 0x9fe   :  { %3611 = vadd.xlane.f32.xlu1 %v3610_v12  ;;  %v3589_v12 = vsel %vm518_vm1, %v3491_v34, 0.0  ;;  %v3628_v34 = vsel %vm518_vm1, %v3517_v21, 0.0 }
 0xa02   :  { %3329 = vadd.xlane.f32.xlu1 %v3328_v14  ;;  %v7845_v14 = vpop.permute.xlu1 %3234 }
 0xa06   :  { %3617 = vadd.xlane.f32.xlu1 %v3616_v32  ;;  %v3529_v32 = vpop.permute.xlu0 %3528 }
 0xa08   :  { %3299 = vadd.xlane.f32.xlu0 %v3298_v17  ;;  %v7851_v17 = vpop.permute.xlu1 %3522 }
 0xa0a   :  { %3335 = vadd.xlane.f32.xlu1 %v3334_v10  ;;  %v3245_v28 = vpop.permute.xlu0 %3244  ;;  %v3346_v10 = vsel %vm518_vm1, %v3233_v36, 0.0  ;;  %v3607_v36 = vsel %vm518_vm1, %v7806_v58, 0.0  ;;  %v3646_v58 = vsel %vm518_vm1, %v3529_v32, 0.0  ;;  %v3337_v32 = vsel %vm518_vm1, %v7826_v8, 0.0 }
 0xa0b   :  { %v3364_v49 = vsel %vm518_vm1, %v3245_v28, 0.0  ;;  %v3625_v28 = vsel %vm518_vm1, %v7830_v26, 0.0 }
 0xa0c   :  { %3590 = vadd.xlane.f32.xlu0 %v3589_v12  ;;  %v7858_v12 = vpop.permute.xlu1 %3238 }
 0xa0e   :  { %3623 = vadd.xlane.f32.xlu1 %v3622_v7  ;;  %v3533_v21 = vpop.permute.xlu0 %3532  ;;  %v3319_v7 = vsel %vm518_vm1, %v7803_v56, 0.0  ;;  %v3358_v56 = vsel %vm518_vm1, %v3241_v35, 0.0  ;;  %v3619_v35 = vsel %vm518_vm1, %v7823_v50, 0.0 }
 0xa0f   :  { %v3652_v18 = vsel %vm518_vm1, %v3533_v21, 0.0  ;;  %v3343_v21 = vsel %vm518_vm1, %v7833_v20, 0.0 }
 0xa10   :  { %3308 = vadd.xlane.f32.xlu0 %v3307_v54  ;;  %v3527_v54 = vpop.permute.xlu1 %3526 }
 0xa12   :  { %3341 = vadd.xlane.f32.xlu1 %v3340_v48  ;;  %v3249_v48 = vpop.permute.xlu0 %3248 }
 0xa13   :  { %v3370_v31 = vsel %vm518_vm1, %v3249_v48, 0.0  ;;  %v3631_v48 = vsel %vm518_vm1, %v7839_v62, 0.0  ;;  %v3355_v62 = vsel %vm518_vm1, %v7858_v12, 0.0 }
 0xa14   :  { %3596 = vadd.xlane.f32.xlu0 %v3595_v53  ;;  %v3243_v53 = vpop.permute.xlu1 %3242 }
 0xa16   :  { %3629 = vadd.xlane.f32.xlu1 %v3628_v34  ;;  %v3537_v34 = vpop.permute.xlu0 %3536 }
 0xa17   :  { %v3658_v50 = vsel %vm518_vm1, %v3537_v34, 0.0  ;;  %v3349_v34 = vsel %vm518_vm1, %v7845_v14, 0.0  ;;  %v3361_v14 = vsel %vm518_vm1, %v3243_v53, 0.0 }
 0xa18   :  { %3314 = vadd.xlane.f32.xlu0 %v3313_v63  ;;  %v3531_v63 = vpop.permute.xlu1 %3530 }
 0xa1a   :  { %3347 = vadd.xlane.f32.xlu1 %v3346_v10  ;;  %v3253_v10 = vpop.permute.xlu0 %3252 }
 0xa1b   :  { %v3376_v8 = vsel %vm518_vm1, %v3253_v10, 0.0  ;;  %v3643_v10 = vsel %vm518_vm1, %v3527_v54, 0.0 }
 0xa1c   :  { %3602 = vadd.xlane.f32.xlu0 %v3601_v5  ;;  %v3247_v5 = vpop.permute.xlu1 %3246 }
 0xa1e   :  { %3635 = vadd.xlane.f32.xlu1 %v3634_v47  ;;  %v3541_v47 = vpop.permute.xlu0 %3540 }
 0xa20   :  { %3320 = vadd.xlane.f32.xlu0 %v3319_v7 }
 0xa22   :  { %3353 = vadd.xlane.f32.xlu1 %v3352_v19  ;;  %v3535_v19 = vpop.permute.xlu1 %3534 }
 0xa24   :  { %3608 = vadd.xlane.f32.xlu0 %v3607_v36 }
 0xa26   :  { %3641 = vadd.xlane.f32.xlu1 %v3640_v15  ;;  %v3251_v15 = vpop.permute.xlu1 %3250 }
 0xa27   :  { %v3294_v7 = vpop.xlane.xlu0 %3293 }
 0xa28   :  { %3326 = vadd.xlane.f32.xlu0 %v3325_v0  ;;  %v3664_v0 = vsel %vm518_vm1, %v3541_v47, 0.0 }
 0xa2a   :  { %3359 = vadd.xlane.f32.xlu1 %v3358_v56  ;;  %v3539_v56 = vpop.permute.xlu1 %3538 }
 0xa2b   :  { %v3582_v36 = vpop.xlane.xlu0 %3581 }
 0xa2c   :  { %3614 = vadd.xlane.f32.xlu0 %v3613_v57  ;;  %v3637_v57 = vsel %vm518_vm1, %v7851_v17, 0.0  ;;  %v3367_v17 = vsel %vm518_vm1, %v3247_v5, 0.0 }
 0xa2e   :  { %3647 = vadd.xlane.f32.xlu1 %v3646_v58  ;;  %v3255_v58 = vpop.permute.xlu1 %3254 }
 0xa2f   :  { %v3257_v26 = vpop.permute.xlu0 %3256 }
 0xa30   :  { %3332 = vadd.xlane.f32.xlu0 %v3331_v41  ;;  %v3382_v20 = vsel %vm518_vm1, %v3257_v26, 0.0 }
 0xa32   :  { %3365 = vadd.xlane.f32.xlu1 %v3364_v49  ;;  %v3543_v41 = vpop.permute.xlu1 %3542 }
 0xa34   :  { %3620 = vadd.xlane.f32.xlu0 %v3619_v35  ;;  %v3649_v35 = vsel %vm518_vm1, %v3531_v63, 0.0 }
 0xa36   :  { %3653 = vadd.xlane.f32.xlu1 %v3652_v18  ;;  %v3297_v49 = vpop.xlane.xlu1 %3296 }
 0xa37   :  { %v3389_v63 = vmul.f32 0.015625, %v3297_v49 }
 0xa38   :  { %3338 = vadd.xlane.f32.xlu0 %v3337_v32  ;;  %v3655_v32 = vsel %vm518_vm1, %v3535_v19, 0.0  ;;  %v3676_v19 = vmul.f32 0.015625, %v3582_v36 }
 0xa3a   :  { %3371 = vadd.xlane.f32.xlu1 %v3370_v31  ;;  %v3259_v18 = vpop.permute.xlu1 %3258 }
 0xa3c   :  { %3626 = vadd.xlane.f32.xlu0 %v3625_v28  ;;  %v3373_v28 = vsel %vm518_vm1, %v3251_v15, 0.0 }
 0xa3e   :  { %3659 = vadd.xlane.f32.xlu1 %v3658_v50  ;;  %v3547_v12 = vpop.permute.xlu1 %3546  ;;  %v3661_v50 = vsel %vm518_vm1, %v3539_v56, 0.0 }
 0xa40   :  { %3344 = vadd.xlane.f32.xlu0 %v3343_v21  ;;  %v3388_v21 = vmul.f32 0.015625, %v3294_v7  ;;  %v8762_v7 = vmax.f32 %v7437_v11, 0.0  ;;  %v8764_v11 = vmax.f32 %v7482_v2, 0.0 }
 0xa42   :  { %3377 = vadd.xlane.f32.xlu1 %v3376_v8  ;;  %v3708_v26 = vmul.f32 %v3388_v21, %v3388_v21  ;;  %v4043_v49 = vmul.f32 0.5, %v8762_v7  ;;  %v8766_v7 = vmax.f32 %v7449_v38, 0.0 }
 0xa44   :  { %3632 = vadd.xlane.f32.xlu0 %v3631_v48  ;;  %v3709_v48 = vmul.f32 %v3389_v63, %v3389_v63  ;;  %v3740_v15 = vsub.f32 %v3676_v19, %v3708_v26 }
 0xa46   :  { %3665 = vadd.xlane.f32.xlu1 %v3664_v0  ;;  %v3379_v0 = vsel %vm518_vm1, %v3255_v58, 0.0  ;;  %v3772_v56 = vmax.f32 %v3740_v15, 0.0 }
 0xa48   :  { %3350 = vadd.xlane.f32.xlu0 %v3349_v34  ;;  %v3836_v58 = vadd.f32 1e-05, %v3772_v56 }
 0xa4a   :  { %3383 = vadd.xlane.f32.xlu1 %v3382_v20 }
 0xa4c   :  { %3638 = vadd.xlane.f32.xlu0 %v3637_v57  ;;  %v3667_v57 = vsel %vm518_vm1, %v3543_v41, 0.0  ;;  %v3673_v41 = vsel %vm518_vm1, %v3547_v12, 0.0  ;;  %v3804_v12 = vsub.f32 %v7472_v60, %v3388_v21 }
 0xa50   :  { %3356 = vadd.xlane.f32.xlu0 %v3355_v62 }
 0xa54   :  { %3644 = vadd.xlane.f32.xlu0 %v3643_v10 }
 0xa58   :  { %3362 = vadd.xlane.f32.xlu0 %v3361_v14  ;;  %v3385_v14 = vsel %vm518_vm1, %v3259_v18, 0.0  ;;  %v4047_v18 = vmul.f32 0.5, %v8764_v11 }
 0xa5c   :  { %3650 = vadd.xlane.f32.xlu0 %v3649_v35 }
 0xa60   :  { %3368 = vadd.xlane.f32.xlu0 %v3367_v17  ;;  %v3585_v47 = vpop.xlane.xlu0 %3584  ;;  %v8763_v17 = vmax.f32 %v7454_v24, 0.0 }
 0xa61   :  { %v3677_v5 = vmul.f32 0.015625, %v3585_v47 }
 0xa62   :  { %v4045_v47 = vmul.f32 0.5, %v8763_v17 }
 0xa63   :  { %v3741_v34 = vsub.f32 %v3677_v5, %v3709_v48 }
 0xa64   :  { %3656 = vadd.xlane.f32.xlu0 %v3655_v32  ;;  %v3545_v31 = vpop.permute.xlu0 %3544 }
 0xa65   :  { %v3670_v54 = vsel %vm518_vm1, %v3545_v31, 0.0  ;;  %v3773_v62 = vmax.f32 %v3741_v34, 0.0 }
 0xa66   :  { %3671 = vadd.xlane.f32.xlu1 %v3670_v54 }
 0xa67   :  { %v7905_v53 = vpop.xlane.xlu1 %3302  ;;  %v3837_v36 = vadd.f32 1e-05, %v3773_v62 }
 0xa68   :  { %3374 = vadd.xlane.f32.xlu0 %v3373_v28 }
 0xa69   :  { %5257 = vrsqrt.f32 %v3837_v36 }
 0xa6a   :  { %5259 = vrsqrt.f32 %v3836_v58 }
 0xa6b   :  { %v7908_v8 = vpop.xlane.xlu1 %3587 }
 0xa6c   :  { %3662 = vadd.xlane.f32.xlu0 %v3661_v50  ;;  %v3805_v50 = vsub.f32 %v7478_v3, %v3389_v63  ;;  %v8765_v3 = vmax.f32 %v7433_v1, 0.0  ;;  %v4044_v1 = vmul.f32 0.5, %v8766_v7 }
 0xa6e   :  { %v4042_v63 = vmul.f32 0.5, %v8765_v3 }
 0xa6f   :  { %v3306_v20 = vpop.xlane.xlu1 %3305 }
 0xa70   :  { %3380 = vadd.xlane.f32.xlu0 %v3379_v0  ;;  %v7930_v2 = vmul.f32 0.015625, %v3306_v20  ;;  %v5189_v20 = vld [vmem:[%s8381_s8] sm:$0xff]  }
 0xa71   :  { %5051 = vmatprep.subr.bf16.mxu1 %v5189_v20 }
 0xa72   :  { %v3712_v60 = vmul.f32 %v7930_v2, %v7930_v2  ;;  %5052 = vmatpush3.bf16.msra.mxu1 %v5189_v20 }
 0xa73   :  { %v3594_v10 = vpop.xlane.xlu1 %3593  ;;  %v5258_v28 = vpop.eup %5257 }
 0xa74   :  { %3668 = vadd.xlane.f32.xlu0 %v3667_v57  ;;  %v5260_v24 = vpop.eup %5259  ;;  %v3901_v19 = vmul.f32 %v5258_v28, %v3805_v50  ;;  %v3680_v15 = vmul.f32 0.015625, %v3594_v10  ;;  %v8768_v50 = vld [vmem:[#allocation43_spill] sm:$0xff] }
 0xa75   :  { %v3900_v48 = vmul.f32 %v5260_v24, %v3804_v12 }
 0xa76   :  { %v3943_v26 = vmul.f32 %v7459_v9, %v3901_v19  ;;  %v3744_v56 = vsub.f32 %v3680_v15, %v3712_v60 }
 0xa77   :  { %v3312_v35 = vpop.xlane.xlu1 %3311  ;;  %4134 = vrot.lane.b32.xlu1 %v4043_v49, %s5428_s1  ;;  %v3942_v34 = vmul.f32 %v7459_v9, %v3900_v48 }
 0xa78   :  { %3386 = vadd.xlane.f32.xlu0 %v3385_v14  ;;  %v3985_v62 = vadd.f32 %v7451_v61, %v3943_v26  ;;  %v7950_v14 = vmul.f32 0.015625, %v3312_v35 }
 0xa79   :  { %v3984_v21 = vadd.f32 %v7451_v61, %v3942_v34 }
 0xa7a   :  { %v4177_v49 = vadd.f32 %v7484_v25, %v3985_v62  ;;  %v3678_v25 = vmul.f32 0.015625, %v7908_v8  ;;  %v5190_v8 = vld [vmem:[%s8381_s8 + $0x8] sm:$0xff]  }
 0xa7b   :  { %v3600_v32 = vpop.xlane.xlu1 %3599  ;;  %4138 = vrot.lane.b32.xlu1 %v4045_v47, %s5428_s1  ;;  %v4176_v17 = vadd.f32 %v7490_v13, %v3984_v21  ;;  %v7957_v47 = vmul.f32 0.015625, %v7905_v53  ;;  %v3714_v13 = vmul.f32 %v7950_v14, %v7950_v14  ;;  %5053 = vmatprep.subr.bf16.mxu1 %v5190_v8 }
 0xa7c   :  { %3674 = vadd.xlane.f32.xlu0 %v3673_v41  ;;  %v3776_v41 = vmax.f32 %v3744_v56, 0.0  ;;  %v3682_v11 = vmul.f32 0.015625, %v3600_v32  ;;  %v4209_v24 = vadd.f32 %v4177_v49, %v8768_v50  ;;  %v8769_v32 = vld [vmem:[#allocation44_spill] sm:$0xff]  ;;  %5054 = vmatpush3.bf16.msra.mxu1 %v5190_v8 }
 0xa7d   :  { %v4208_v19 = vadd.f32 %v4176_v17, %v8769_v32  ;;  %v3711_v48 = vmul.f32 %v7957_v47, %v7957_v47 }
 0xa7e   :  { %v3746_v26 = vsub.f32 %v3682_v11, %v3714_v13  ;;  %v5191_v11 = vld [vmem:[%s8381_s8 + $0x10] sm:$0xff]  }
 0xa7f   :  { %v3318_v31 = vpop.xlane.xlu1 %3317  ;;  %4142 = vrot.lane.b32.xlu1 %v4047_v18, %s5428_s1  ;;  %v8767_v18 = vmax.f32 %v7476_v6, 0.0  ;;  %v3840_v6 = vadd.f32 1e-05, %v3776_v41  ;;  %5055 = vmatprep.subr.bf16.mxu1 %v5191_v11 }
 0xa80   :  { %v7978_v62 = vmul.f32 0.015625, %v3318_v31  ;;  %v3778_v7 = vmax.f32 %v3746_v26, 0.0  ;;  %5056 = vmatpush3.bf16.msra.mxu1 %v5191_v11 }
 0xa81   :  { %v4046_v28 = vmul.f32 0.5, %v8767_v18  ;;  %5261 = vrsqrt.f32 %v3840_v6 }
 0xa82   :  { %v3716_v17 = vmul.f32 %v7978_v62, %v7978_v62  ;;  %v3842_v18 = vadd.f32 1e-05, %v3778_v7 }
 0xa83   :  { %v3606_v54 = vpop.xlane.xlu1 %3605 }
 0xa87   :  { %v7924_v5 = vpop.xlane.xlu1 %3323 }
 0xa8b   :  { %v7927_v0 = vpop.xlane.xlu1 %3611  ;;  %v5262_v6 = vpop.eup %5261 }
 0xa8c   :  { %v3686_v8 = vmul.f32 0.015625, %v7927_v0  ;;  %v3808_v0 = vsub.f32 %v7527_v16, %v7930_v2 }
 0xa8e   :  { %v3904_v11 = vmul.f32 %v5262_v6, %v3808_v0 }
 0xa8f   :  { %v7933_v57 = vpop.xlane.xlu1 %3329 }
 0xa92   :  { %4132 = vrot.lane.b32.xlu0 %v4042_v63, %s5428_s1  ;;  %v4240_v63 = vpack.c.bf16 %v4209_v24, %v4208_v19 }
 0xa93   :  { %v7945_v10 = vpop.xlane.xlu1 %3617 }
 0xa95   :  { %v3300_v36 = vpop.xlane.xlu0 %3299 }
 0xa96   :  { %v7952_v58 = vmul.f32 0.015625, %v3300_v36  ;;  %4136 = vrot.lane.b32.xlu0 %v4044_v1, %s5428_s1  ;;  %v3684_v1 = vmul.f32 0.015625, %v3606_v54 }
 0xa97   :  { %v7959_v38 = vpop.xlane.xlu1 %3335 }
 0xa98   :  { %v3710_v35 = vmul.f32 %v7952_v58, %v7952_v58  ;;  %v3806_v26 = vsub.f32 %v7505_v51, %v7952_v58  ;;  %v3807_v51 = vsub.f32 %v7512_v22, %v7957_v47 }
 0xa99   :  { %v3591_v12 = vpop.xlane.xlu0 %3590 }
 0xa9a   :  { %v3742_v53 = vsub.f32 %v3678_v25, %v3710_v35  ;;  %4140 = vrot.lane.b32.xlu0 %v4046_v28, %s5428_s1  ;;  %v3679_v34 = vmul.f32 0.015625, %v3591_v12  ;;  %v5192_v25 = vld [vmem:[%s8381_s8 + $0x18] sm:$0xff]   ;;  %v3748_v28 = vsub.f32 %v3684_v1, %v3716_v17  ;;  %v7998_v12 = vmul.f32 0.015625, %v7924_v5 }
 0xa9b   :  { %v7976_v15 = vpop.xlane.xlu1 %3623  ;;  %5057 = vmatprep.subr.bf16.mxu1 %v5192_v25  ;;  %v8016_v1 = vmul.f32 0.015625, %v7933_v57 }
 0xa9c   :  { %v3774_v3 = vmax.f32 %v3742_v53, 0.0  ;;  %v3743_v60 = vsub.f32 %v3679_v34, %v3711_v48  ;;  %v3780_v19 = vmax.f32 %v3748_v28, 0.0  ;;  %5058 = vmatpush3.bf16.msra.mxu1 %v5192_v25  ;;  %v3688_v25 = vmul.f32 0.015625, %v7945_v10 }
 0xa9d   :  { %v3309_v21 = vpop.xlane.xlu0 %3308  ;;  %v3720_v57 = vmul.f32 %v8016_v1, %v8016_v1 }
 0xa9e   :  { %v3838_v20 = vadd.f32 1e-05, %v3774_v3  ;;  %v7980_v56 = vmul.f32 0.015625, %v3309_v21  ;;  %4287 = vrot.lane.b32.xlu0 %v4240_v63, %s5428_s1  ;;  %v3775_v49 = vmax.f32 %v3743_v60, 0.0  ;;  %v3718_v63 = vmul.f32 %v7998_v12, %v7998_v12 }
 0xa9f   :  { %v7983_v36 = vpop.xlane.xlu1 %3341 }
 0xaa0   :  { %5263 = vrsqrt.f32 %v3838_v20  ;;  %v3839_v31 = vadd.f32 1e-05, %v3775_v49  ;;  %v3713_v54 = vmul.f32 %v7980_v56, %v7980_v56  ;;  %v3844_v20 = vadd.f32 1e-05, %v3780_v19 }
 0xaa1   :  { %v3597_v41 = vpop.xlane.xlu0 %3596  ;;  %v3750_v58 = vsub.f32 %v3686_v8, %v3718_v63  ;;  %v3752_v19 = vsub.f32 %v3688_v25, %v3720_v57  ;;  %v3809_v6 = vsub.f32 %v7532_v45, %v7980_v56  ;;  %v3812_v57 = vsub.f32 %v7567_v23, %v7978_v62 }
 0xaa2   :  { %v3681_v35 = vmul.f32 0.015625, %v3597_v41  ;;  %5265 = vrsqrt.f32 %v3839_v31 }
 0xaa3   :  { %v7995_v24 = vpop.xlane.xlu1 %3629  ;;  %5267 = vrsqrt.f32 %v3842_v18  ;;  %v3782_v22 = vmax.f32 %v3750_v58, 0.0 }
 0xaa4   :  { %v3745_v50 = vsub.f32 %v3681_v35, %v3713_v54 }
 0xaa5   :  { %v3315_v13 = vpop.xlane.xlu0 %3314 }
 0xaa6   :  { %v3777_v53 = vmax.f32 %v3745_v50, 0.0  ;;  %v8000_v32 = vmul.f32 0.015625, %v3315_v13  ;;  %v3810_v50 = vsub.f32 %v7547_v55, %v7950_v14  ;;  %v3846_v55 = vadd.f32 1e-05, %v3782_v22 }
 0xaa7   :  { %v8009_v60 = vpop.xlane.xlu1 %3347 }
 0xaa8   :  { %v3841_v48 = vadd.f32 1e-05, %v3777_v53  ;;  %v3715_v5 = vmul.f32 %v8000_v32, %v8000_v32  ;;  %v3946_v53 = vmul.f32 %v7459_v9, %v3904_v11 }
 0xaa9   :  { %v3603_v34 = vpop.xlane.xlu0 %3602 }
 0xaaa   :  { %v5264_v3 = vpop.eup %5263  ;;  %5269 = vrsqrt.f32 %v3841_v48  ;;  %v3683_v21 = vmul.f32 0.015625, %v3603_v34 }
 0xaab   :  { %v3902_v7 = vmul.f32 %v5264_v3, %v3806_v26  ;;  %5271 = vrsqrt.f32 %v3844_v20  ;;  %v8025_v18 = vpop.xlane.xlu1 %3635 }
 0xaac   :  { %v3747_v49 = vsub.f32 %v3683_v21, %v3715_v5  ;;  %v5266_v17 = vpop.eup %5265  ;;  %v8038_v5 = vmul.f32 0.015625, %v7959_v38 }
 0xaad   :  { %v3944_v31 = vmul.f32 %v7459_v9, %v3902_v7  ;;  %v3321_v41 = vpop.xlane.xlu0 %3320  ;;  %v3903_v16 = vmul.f32 %v5266_v17, %v3807_v51  ;;  %v5268_v28 = vpop.eup %5267  ;;  %v3988_v7 = vadd.f32 %v7451_v61, %v3946_v53  ;;  %v3784_v51 = vmax.f32 %v3752_v19, 0.0 }
 0xaae   :  { %v3779_v54 = vmax.f32 %v3747_v49, 0.0  ;;  %v8020_v35 = vmul.f32 0.015625, %v3321_v41  ;;  %v3906_v63 = vmul.f32 %v5268_v28, %v3810_v50  ;;  %v8770_v49 = vld [vmem:[#allocation45_spill] sm:$0xff] }
 0xaaf   :  { %v3986_v2 = vadd.f32 %v7451_v61, %v3944_v31  ;;  %v3945_v10 = vmul.f32 %v7459_v9, %v3903_v16  ;;  %v8042_v58 = vpop.xlane.xlu1 %3353  ;;  %v8771_v31 = vld [vmem:[#allocation46_spill] sm:$0xff]  ;;  %v3848_v50 = vadd.f32 1e-05, %v3784_v51 }
 0xab0   :  { %v3843_v47 = vadd.f32 1e-05, %v3779_v54  ;;  %v3717_v8 = vmul.f32 %v8020_v35, %v8020_v35  ;;  %v3722_v54 = vmul.f32 %v8038_v5, %v8038_v5 }
 0xab1   :  { %v3609_v13 = vpop.xlane.xlu0 %3608  ;;  %v3987_v26 = vadd.f32 %v7451_v61, %v3945_v10  ;;  %v4178_v34 = vadd.f32 %v7510_v37, %v3986_v2  ;;  %v3690_v37 = vmul.f32 0.015625, %v7976_v15  ;;  %v4180_v15 = vadd.f32 %v7530_v27, %v3988_v7 }
 0xab2   :  { %5273 = vrsqrt.f32 %v3843_v47  ;;  %v3685_v48 = vmul.f32 0.015625, %v3609_v13  ;;  %v3811_v10 = vsub.f32 %v7552_v4, %v8000_v32 }
 0xab3   :  { %v4179_v0 = vadd.f32 %v7502_v46, %v3987_v26  ;;  %v4210_v17 = vadd.f32 %v4178_v34, %v8770_v49  ;;  %5275 = vrsqrt.f32 %v3846_v55  ;;  %v3948_v46 = vmul.f32 %v7459_v9, %v3906_v63  ;;  %v8773_v34 = vld [vmem:[#allocation47_spill] sm:$0xff] }
 0xab4   :  { %v5270_v3 = vpop.eup %5269  ;;  %v3749_v14 = vsub.f32 %v3685_v48, %v3717_v8  ;;  %v3754_v13 = vsub.f32 %v3690_v37, %v3722_v54  ;;  %v8063_v8 = vpop.xlane.xlu1 %3641 }
 0xab5   :  { %v3327_v21 = vpop.xlane.xlu0 %3326  ;;  %v3905_v20 = vmul.f32 %v5270_v3, %v3809_v6  ;;  %v4211_v41 = vadd.f32 %v4179_v0, %v8771_v31  ;;  %v5272_v25 = vpop.eup %5271  ;;  %v3990_v23 = vadd.f32 %v7451_v61, %v3948_v46  ;;  %v8772_v6 = vld [vmem:[#allocation48_spill] sm:$0xff]  ;;  %v3692_v0 = vmul.f32 0.015625, %v7995_v24 }
 0xab6   :  { %v3781_v45 = vmax.f32 %v3749_v14, 0.0  ;;  %v8044_v56 = vmul.f32 0.015625, %v3327_v21  ;;  %v3908_v62 = vmul.f32 %v5272_v25, %v3812_v57  ;;  %v4212_v26 = vadd.f32 %v4180_v15, %v8772_v6 }
 0xab7   :  { %v3947_v38 = vmul.f32 %v7459_v9, %v3905_v20  ;;  %v4241_v16 = vpack.c.bf16 %v4211_v41, %v4210_v17  ;;  %v8069_v14 = vmul.f32 0.015625, %v7983_v36  ;;  %v4182_v7 = vadd.f32 %v7550_v44, %v3990_v23 }
 0xab8   :  { %v3845_v11 = vadd.f32 1e-05, %v3781_v45  ;;  %v3719_v47 = vmul.f32 %v8044_v56, %v8044_v56  ;;  %v3950_v51 = vmul.f32 %v7459_v9, %v3908_v62  ;;  %v8081_v17 = vpop.xlane.xlu1 %3359  ;;  %v3814_v44 = vsub.f32 %v7587_v39, %v7998_v12 }
 0xab9   :  { %v3615_v2 = vpop.xlane.xlu0 %3614  ;;  %v3989_v22 = vadd.f32 %v7451_v61, %v3947_v38  ;;  %4289 = vrot.lane.b32.xlu1 %v4241_v16, %s5428_s1  ;;  %v3724_v49 = vmul.f32 %v8069_v14, %v8069_v14  ;;  %v3813_v38 = vsub.f32 %v7572_v52, %v8020_v35  ;;  %v8774_v16 = vld [vmem:[#allocation55_spill] sm:$0xff]  ;;  %v8093_v15 = vmul.f32 0.015625, %v8009_v60 }
 0xaba   :  { %5277 = vrsqrt.f32 %v3845_v11  ;;  %v3687_v28 = vmul.f32 0.015625, %v3615_v2  ;;  %v4214_v2 = vadd.f32 %v4182_v7, %v8774_v16  ;;  %v8115_v7 = vmul.f32 0.015625, %v8042_v58 }
 0xabb   :  { %v4181_v53 = vadd.f32 %v7524_v43, %v3989_v22  ;;  %5279 = vrsqrt.f32 %v3848_v50  ;;  %v3786_v43 = vmax.f32 %v3754_v13, 0.0  ;;  %v3756_v25 = vsub.f32 %v3692_v0, %v3724_v49 }
 0xabc   :  { %v5274_v19 = vpop.eup %5273  ;;  %v3751_v27 = vsub.f32 %v3687_v28, %v3719_v47  ;;  %v3992_v22 = vadd.f32 %v7451_v61, %v3950_v51  ;;  %v8775_v47 = vld [vmem:[#allocation54_spill] sm:$0xff]  ;;  %v3726_v23 = vmul.f32 %v8093_v15, %v8093_v15 }
 0xabd   :  { %v3333_v48 = vpop.xlane.xlu0 %3332  ;;  %v4213_v3 = vadd.f32 %v4181_v53, %v8773_v34  ;;  %v3907_v55 = vmul.f32 %v5274_v19, %v3811_v10  ;;  %v5276_v37 = vpop.eup %5275  ;;  %v3850_v41 = vadd.f32 1e-05, %v3786_v43  ;;  %v3788_v10 = vmax.f32 %v3756_v25, 0.0 }
 0xabe   :  { %v3783_v4 = vmax.f32 %v3751_v27, 0.0  ;;  %v8071_v32 = vmul.f32 0.015625, %v3333_v48  ;;  %v3910_v12 = vmul.f32 %v5276_v37, %v3814_v44  ;;  %v3648_v53 = vpop.xlane.xlu1 %3647  ;;  %v4184_v60 = vadd.f32 %v7570_v42, %v3992_v22 }
 0xabf   :  { %v4242_v63 = vpack.c.bf16 %v4213_v3, %v4212_v26  ;;  %v3949_v21 = vmul.f32 %v7459_v9, %v3907_v55  ;;  %v3815_v3 = vsub.f32 %v7592_v30, %v8044_v56  ;;  %v3852_v43 = vadd.f32 1e-05, %v3788_v10 }
 0xac0   :  { %v3847_v20 = vadd.f32 1e-05, %v3783_v4  ;;  %v3721_v24 = vmul.f32 %v8071_v32, %v8071_v32  ;;  %v3952_v6 = vmul.f32 %v7459_v9, %v3910_v12  ;;  %v3696_v56 = vmul.f32 0.015625, %v8063_v8  ;;  %v8778_v8 = vld [vmem:[#allocation53_spill] sm:$0xff] }
 0xac1   :  { %4291 = vrot.lane.b32.xlu0 %v4242_v63, %s5428_s1  ;;  %v3621_v45 = vpop.xlane.xlu0 %3620  ;;  %v3991_v36 = vadd.f32 %v7451_v61, %v3949_v21  ;;  %v8776_v21 = vld [vmem:[#allocation57_spill] sm:$0xff] }
 0xac2   :  { %5281 = vrsqrt.f32 %v3847_v20  ;;  %v3689_v31 = vmul.f32 0.015625, %v3621_v45  ;;  %v4216_v0 = vadd.f32 %v4184_v60, %v8776_v21  ;;  %v3366_v37 = vpop.xlane.xlu1 %3365 }
 0xac3   :  { %v4183_v11 = vadd.f32 %v7544_v40, %v3991_v36  ;;  %5283 = vrsqrt.f32 %v3850_v41  ;;  %v3694_v40 = vmul.f32 0.015625, %v8025_v18  ;;  %v3816_v18 = vsub.f32 %v7607_v33, %v8016_v1  ;;  %v8777_v1 = vld [vmem:[#allocation56_spill] sm:$0xff] }
 0xac4   :  { %v5278_v46 = vpop.eup %5277  ;;  %v3753_v54 = vsub.f32 %v3689_v31, %v3721_v24  ;;  %v3994_v36 = vadd.f32 %v7451_v61, %v3952_v6 }
 0xac5   :  { %v3339_v57 = vpop.xlane.xlu0 %3338  ;;  %v4215_v28 = vadd.f32 %v4183_v11, %v8775_v47  ;;  %v3909_v39 = vmul.f32 %v5278_v46, %v3813_v38  ;;  %v5280_v27 = vpop.eup %5279  ;;  %v3758_v42 = vsub.f32 %v3694_v40, %v3726_v23  ;;  %v3728_v38 = vmul.f32 %v8115_v7, %v8115_v7  ;;  %v8779_v47 = vld [vmem:[#allocation63_spill] sm:$0xff] }
 0xac6   :  { %v3785_v50 = vmax.f32 %v3753_v54, 0.0  ;;  %v8096_v13 = vmul.f32 0.015625, %v3339_v57  ;;  %v3912_v20 = vmul.f32 %v5280_v27, %v3816_v18  ;;  %v4186_v25 = vadd.f32 %v7590_v29, %v3994_v36  ;;  %v3654_v29 = vpop.xlane.xlu1 %3653  ;;  %v8782_v27 = vld [vmem:[#allocation40_spill] sm:$0xff]  ;;  %v8785_v36 = vld [vmem:[#allocation65_spill] sm:$0xff] }
 0xac7   :  { %v4243_v52 = vpack.c.bf16 %v4215_v28, %v4214_v2  ;;  %v3951_v35 = vmul.f32 %v7459_v9, %v3909_v39  ;;  %v3818_v54 = vsub.f32 %v8778_v8, %v8038_v5  ;;  %v3760_v57 = vsub.f32 %v3696_v56, %v3728_v38  ;;  %v8780_v39 = vld [vmem:[#allocation60_spill] sm:$0xff] }
 0xac8   :  { %v3849_v19 = vadd.f32 1e-05, %v3785_v50  ;;  %v3723_v26 = vmul.f32 %v8096_v13, %v8096_v13  ;;  %v3954_v58 = vmul.f32 %v7459_v9, %v3912_v20  ;;  %v3817_v28 = vsub.f32 %v8779_v47, %v8071_v32  ;;  %v8789_v47 = vld [vmem:[#allocation20_spill] sm:$0xff] }
 0xac9   :  { %4293 = vrot.lane.b32.xlu1 %v4243_v52, %s5428_s1  ;;  %v3627_v62 = vpop.xlane.xlu0 %3626  ;;  %v3993_v48 = vadd.f32 %v7451_v61, %v3951_v35  ;;  %v8137_v40 = vmul.f32 0.015625, %v8081_v17  ;;  %v3792_v18 = vmax.f32 %v3760_v57, 0.0  ;;  %v8160_v38 = vmul.f32 0.015625, %v3366_v37 }
 0xaca   :  { %5285 = vrsqrt.f32 %v3849_v19  ;;  %v3691_v34 = vmul.f32 0.015625, %v3627_v62  ;;  %v3996_v5 = vadd.f32 %v7451_v61, %v3954_v58  ;;  %v8781_v19 = vld [vmem:[#allocation14_spill] sm:$0xff] }
 0xacb   :  { %v4185_v55 = vadd.f32 %v7564_v59, %v3993_v48  ;;  %v3790_v59 = vmax.f32 %v3758_v42, 0.0  ;;  %5287 = vrsqrt.f32 %v3852_v43  ;;  %v4218_v60 = vadd.f32 %v4186_v25, %v8781_v19 }
 0xacc   :  { %v5282_v4 = vpop.eup %5281  ;;  %v3755_v63 = vsub.f32 %v3691_v34, %v3723_v26  ;;  %v3698_v48 = vmul.f32 0.015625, %v3648_v53  ;;  %v3730_v34 = vmul.f32 %v8137_v40, %v8137_v40 }
 0xacd   :  { %v3345_v33 = vpop.xlane.xlu0 %3344  ;;  %v4217_v51 = vadd.f32 %v4185_v55, %v8777_v1  ;;  %v3911_v45 = vmul.f32 %v5282_v4, %v3815_v3  ;;  %v5284_v41 = vpop.eup %5283  ;;  %v3854_v22 = vadd.f32 1e-05, %v3790_v59  ;;  %v8783_v3 = vld [vmem:[#allocation62_spill] sm:$0xff]  ;;  %v8784_v1 = vld [vmem:[#allocation51_spill] sm:$0xff]  ;;  %v8786_v59 = vld [vmem:[#allocation61_spill] sm:$0xff] }
 0xace   :  { %v3787_v49 = vmax.f32 %v3755_v63, 0.0  ;;  %v8119_v30 = vmul.f32 0.015625, %v3345_v33  ;;  %v3914_v35 = vmul.f32 %v5284_v41, %v3818_v54  ;;  %v4188_v55 = vadd.f32 %v8783_v3, %v3996_v5 }
 0xacf   :  { %v4244_v24 = vpack.c.bf16 %v4217_v51, %v4216_v0  ;;  %v3953_v31 = vmul.f32 %v7459_v9, %v3911_v45  ;;  %v3762_v21 = vsub.f32 %v3698_v48, %v3730_v34  ;;  %v3372_v0 = vpop.xlane.xlu1 %3371  ;;  %v3820_v51 = vsub.f32 %v8784_v1, %v8069_v14  ;;  %v8792_v48 = vld [vmem:[#allocation66_spill] sm:$0xff] }
 0xad0   :  { %v3851_v44 = vadd.f32 1e-05, %v3787_v49  ;;  %v3725_v16 = vmul.f32 %v8119_v30, %v8119_v30  ;;  %v3956_v4 = vmul.f32 %v7459_v9, %v3914_v35  ;;  %v3856_v45 = vadd.f32 1e-05, %v3792_v18  ;;  %v8790_v35 = vld [vmem:[#allocation64_spill] sm:$0xff] }
 0xad1   :  { %4295 = vrot.lane.b32.xlu0 %v4244_v24, %s5428_s1  ;;  %v3633_v11 = vpop.xlane.xlu0 %3632  ;;  %v3995_v46 = vadd.f32 %v7451_v61, %v3953_v31  ;;  %v3819_v49 = vsub.f32 %v8785_v36, %v8096_v13  ;;  %v3794_v14 = vmax.f32 %v3762_v21, 0.0  ;;  %v3700_v13 = vmul.f32 0.015625, %v3654_v29 }
 0xad2   :  { %5289 = vrsqrt.f32 %v3851_v44  ;;  %v3693_v2 = vmul.f32 0.015625, %v3633_v11  ;;  %v8787_v44 = vld [vmem:[#allocation31_spill] sm:$0xff]  ;;  %v3998_v41 = vadd.f32 %v7451_v61, %v3956_v4 }
 0xad3   :  { %v4187_v12 = vadd.f32 %v8780_v39, %v3995_v46  ;;  %5291 = vrsqrt.f32 %v3854_v22  ;;  %v4220_v58 = vadd.f32 %v4188_v55, %v8787_v44  ;;  %v8788_v46 = vld [vmem:[#allocation41_spill] sm:$0xff]  ;;  %v3660_v39 = vpop.xlane.xlu1 %3659  ;;  %v3858_v19 = vadd.f32 1e-05, %v3794_v14  ;;  %v8794_v55 = vld [vmem:[#allocation39_spill] sm:$0xff]  ;;  %v8798_v14 = vld [vmem:[#allocation68_spill] sm:$0xff] }
 0xad4   :  { %v5286_v50 = vpop.eup %5285  ;;  %v3757_v52 = vsub.f32 %v3693_v2, %v3725_v16 }
 0xad5   :  { %v3351_v10 = vpop.xlane.xlu0 %3350  ;;  %v4219_v23 = vadd.f32 %v4187_v12, %v8782_v27  ;;  %v3913_v62 = vmul.f32 %v5286_v50, %v3817_v28  ;;  %v5288_v63 = vpop.eup %5287  ;;  %v3822_v28 = vsub.f32 %v8789_v47, %v8093_v15  ;;  %v3732_v50 = vmul.f32 %v8160_v38, %v8160_v38 }
 0xad6   :  { %v3789_v6 = vmax.f32 %v3757_v52, 0.0  ;;  %v8142_v32 = vmul.f32 0.015625, %v3351_v10  ;;  %v3916_v54 = vmul.f32 %v5288_v63, %v3820_v51  ;;  %v4190_v10 = vadd.f32 %v8790_v35, %v3998_v41 }
 0xad7   :  { %v4245_v26 = vpack.c.bf16 %v4219_v23, %v4218_v60  ;;  %v3955_v17 = vmul.f32 %v7459_v9, %v3913_v62  ;;  %v3764_v27 = vsub.f32 %v3700_v13, %v3732_v50  ;;  %v8791_v23 = vld [vmem:[#allocation67_spill] sm:$0xff]  ;;  %v3378_v63 = vpop.xlane.xlu1 %3377  ;;  %v8800_v50 = vld [vmem:[#allocation42_spill] sm:$0xff] }
 0xad8   :  { %v3853_v42 = vadd.f32 1e-05, %v3789_v6  ;;  %v3727_v20 = vmul.f32 %v8142_v32, %v8142_v32  ;;  %v3958_v29 = vmul.f32 %v7459_v9, %v3916_v54  ;;  %v3821_v62 = vsub.f32 %v8791_v23, %v8119_v30 }
 0xad9   :  { %4297 = vrot.lane.b32.xlu1 %v4245_v26, %s5428_s1  ;;  %v3639_v43 = vpop.xlane.xlu0 %3638  ;;  %v3997_v53 = vadd.f32 %v7451_v61, %v3955_v17  ;;  %v8184_v30 = vmul.f32 0.015625, %v3372_v0 }
 0xada   :  { %5293 = vrsqrt.f32 %v3853_v42  ;;  %v3695_v33 = vmul.f32 0.015625, %v3639_v43  ;;  %v8793_v42 = vld [vmem:[#allocation15_spill] sm:$0xff] }
 0xadb   :  { %v4189_v56 = vadd.f32 %v8786_v59, %v3997_v53  ;;  %5295 = vrsqrt.f32 %v3856_v45  ;;  %v4222_v3 = vadd.f32 %v4190_v10, %v8793_v42  ;;  %v4000_v53 = vadd.f32 %v7451_v61, %v3958_v29 }
 0xadc   :  { %v5290_v24 = vpop.eup %5289  ;;  %v3759_v31 = vsub.f32 %v3695_v33, %v3727_v20  ;;  %v3796_v33 = vmax.f32 %v3764_v27, 0.0  ;;  %v3702_v59 = vmul.f32 0.015625, %v3660_v39  ;;  %v8801_v27 = vld [vmem:[#allocation52_spill] sm:$0xff] }
 0xadd   :  { %v3357_v11 = vpop.xlane.xlu0 %3356  ;;  %v4221_v25 = vadd.f32 %v4189_v56, %v8788_v46  ;;  %v3915_v8 = vmul.f32 %v5290_v24, %v3819_v49  ;;  %v5292_v12 = vpop.eup %5291 }
 0xade   :  { %v3791_v16 = vmax.f32 %v3759_v31, 0.0  ;;  %v8163_v2 = vmul.f32 0.015625, %v3357_v11  ;;  %v3918_v17 = vmul.f32 %v5292_v12, %v3822_v28  ;;  %v8795_v31 = vld [vmem:[#allocation50_spill] sm:$0xff]  ;;  %v3860_v46 = vadd.f32 1e-05, %v3796_v33 }
 0xadf   :  { %v4246_v22 = vpack.c.bf16 %v4221_v25, %v4220_v58  ;;  %v3957_v57 = vmul.f32 %v7459_v9, %v3915_v8  ;;  %v4192_v44 = vadd.f32 %v8795_v31, %v4000_v53  ;;  %v8796_v58 = vld [vmem:[#allocation22_spill] sm:$0xff]  ;;  %v3734_v25 = vmul.f32 %v8184_v30, %v8184_v30  ;;  %v8797_v8 = vld [vmem:[#allocation69_spill] sm:$0xff] }
 0xae0   :  { %v3855_v37 = vadd.f32 1e-05, %v3791_v16  ;;  %v3729_v15 = vmul.f32 %v8163_v2, %v8163_v2  ;;  %v3960_v36 = vmul.f32 %v7459_v9, %v3918_v17  ;;  %v3824_v41 = vsub.f32 %v8796_v58, %v8115_v7  ;;  %v8802_v17 = vld [vmem:[#allocation24_spill] sm:$0xff] }
 0xae1   :  { %4299 = vrot.lane.b32.xlu0 %v4246_v22, %s5428_s1  ;;  %v3645_v52 = vpop.xlane.xlu0 %3644  ;;  %v3999_v5 = vadd.f32 %v7451_v61, %v3957_v57  ;;  %v3823_v54 = vsub.f32 %v8797_v8, %v8142_v32  ;;  %v3666_v22 = vpop.xlane.xlu1 %3665  ;;  %v3766_v28 = vsub.f32 %v3702_v59, %v3734_v25  ;;  %v8205_v32 = vmul.f32 0.015625, %v3378_v63  ;;  %v8804_v63 = vld [vmem:[#allocation70_spill] sm:$0xff]  ;;  %v8807_v8 = vld [vmem:[#allocation21_spill] sm:$0xff] }
 0xae2   :  { %5297 = vrsqrt.f32 %v3855_v37  ;;  %v3697_v60 = vmul.f32 0.015625, %v3645_v52  ;;  %v4002_v47 = vadd.f32 %v7451_v61, %v3960_v36  ;;  %v8799_v37 = vld [vmem:[#allocation30_spill] sm:$0xff] }
 0xae3   :  { %v4191_v6 = vadd.f32 %v8792_v48, %v3999_v5  ;;  %5299 = vrsqrt.f32 %v3858_v19  ;;  %v4224_v12 = vadd.f32 %v4192_v44, %v8799_v37  ;;  %v3798_v48 = vmax.f32 %v3766_v28, 0.0 }
 0xae4   :  { %v5294_v18 = vpop.eup %5293  ;;  %v3761_v26 = vsub.f32 %v3697_v60, %v3729_v15  ;;  %v4194_v23 = vadd.f32 %v8801_v27, %v4002_v47 }
 0xae5   :  { %v3363_v34 = vpop.xlane.xlu0 %3362  ;;  %v4223_v4 = vadd.f32 %v4191_v6, %v8794_v55  ;;  %v3917_v43 = vmul.f32 %v5294_v18, %v3821_v62  ;;  %v5296_v49 = vpop.eup %5295  ;;  %v3704_v6 = vmul.f32 0.015625, %v3666_v22 }
 0xae6   :  { %v3793_v21 = vmax.f32 %v3761_v26, 0.0  ;;  %v8182_v20 = vmul.f32 0.015625, %v3363_v34  ;;  %v3920_v7 = vmul.f32 %v5296_v49, %v3824_v41  ;;  %v3826_v34 = vsub.f32 %v8802_v17, %v8137_v40  ;;  %v3384_v42 = vpop.xlane.xlu1 %3383 }
 0xae7   :  { %v4247_v1 = vpack.c.bf16 %v4223_v4, %v4222_v3  ;;  %v3959_v51 = vmul.f32 %v7459_v9, %v3917_v43  ;;  %v3736_v4 = vmul.f32 %v8205_v32, %v8205_v32  ;;  %v8803_v43 = vld [vmem:[#allocation71_spill] sm:$0xff]  ;;  %v3862_v49 = vadd.f32 1e-05, %v3798_v48 }
 0xae8   :  { %v3857_v45 = vadd.f32 1e-05, %v3793_v21  ;;  %v3731_v0 = vmul.f32 %v8182_v20, %v8182_v20  ;;  %v3962_v62 = vmul.f32 %v7459_v9, %v3920_v7  ;;  %v3825_v53 = vsub.f32 %v8803_v43, %v8163_v2  ;;  %v8808_v7 = vld [vmem:[#allocation26_spill] sm:$0xff] }
 0xae9   :  { %4301 = vrot.lane.b32.xlu1 %v4247_v1, %s5428_s1  ;;  %v3651_v56 = vpop.xlane.xlu0 %3650  ;;  %v4001_v24 = vadd.f32 %v7451_v61, %v3959_v51  ;;  %v8805_v51 = vld [vmem:[#allocation38_spill] sm:$0xff]  ;;  %v3768_v59 = vsub.f32 %v3704_v6, %v3736_v4  ;;  %v8226_v2 = vmul.f32 0.015625, %v3384_v42  ;;  %v3828_v28 = vsub.f32 %v8808_v7, %v8160_v38  ;;  %v8812_v6 = vld [vmem:[#allocation32_spill] sm:$0xff]  ;;  %v8819_v7 = vld [vmem:[#allocation25_spill] sm:$0xff] }
 0xaea   :  { %5301 = vrsqrt.f32 %v3857_v45  ;;  %v3699_v11 = vmul.f32 0.015625, %v3651_v56  ;;  %v4226_v45 = vadd.f32 %v4194_v23, %v8805_v51  ;;  %v4004_v40 = vadd.f32 %v7451_v61, %v3962_v62 }
 0xaeb   :  { %v4193_v16 = vadd.f32 %v8798_v14, %v4001_v24  ;;  %5303 = vrsqrt.f32 %v3860_v46  ;;  %v8806_v24 = vld [vmem:[#allocation37_spill] sm:$0xff] }
 0xaec   :  { %v5298_v13 = vpop.eup %5297  ;;  %v3763_v57 = vsub.f32 %v3699_v11, %v3731_v0 }
 0xaed   :  { %v3369_v39 = vpop.xlane.xlu0 %3368  ;;  %v4225_v52 = vadd.f32 %v4193_v16, %v8800_v50  ;;  %v3919_v5 = vmul.f32 %v5298_v13, %v3823_v54  ;;  %v5300_v15 = vpop.eup %5299  ;;  %v4196_v54 = vadd.f32 %v8807_v8, %v4004_v40  ;;  %v3800_v13 = vmax.f32 %v3768_v59, 0.0  ;;  %v8809_v50 = vld [vmem:[#allocation73_spill] sm:$0xff] }
 0xaee   :  { %v3795_v35 = vmax.f32 %v3763_v57, 0.0  ;;  %v8203_v10 = vmul.f32 0.015625, %v3369_v39  ;;  %v3922_v36 = vmul.f32 %v5300_v15, %v3826_v34  ;;  %v8811_v15 = vld [vmem:[#allocation34_spill] sm:$0xff] }
 0xaef   :  { %v4248_v29 = vpack.c.bf16 %v4225_v52, %v4224_v12  ;;  %v3961_v19 = vmul.f32 %v7459_v9, %v3919_v5  ;;  %v3738_v12 = vmul.f32 %v8226_v2, %v8226_v2  ;;  %v3827_v52 = vsub.f32 %v8809_v50, %v8182_v20  ;;  %v8810_v5 = vld [vmem:[#allocation72_spill] sm:$0xff] }
 0xaf0   :  { %v3859_v60 = vadd.f32 1e-05, %v3795_v35  ;;  %v3733_v3 = vmul.f32 %v8203_v10, %v8203_v10  ;;  %v3964_v14 = vmul.f32 %v7459_v9, %v3922_v36  ;;  %v3864_v23 = vadd.f32 1e-05, %v3800_v13  ;;  %v8815_v36 = vld [vmem:[#allocation74_spill] sm:$0xff]  ;;  %v8820_v50 = vld [vmem:[#allocation28_spill] sm:$0xff] }
 0xaf1   :  { %4303 = vrot.lane.b32.xlu0 %v4248_v29, %s5428_s1  ;;  %v3657_v18 = vpop.xlane.xlu0 %3656  ;;  %v4003_v26 = vadd.f32 %v7451_v61, %v3961_v19 }
 0xaf2   :  { %5305 = vrsqrt.f32 %v3859_v60  ;;  %v3701_v55 = vmul.f32 0.015625, %v3657_v18  ;;  %v4228_v60 = vadd.f32 %v4196_v54, %v8811_v15  ;;  %v4006_v27 = vadd.f32 %v7451_v61, %v3964_v14 }
 0xaf3   :  { %v4195_v21 = vadd.f32 %v8804_v63, %v4003_v26  ;;  %v3672_v41 = vpop.xlane.xlu1 %3671  ;;  %5307 = vrsqrt.f32 %v3862_v49 }
 0xaf4   :  { %v5302_v33 = vpop.eup %5301  ;;  %v3765_v1 = vsub.f32 %v3701_v55, %v3733_v3  ;;  %v3706_v22 = vmul.f32 0.015625, %v3672_v41  ;;  %v8813_v55 = vld [vmem:[#allocation23_spill] sm:$0xff] }
 0xaf5   :  { %v3375_v56 = vpop.xlane.xlu0 %3374  ;;  %v4227_v31 = vadd.f32 %v4195_v21, %v8806_v24  ;;  %v3921_v44 = vmul.f32 %v5302_v33, %v3825_v53  ;;  %v5304_v16 = vpop.eup %5303  ;;  %v4198_v4 = vadd.f32 %v8813_v55, %v4006_v27 }
 0xaf6   :  { %v3797_v58 = vmax.f32 %v3765_v1, 0.0  ;;  %v8224_v0 = vmul.f32 0.015625, %v3375_v56  ;;  %v3924_v38 = vmul.f32 %v5304_v16, %v3828_v28  ;;  %v3770_v62 = vsub.f32 %v3706_v22, %v3738_v12  ;;  %v8816_v56 = vld [vmem:[#allocation27_spill] sm:$0xff] }
 0xaf7   :  { %v4249_v11 = vpack.c.bf16 %v4227_v31, %v4226_v45  ;;  %v3963_v46 = vmul.f32 %v7459_v9, %v3921_v44  ;;  %v8814_v45 = vld [vmem:[#allocation75_spill] sm:$0xff]  ;;  %v3830_v24 = vsub.f32 %v8816_v56, %v8184_v30  ;;  %v8828_v56 = vld [vmem:[#allocation12_spill] sm:$0xff] }
 0xaf8   :  { %v3861_v25 = vadd.f32 1e-05, %v3797_v58  ;;  %v3735_v39 = vmul.f32 %v8224_v0, %v8224_v0  ;;  %v3802_v43 = vmax.f32 %v3770_v62, 0.0  ;;  %v3966_v21 = vmul.f32 %v7459_v9, %v3924_v38  ;;  %v8817_v44 = vld [vmem:[#allocation35_spill] sm:$0xff] }
 0xaf9   :  { %4305 = vrot.lane.b32.xlu1 %v4249_v11, %s5428_s1  ;;  %v3663_v57 = vpop.xlane.xlu0 %3662  ;;  %v4005_v47 = vadd.f32 %v7451_v61, %v3963_v46  ;;  %v3829_v40 = vsub.f32 %v8814_v45, %v8203_v10  ;;  %v4230_v58 = vadd.f32 %v4198_v4, %v8817_v44  ;;  %v8818_v46 = vld [vmem:[#allocation16_spill] sm:$0xff]  ;;  %v8826_v45 = vld [vmem:[#allocation58_spill] sm:$0xff] }
 0xafa   :  { %5309 = vrsqrt.f32 %v3861_v25  ;;  %v3703_v37 = vmul.f32 0.015625, %v3663_v57  ;;  %v3866_v41 = vadd.f32 1e-05, %v3802_v43  ;;  %v4008_v54 = vadd.f32 %v7451_v61, %v3966_v21  ;;  %v4135_v43 = vpop.permute.xlu1 %4134 }
 0xafb   :  { %v4197_v35 = vadd.f32 %v8810_v5, %v4005_v47  ;;  %5311 = vrsqrt.f32 %v3864_v23  ;;  %v8823_v23 = vld [vmem:[#allocation17_spill] sm:$0xff] }
 0xafc   :  { %v5306_v29 = vpop.eup %5305  ;;  %v3767_v19 = vsub.f32 %v3703_v37, %v3735_v39  ;;  %v4200_v28 = vadd.f32 %v8819_v7, %v4008_v54 }
 0xafd   :  { %v3381_v48 = vpop.xlane.xlu0 %3380  ;;  %v4229_v18 = vadd.f32 %v4197_v35, %v8812_v6  ;;  %v3923_v26 = vmul.f32 %v5306_v29, %v3827_v52  ;;  %v5308_v51 = vpop.eup %5307  ;;  %v3831_v52 = vsub.f32 %v8820_v50, %v8224_v0  ;;  %v8821_v35 = vld [vmem:[#allocation76_spill] sm:$0xff] }
 0xafe   :  { %v3799_v17 = vmax.f32 %v3767_v19, 0.0  ;;  %v8245_v34 = vmul.f32 0.015625, %v3381_v48  ;;  %v3926_v13 = vmul.f32 %v5308_v51, %v3830_v24  ;;  %v4232_v62 = vadd.f32 %v4200_v28, %v8823_v23  ;;  %v8824_v48 = vld [vmem:[#allocation33_spill] sm:$0xff] }
 0xaff   :  { %v4250_v42 = vpack.c.bf16 %v4229_v18, %v4228_v60  ;;  %v3965_v20 = vmul.f32 %v7459_v9, %v3923_v26  ;;  %v8822_v60 = vld [vmem:[#allocation29_spill] sm:$0xff] }
 0xb00   :  { %v3863_v3 = vadd.f32 1e-05, %v3799_v17  ;;  %v3737_v33 = vmul.f32 %v8245_v34, %v8245_v34  ;;  %v3968_v5 = vmul.f32 %v7459_v9, %v3926_v13  ;;  %v3832_v27 = vsub.f32 %v8822_v60, %v8205_v32 }
 0xb01   :  { %4307 = vrot.lane.b32.xlu0 %v4250_v42, %s5428_s1  ;;  %v3669_v53 = vpop.xlane.xlu0 %3668  ;;  %v4007_v63 = vadd.f32 %v7451_v61, %v3965_v20 }
 0xb02   :  { %5313 = vrsqrt.f32 %v3863_v3  ;;  %v3705_v1 = vmul.f32 0.015625, %v3669_v53  ;;  %v4010_v17 = vadd.f32 %v7451_v61, %v3968_v5  ;;  %v8832_v5 = vld [vmem:[#allocation19_spill] sm:$0xff] }
 0xb03   :  { %v4199_v49 = vadd.f32 %v8815_v36, %v4007_v63  ;;  %5315 = vrsqrt.f32 %v3866_v41  ;;  %v8825_v63 = vld [vmem:[#allocation11_spill] sm:$0xff]  ;;  %v8827_v36 = vld [vmem:[#allocation13_spill] sm:$0xff] }
 0xb04   :  { %v5310_v59 = vpop.eup %5309  ;;  %v3769_v31 = vsub.f32 %v3705_v1, %v3737_v33  ;;  %v3833_v21 = vsub.f32 %v8825_v63, %v8245_v34 }
 0xb05   :  { %v3387_v11 = vpop.xlane.xlu0 %3386  ;;  %v4231_v25 = vadd.f32 %v4199_v49, %v8818_v46  ;;  %v3925_v8 = vmul.f32 %v5310_v59, %v3829_v40  ;;  %v5312_v12 = vpop.eup %5311  ;;  %v3834_v40 = vsub.f32 %v8826_v45, %v8226_v2  ;;  %v8829_v2 = vld [vmem:[#allocation59_spill] sm:$0xff] }
 0xb06   :  { %v3801_v14 = vmax.f32 %v3769_v31, 0.0  ;;  %v8262_v16 = vmul.f32 0.015625, %v3387_v11  ;;  %v3928_v0 = vmul.f32 %v5312_v12, %v3832_v27 }
 0xb07   :  { %v4251_v10 = vpack.c.bf16 %v4231_v25, %v4230_v58  ;;  %v3967_v22 = vmul.f32 %v7459_v9, %v3925_v8  ;;  %v4139_v8 = vpop.permute.xlu1 %4138 }
 0xb08   :  { %v3865_v57 = vadd.f32 1e-05, %v3801_v14  ;;  %v3739_v39 = vmul.f32 %v8262_v16, %v8262_v16  ;;  %v3970_v33 = vmul.f32 %v7459_v9, %v3928_v0  ;;  %v3835_v54 = vsub.f32 %v8829_v2, %v8262_v16 }
 0xb09   :  { %4309 = vrot.lane.b32.xlu1 %v4251_v10, %s5428_s1  ;;  %v3675_v30 = vpop.xlane.xlu0 %3674  ;;  %v4009_v47 = vadd.f32 %v7451_v61, %v3967_v22  ;;  %v8830_v22 = vld [vmem:[#allocation18_spill] sm:$0xff] }
 0xb0a   :  { %5317 = vrsqrt.f32 %v3865_v57  ;;  %v3707_v37 = vmul.f32 0.015625, %v3675_v30  ;;  %v4012_v44 = vadd.f32 %v7451_v61, %v3970_v33  ;;  %v8831_v30 = vld [vmem:[#allocation36_spill] sm:$0xff] }
 0xb0b   :  { %v4201_v29 = vadd.f32 %v8821_v35, %v4009_v47  ;;  %v4143_v16 = vpop.permute.xlu1 %4142 }
 0xb0c   :  { %v5314_v19 = vpop.eup %5313  ;;  %v3771_v15 = vsub.f32 %v3707_v37, %v3739_v39 }
 0xb0d   :  { %v4133_v38 = vpop.permute.xlu0 %4132  ;;  %v4233_v6 = vadd.f32 %v4201_v29, %v8824_v48  ;;  %v3927_v18 = vmul.f32 %v5314_v19, %v3831_v52  ;;  %v5316_v53 = vpop.eup %5315  ;;  %v8833_v29 = vld [vmem:[#allocation49_spill] sm:$0xff] }
 0xb0e   :  { %v3803_v26 = vmax.f32 %v3771_v15, 0.0  ;;  %v4202_v55 = vadd.f32 %v4133_v38, %v4010_v17  ;;  %v3930_v58 = vmul.f32 %v5316_v53, %v3834_v40 }
 0xb0f   :  { %v4252_v42 = vpack.c.bf16 %v4233_v6, %v4232_v62  ;;  %v3969_v20 = vmul.f32 %v7459_v9, %v3927_v18 }
 0xb10   :  { %v3867_v3 = vadd.f32 1e-05, %v3803_v26  ;;  %v4234_v49 = vadd.f32 %v4202_v55, %v8827_v36  ;;  %v3972_v14 = vmul.f32 %v7459_v9, %v3930_v58 }
 0xb11   :  { %4311 = vrot.lane.b32.xlu0 %v4252_v42, %s5428_s1  ;;  %v4137_v4 = vpop.permute.xlu0 %4136  ;;  %v4011_v32 = vadd.f32 %v7451_v61, %v3969_v20 }
 0xb12   :  { %5319 = vrsqrt.f32 %v3867_v3  ;;  %v4204_v34 = vadd.f32 %v4137_v4, %v4012_v44  ;;  %v4014_v28 = vadd.f32 %v7451_v61, %v3972_v14  ;;  %v8324_v3 = vld [vmem:[%s8382_s9] ss:$0 sm:$0xff]  ;;  %s5431_s9 = smov [#allocation7]  }
 0xb13   :  { %v4203_v1 = vadd.f32 %v4135_v43, %v4011_v32  ;;  %s4589_s22 = sshll.u32 %s5431_s9, 4  ;;  %s4590_s22 = int_to_ptr.vmem [resolvable:$true] %s4589_s22 }
 0xb14   :  { %v5318_v51 = vpop.eup %5317  ;;  %v4236_v57 = vadd.f32 %v4204_v34, %v8830_v22  ;;  %s5396_s25 = scalar_lea.vmem %s4590_s22, 4096  ;;  %p5401_p3 = scmp.lt.s32.totalorder %s4590_s22, %s4590_s22 }
 0xb15   :  { %v4141_v59 = vpop.permute.xlu0 %4140  ;;  %v4235_v24 = vadd.f32 %v4203_v1, %v8828_v56  ;;  %v3929_v31 = vmul.f32 %v5318_v51, %v3833_v21  ;;  %p5397_p2 = scmp.ne.s32.totalorder %s4590_s22, %s5396_s25  ;;  %p5402_p4 = scmp.lt.s32.totalorder %s5396_s25, %s5396_s25 }
 0xb16   :  { %v4206_v12 = vadd.f32 %v4141_v59, %v4014_v28 }
 0xb17   :  { %v4253_v41 = vpack.c.bf16 %v4235_v24, %v4234_v49  ;;  %v3971_v11 = vmul.f32 %v7459_v9, %v3929_v31  ;;  %p5403_p5 = por %p5402_p4, %p5401_p3 }
 0xb18   :  { %v4238_v35 = vadd.f32 %v4206_v12, %v8832_v5 }
 0xb19   :  { %4313 = vrot.lane.b32.xlu1 %v4253_v41, %s5428_s1  ;;  %v4288_v46 = vpop.permute.xlu0 %4287  ;;  %v4013_v25 = vadd.f32 %v7451_v61, %v3971_v11  ;;  %p5404_p6 = pnand %p5403_p5, %p5397_p2 }
 0xb1a   :  { %5059 = vmatprep.mubr.msk.bf16.mxu1 %vm518_vm1, %v4288_v46 }
 0xb1b   :  { %v4205_v10 = vadd.f32 %v4139_v8, %v4013_v25 }
 0xb1c   :  { %v5320_v13 = vpop.eup %5319 }
 0xb1d   :  { %v4237_v47 = vadd.f32 %v4205_v10, %v8831_v30  ;;  %v3931_v7 = vmul.f32 %v5320_v13, %v3835_v54 }
 0xb1f   :  { %v4254_v39 = vpack.c.bf16 %v4237_v47, %v4236_v57  ;;  %v3973_v37 = vmul.f32 %v7459_v9, %v3931_v7 }
 0xb21   :  { %4315 = vrot.lane.b32.xlu0 %v4254_v39, %s5428_s1  ;;  %v4015_v50 = vadd.f32 %v7451_v61, %v3973_v37 }
 0xb23   :  { %v4207_v52 = vadd.f32 %v4143_v16, %v4015_v50 }
 0xb25   :  { %v4239_v19 = vadd.f32 %v4207_v52, %v8833_v29 }
 0xb27   :  { %v4255_v15 = vpack.c.bf16 %v4239_v19, %v4238_v35 }
 0xb29   :  { %4317 = vrot.lane.b32.xlu1 %v4255_v15, %s5428_s1 }
 0xb2b   :  { %v4290_v60 = vpop.permute.xlu1 %4289 }
 0xb2c   :  { %5060 = vmatmul.mubr.msk.bf16.vlgmr.msra.gmra.mrb[128].mxu1 %vm518_vm1, %v4290_v60 }
 0xb33   :  { %v4292_v27 = vpop.permute.xlu0 %4291 }
 0xb34   :  { %5063 = vmatprep.mubr.msk.bf16.mxu1 %vm518_vm1, %v4292_v27 }
 0xb3b   :  { %v4294_v9 = vpop.permute.xlu1 %4293 }
 0xb3c   :  { %5064 = vmatmul.mubr.msk.bf16.gmra.mrb[132].mxu1 %vm518_vm1, %v4294_v9 }
 0xb43   :  { %v4296_v38 = vpop.permute.xlu0 %4295 }
 0xb44   :  { %5067 = vmatprep.mubr.msk.bf16.mxu1 %vm518_vm1, %v4296_v38 }
 0xb4b   :  { %v4298_v61 = vpop.permute.xlu1 %4297 }
 0xb4c   :  { %5068 = vmatmul.mubr.msk.bf16.gmra.mrb[136].mxu1 %vm518_vm1, %v4298_v61 }
 0xb53   :  { %v4300_v23 = vpop.permute.xlu0 %4299 }
 0xb54   :  { %5071 = vmatprep.mubr.msk.bf16.mxu1 %vm518_vm1, %v4300_v23 }
 0xb5b   :  { %v4302_v62 = vpop.permute.xlu1 %4301 }
 0xb5c   :  { %5072 = vmatmul.mubr.msk.bf16.gmra.mrb[140].mxu1 %vm518_vm1, %v4302_v62 }
 0xb63   :  { %v4304_v48 = vpop.permute.xlu0 %4303 }
 0xb64   :  { %5075 = vmatprep.mubr.msk.bf16.mxu1 %vm518_vm1, %v4304_v48 }
 0xb6b   :  { %v4306_v6 = vpop.permute.xlu1 %4305 }
 0xb6c   :  { %5076 = vmatmul.mubr.msk.bf16.gmra.mrb[144].mxu1 %vm518_vm1, %v4306_v6 }
 0xb73   :  { %v4308_v18 = vpop.permute.xlu0 %4307 }
 0xb74   :  { %5079 = vmatprep.mubr.msk.bf16.mxu1 %vm518_vm1, %v4308_v18 }
 0xb7b   :  { %v4310_v26 = vpop.permute.xlu1 %4309 }
 0xb7c   :  { %5080 = vmatmul.mubr.msk.bf16.gmra.mrb[148].mxu1 %vm518_vm1, %v4310_v26 }
 0xb83   :  { %v4312_v17 = vpop.permute.xlu0 %4311 }
 0xb84   :  { %5083 = vmatprep.mubr.msk.bf16.mxu1 %vm518_vm1, %v4312_v17 }
 0xb8b   :  { %v4314_v42 = vpop.permute.xlu1 %4313 }
 0xb8c   :  { %5084 = vmatmul.mubr.msk.bf16.gmra.mrb[152].mxu1 %vm518_vm1, %v4314_v42 }
 0xb93   :  { %v4316_v0 = vpop.permute.xlu0 %4315 }
 0xb94   :  { %5087 = vmatprep.mubr.msk.bf16.mxu1 %vm518_vm1, %v4316_v0 }
 0xb9b   :  { %v4318_v20 = vpop.permute.xlu1 %4317 }
 0xb9c   :  { %5088 = vmatmul.mubr.msk.bf16.gmra.mrb[156].mxu1 %vm518_vm1, %v4318_v20 }
 0xbff   :  { %v5061_v55 = vpop.f32.mrb[128].mxu1 }
 0xc00   :  { %v4434_v4 = vadd.f32 %v5061_v55, %v8324_v3  ;;  %v4425_v32 = vpop.f32.mrb[129].mxu1 }
 0xc01   :  { %v4426_v43 = vadd.f32 %v8324_v3, %v4425_v32  ;;  %v5062_v53 = vpop.f32.mrb[130].mxu1 }
 0xc02   :  { %4554 = vst [vmem:[#allocation7 + $0x10] sm:$0xff] %v4434_v4  ;;  %v4437_v63 = vadd.f32 %v5062_v53, %v8324_v3  ;;  %v4428_v21 = vpop.f32.mrb[131].mxu1 }
 0xc03   :  { %4552 = vst [vmem:[#allocation7] sm:$0xff] %v4426_v43  ;;  %v4429_v33 = vadd.f32 %v8324_v3, %v4428_v21 }
 0xc04   :  { %4555 = vst [vmem:[#allocation7 + $0x18] sm:$0xff] %v4437_v63 }
 0xc05   :  { %4553 = vst [vmem:[#allocation7 + $0x8] sm:$0xff] %v4429_v33 }
 0xc0f   :  { %v5065_v1 = vpop.f32.mrb[132].mxu1 }
 0xc10   :  { %v4450_v51 = vadd.f32 %v5065_v1, %v8324_v3  ;;  %v4441_v45 = vpop.f32.mrb[133].mxu1 }
 0xc11   :  { %v4442_v40 = vadd.f32 %v8324_v3, %v4441_v45  ;;  %v5066_v36 = vpop.f32.mrb[134].mxu1 }
 0xc12   :  { %4558 = vst [vmem:[#allocation7 + $0x30] sm:$0xff] %v4450_v51  ;;  %v4453_v49 = vadd.f32 %v5066_v36, %v8324_v3  ;;  %v4444_v59 = vpop.f32.mrb[135].mxu1 }
 0xc13   :  { %4556 = vst [vmem:[#allocation7 + $0x20] sm:$0xff] %v4442_v40  ;;  %v4445_v56 = vadd.f32 %v8324_v3, %v4444_v59 }
 0xc14   :  { %4559 = vst [vmem:[#allocation7 + $0x38] sm:$0xff] %v4453_v49 }
 0xc15   :  { %4557 = vst [vmem:[#allocation7 + $0x28] sm:$0xff] %v4445_v56 }
 0xc1f   :  { %v5069_v24 = vpop.f32.mrb[136].mxu1 }
 0xc20   :  { %v4466_v31 = vadd.f32 %v5069_v24, %v8324_v3  ;;  %v4457_v44 = vpop.f32.mrb[137].mxu1 }
 0xc21   :  { %v4458_v58 = vadd.f32 %v8324_v3, %v4457_v44  ;;  %v5070_v41 = vpop.f32.mrb[138].mxu1 }
 0xc22   :  { %4562 = vst [vmem:[#allocation7 + $0x50] sm:$0xff] %v4466_v31  ;;  %v4469_v11 = vadd.f32 %v5070_v41, %v8324_v3  ;;  %v4460_v34 = vpop.f32.mrb[139].mxu1 }
 0xc23   :  { %4560 = vst [vmem:[#allocation7 + $0x40] sm:$0xff] %v4458_v58  ;;  %v4461_v46 = vadd.f32 %v8324_v3, %v4460_v34 }
 0xc24   :  { %4563 = vst [vmem:[#allocation7 + $0x58] sm:$0xff] %v4469_v11 }
 0xc25   :  { %4561 = vst [vmem:[#allocation7 + $0x48] sm:$0xff] %v4461_v46 }
 0xc2f   :  { %v5073_v25 = vpop.f32.mrb[140].mxu1 }
 0xc30   :  { %v4482_v8 = vadd.f32 %v5073_v25, %v8324_v3  ;;  %v4473_v2 = vpop.f32.mrb[141].mxu1 }
 0xc31   :  { %v4474_v54 = vadd.f32 %v8324_v3, %v4473_v2  ;;  %v5074_v14 = vpop.f32.mrb[142].mxu1 }
 0xc32   :  { %4566 = vst [vmem:[#allocation7 + $0x70] sm:$0xff] %v4482_v8  ;;  %v4485_v10 = vadd.f32 %v5074_v14, %v8324_v3  ;;  %v4476_v13 = vpop.f32.mrb[143].mxu1 }
 0xc33   :  { %4564 = vst [vmem:[#allocation7 + $0x60] sm:$0xff] %v4474_v54  ;;  %v4477_v22 = vadd.f32 %v8324_v3, %v4476_v13 }
 0xc34   :  { %4567 = vst [vmem:[#allocation7 + $0x78] sm:$0xff] %v4485_v10 }
 0xc35   :  { %4565 = vst [vmem:[#allocation7 + $0x68] sm:$0xff] %v4477_v22 }
 0xc3f   :  { %v5077_v57 = vpop.f32.mrb[144].mxu1 }
 0xc40   :  { %v4498_v30 = vadd.f32 %v5077_v57, %v8324_v3  ;;  %v4489_v47 = vpop.f32.mrb[145].mxu1 }
 0xc41   :  { %v4490_v7 = vadd.f32 %v8324_v3, %v4489_v47  ;;  %v5078_v28 = vpop.f32.mrb[146].mxu1 }
 0xc42   :  { %4570 = vst [vmem:[#allocation7 + $0x90] sm:$0xff] %v4498_v30  ;;  %v4501_v39 = vadd.f32 %v5078_v28, %v8324_v3  ;;  %v4492_v37 = vpop.f32.mrb[147].mxu1 }
 0xc43   :  { %4568 = vst [vmem:[#allocation7 + $0x80] sm:$0xff] %v4490_v7  ;;  %v4493_v12 = vadd.f32 %v8324_v3, %v4492_v37 }
 0xc44   :  { %4571 = vst [vmem:[#allocation7 + $0x98] sm:$0xff] %v4501_v39 }
 0xc45   :  { %4569 = vst [vmem:[#allocation7 + $0x88] sm:$0xff] %v4493_v12 }
 0xc4f   :  { %v5081_v50 = vpop.f32.mrb[148].mxu1 }
 0xc50   :  { %v4514_v16 = vadd.f32 %v5081_v50, %v8324_v3  ;;  %v4505_v52 = vpop.f32.mrb[149].mxu1 }
 0xc51   :  { %v4506_v5 = vadd.f32 %v8324_v3, %v4505_v52  ;;  %v5082_v35 = vpop.f32.mrb[150].mxu1 }
 0xc52   :  { %4574 = vst [vmem:[#allocation7 + $0xb0] sm:$0xff] %v4514_v16  ;;  %v4517_v29 = vadd.f32 %v5082_v35, %v8324_v3  ;;  %v4508_v19 = vpop.f32.mrb[151].mxu1 }
 0xc53   :  { %4572 = vst [vmem:[#allocation7 + $0xa0] sm:$0xff] %v4506_v5  ;;  %v4509_v15 = vadd.f32 %v8324_v3, %v4508_v19 }
 0xc54   :  { %4575 = vst [vmem:[#allocation7 + $0xb8] sm:$0xff] %v4517_v29 }
 0xc55   :  { %4573 = vst [vmem:[#allocation7 + $0xa8] sm:$0xff] %v4509_v15 }
 0xc5f   :  { %v5085_v60 = vpop.f32.mrb[152].mxu1 }
 0xc60   :  { %v4530_v27 = vadd.f32 %v5085_v60, %v8324_v3  ;;  %v4521_v9 = vpop.f32.mrb[153].mxu1 }
 0xc61   :  { %v4522_v38 = vadd.f32 %v8324_v3, %v4521_v9  ;;  %v5086_v61 = vpop.f32.mrb[154].mxu1 }
 0xc62   :  { %4578 = vst [vmem:[#allocation7 + $0xd0] sm:$0xff] %v4530_v27  ;;  %v4533_v23 = vadd.f32 %v5086_v61, %v8324_v3  ;;  %v4524_v62 = vpop.f32.mrb[155].mxu1 }
 0xc63   :  { %4576 = vst [vmem:[#allocation7 + $0xc0] sm:$0xff] %v4522_v38  ;;  %v4525_v48 = vadd.f32 %v8324_v3, %v4524_v62 }
 0xc64   :  { %4579 = vst [vmem:[#allocation7 + $0xd8] sm:$0xff] %v4533_v23 }
 0xc65   :  { %4577 = vst [vmem:[#allocation7 + $0xc8] sm:$0xff] %v4525_v48 }
 0xc6f   :  { %v5089_v6 = vpop.f32.mrb[156].mxu1 }
 0xc70   :  { %v4546_v18 = vadd.f32 %v5089_v6, %v8324_v3  ;;  %v4537_v26 = vpop.f32.mrb[157].mxu1 }
 0xc71   :  { %v4538_v17 = vadd.f32 %v8324_v3, %v4537_v26  ;;  %v5090_v42 = vpop.f32.mrb[158].mxu1 }
 0xc72   :  { %4582 = vst [vmem:[#allocation7 + $0xf0] sm:$0xff] %v4546_v18  ;;  %v4549_v0 = vadd.f32 %v5090_v42, %v8324_v3  ;;  %v4540_v20 = vpop.f32.mrb[159].mxu1 }
 0xc73   :  { %4580 = vst [vmem:[#allocation7 + $0xe0] sm:$0xff] %v4538_v17  ;;  %v4541_v55 = vadd.f32 %v8324_v3, %v4540_v20 }
 0xc74   :  { %4583 = vst [vmem:[#allocation7 + $0xf8] sm:$0xff] %v4549_v0 }
 0xc75   :  { %4581 = vst [vmem:[#allocation7 + $0xe8] sm:$0xff] %v4541_v55 }
 0xc76   :  { %5407 = shalt.err (!%p5404_p6)
}
 0xc77   :  { %s5408_s27 = scalar_lea.hbm %s8383_s10, 4096 }
 0xc78   :  { %p5409_p7 = scmp.ne.s32.totalorder %s8383_s10, %s5408_s27  ;;  %p5412_p8 = scmp.lt.u32.totalorder %s5408_s27, %s8383_s10 }
 0xc7a   :  { %p5414_p9 = pnand %p5412_p8, %p5409_p7 }
 0xc7c   :  { %5417 = shalt.err (!%p5414_p9)
}
 0xc7d   :  { %4595 = dma.vmem_to_hbm [thread:$0]  %s4590_s22, 4096, %s8383_s10, [#allocation4], %s5425_s23, %s5425_s23, %s5426_s24  }
 0xc7e   :  { %5422 = dma.done.wait [#allocation4], 4096  }
 0xc7f   :  { %5423 = vsyncadd [#allocation4], 4294963200 }
 0xc80   :  { %4599 = vsyncpa [#allocation3], 1 }
 0xc81   :  { %4600 = vsyncpa [#allocation6], 1 }
 0xc82   :  { %4601 = vsyncpa [#allocation4], 1 }

</bundles_post_ra>
